<compile_context>
chip_gen: v5e
topology: v5e:2x2
jax: 0.10.0
libtpu: 0.0.40
codegen_flags: <defaults>
</compile_context>

<pallas_src>
import functools

import jax
import jax.numpy as jnp
from jax.experimental import pallas as pl
from jax.experimental.pallas import tpu as pltpu

EMBED_DIM = 512
NUM_HEADS = 8
HEAD_DIM = EMBED_DIM // NUM_HEADS


# ----------------------------------------------------------------------------
# Tiled linear:  y = x @ Wt + b   (Wt already (E, O), possibly bf16)
# ----------------------------------------------------------------------------
def _pick_tile_m(m, target=512):
    # Largest M-tile that keeps the (8,128) block rule happy and VMEM modest
    # (f32 activations, E/O <= 1024  ->  <= ~4 MiB per buffer at tile 512).
    if m <= target:
        return m
    for t in (target, 256, 128, 64, 32, 16, 8):
        if m % t == 0:
            return t
    return m


def _linear_kernel(x_ref, wt_ref, b_ref, o_ref):
    w = wt_ref[...]
    x = x_ref[...].astype(w.dtype)          # cast MXU operand at the boundary
    acc = jnp.dot(x, w, preferred_element_type=jnp.float32)
    o_ref[...] = (acc + b_ref[...]).astype(o_ref.dtype)


def linear(x, wt, b2):
    """x: (M, E) f32, wt: (E, O) [bf16|f32], b2: (1, O) f32 -> (M, O) f32."""
    M, E = x.shape
    O = wt.shape[1]
    tm = _pick_tile_m(M)
    wbytes = wt.size * wt.dtype.itemsize
    cost = pl.CostEstimate(
        flops=2 * M * E * O,
        transcendentals=0,
        bytes_accessed=4 * M * E + wbytes + 4 * M * O + 4 * O,
    )
    return pl.pallas_call(
        _linear_kernel,
        out_shape=jax.ShapeDtypeStruct((M, O), jnp.float32),
        grid=(pl.cdiv(M, tm),),
        in_specs=[
            pl.BlockSpec((tm, E), lambda i: (i, 0)),
            pl.BlockSpec((E, O), lambda i: (0, 0)),   # weight resident
            pl.BlockSpec((1, O), lambda i: (0, 0)),
        ],
        out_specs=pl.BlockSpec((tm, O), lambda i: (i, 0)),
        compiler_params=pltpu.CompilerParams(dimension_semantics=("parallel",)),
        cost_estimate=cost,
    )(x, wt, b2)


# ----------------------------------------------------------------------------
# Fused attention (+ output projection) kernel: one grid step per batch.
# ----------------------------------------------------------------------------
def _attn_kernel(q_ref, kv_ref, wo_ref, bo_ref, *rest, num_heads, scale,
                 has_bias):
    if has_bias:
        bias_ref, o_ref = rest
    else:
        (o_ref,) = rest

    Sx, E = q_ref.shape[1], q_ref.shape[2]
    Se = kv_ref.shape[1]
    H = num_heads
    Dh = E // H
    cdt = wo_ref.dtype                      # MXU compute dtype (bf16 or f32)

    # Lane-dense loads; head split happens in-register (no HBM transposes).
    q = q_ref[0].astype(cdt)                # (Sx, E)
    k = kv_ref[0, :, :E].astype(cdt)        # (Se, E)
    v = kv_ref[0, :, E:].astype(cdt)        # (Se, E)

    qh = jnp.swapaxes(q.reshape(Sx, H, Dh), 0, 1)    # (H, Sx, Dh)
    kh = jnp.swapaxes(k.reshape(Se, H, Dh), 0, 1)    # (H, Se, Dh)
    vh = jnp.swapaxes(v.reshape(Se, H, Dh), 0, 1)    # (H, Se, Dh)

    # Batched (all heads at once) scores; f32 accumulation + f32 softmax math.
    s = jnp.einsum("hqd,hkd->hqk", qh, kh,
                   preferred_element_type=jnp.float32) * scale    # (H, Sx, Se)
    if has_bias:
        s = s + bias_ref[0][None]           # (1,1,Se) additive 0 / -inf bias

    # NOTE: a fully-masked row yields NaN, matching PyTorch nn.MultiheadAttention.
    m = jnp.max(s, axis=-1, keepdims=True)
    p = jnp.exp(s - m)
    denom = jnp.sum(p, axis=-1, keepdims=True)
    inv = pl.reciprocal(denom, approx=True)           # EUP slot, off the VALU

    o = jnp.einsum("hqk,hkd->hqd", p.astype(cdt), vh,
                   preferred_element_type=jnp.float32)            # (H, Sx, Dh)
    o = o * inv
    o = jnp.swapaxes(o, 0, 1).reshape(Sx, E)          # lane-dense (Sx, 512)

    # Fused output projection (weight resident across the batch grid).
    out = jnp.dot(o.astype(cdt), wo_ref[...],
                  preferred_element_type=jnp.float32) + bo_ref[...]
    o_ref[0] = out.astype(o_ref.dtype)


def attention(q, kv, wo_t, bo2, bias=None):
    """q: (B,Sx,E), kv: (B,Se,2E), wo_t: (E,E), bo2: (1,E),
    bias: optional (B,1,Se) additive f32 mask bias -> (B,Sx,E)."""
    B, Sx, E = q.shape
    Se = kv.shape[1]
    H, Dh = NUM_HEADS, E // NUM_HEADS
    has_bias = bias is not None

    kern = functools.partial(_attn_kernel, num_heads=H,
                             scale=1.0 / (Dh ** 0.5), has_bias=has_bias)
    in_specs = [
        pl.BlockSpec((1, Sx, E), lambda b: (b, 0, 0)),
        pl.BlockSpec((1, Se, 2 * E), lambda b: (b, 0, 0)),
        pl.BlockSpec((E, E), lambda b: (0, 0)),
        pl.BlockSpec((1, E), lambda b: (0, 0)),
    ]
    args = [q, kv, wo_t, bo2]
    if has_bias:
        in_specs.append(pl.BlockSpec((1, 1, Se), lambda b: (b, 0, 0)))
        args.append(bias)

    wbytes = wo_t.size * wo_t.dtype.itemsize
    cost = pl.CostEstimate(
        flops=B * (4 * H * Sx * Se * Dh + 2 * Sx * E * E),
        transcendentals=B * H * Sx * (Se + 1),
        bytes_accessed=8 * B * Sx * E + 8 * B * Se * E + wbytes + 4 * E,
    )
    return pl.pallas_call(
        kern,
        out_shape=jax.ShapeDtypeStruct((B, Sx, E), jnp.float32),
        grid=(B,),
        in_specs=in_specs,
        out_specs=pl.BlockSpec((1, Sx, E), lambda b: (b, 0, 0)),
        compiler_params=pltpu.CompilerParams(dimension_semantics=("parallel",)),
        cost_estimate=cost,
    )(*args)


# ----------------------------------------------------------------------------
# Parameter prep (one-time) + module forward
# ----------------------------------------------------------------------------
def prepare_params(params, mxu_dtype=jnp.bfloat16):
    """Pre-transpose / fuse weights once, cast MXU operands to mxu_dtype.
    Biases stay f32 (added after f32 accumulation)."""
    E = params["out_proj_weight"].shape[0]
    wq, wk, wv = jnp.split(params["in_proj_weight"], 3, axis=0)   # (E, E) each
    bq, bk, bv = jnp.split(params["in_proj_bias"], 3, axis=0)
    wkv = jnp.concatenate([wk, wv], axis=0)                        # (2E, E)
    bkv = jnp.concatenate([bk, bv], axis=0)                        # (2E,)
    return {
        "wq_t": jnp.transpose(wq).astype(mxu_dtype),               # (E, E)
        "bq": bq.reshape(1, E).astype(jnp.float32),
        "wkv_t": jnp.transpose(wkv).astype(mxu_dtype),             # (E, 2E)
        "bkv": bkv.reshape(1, 2 * E).astype(jnp.float32),
        "wo_t": jnp.transpose(params["out_proj_weight"]).astype(mxu_dtype),
        "bo": params["out_proj_bias"].reshape(1, E).astype(jnp.float32),
    }


def mha_encoder_decoder_attention(x, encoded, prepared, mask=None):
    """x: (B, Sx, E), encoded: (B, Se, E), mask: optional bool (B, Se)
    with True = masked-out encoder position (torch bool attn_mask)."""
    B, Sx, E = x.shape
    Se = encoded.shape[1]

    q = linear(x.reshape(B * Sx, E), prepared["wq_t"],
               prepared["bq"]).reshape(B, Sx, E)
    kv = linear(encoded.reshape(B * Se, E), prepared["wkv_t"],
                prepared["bkv"]).reshape(B, Se, 2 * E)

    bias = None
    if mask is not None:
        # tiny (B, 1, Se) additive bias; broadcast over heads/queries in-kernel
        bias = jnp.where(mask, -jnp.inf, 0.0).astype(jnp.float32).reshape(B, 1, Se)

    return attention(q, kv, prepared["wo_t"], prepared["bo"], bias)


# ----------------------------------------------------------------------------
# Pure-JAX reference (PyTorch-equivalent semantics)
# ----------------------------------------------------------------------------
def reference(x, encoded, params, mask=None):
    B, Sx, E = x.shape
    Se = encoded.shape[1]
    H, Dh = NUM_HEADS, E // NUM_HEADS
    wq, wk, wv = jnp.split(params["in_proj_weight"], 3, axis=0)
    bq, bk, bv = jnp.split(params["in_proj_bias"], 3, axis=0)
    q = x @ wq.T + bq
    k = encoded @ wk.T + bk
    v = encoded @ wv.T + bv
    q = q.reshape(B, Sx, H, Dh).transpose(0, 2, 1, 3)
    k = k.reshape(B, Se, H, Dh).transpose(0, 2, 1, 3)
    v = v.reshape(B, Se, H, Dh).transpose(0, 2, 1, 3)
    s = jnp.einsum("bhqd,bhkd->bhqk", q, k) / (Dh ** 0.5)
    if mask is not None:
        s = s + jnp.where(mask[:, None, None, :], -jnp.inf, 0.0)
    p = jax.nn.softmax(s, axis=-1)
    o = jnp.einsum("bhqk,bhkd->bhqd", p, v)
    o = o.transpose(0, 2, 1, 3).reshape(B, Sx, E)
    return o @ params["out_proj_weight"].T + params["out_proj_bias"]


def init_params(key, embed_dim=EMBED_DIM):
    k1, k2, k3, k4 = jax.random.split(key, 4)
    scale = 1.0 / (embed_dim ** 0.5)
    return {
        "in_proj_weight": jax.random.normal(k1, (3 * embed_dim, embed_dim),
                                            jnp.float32) * scale,
        "in_proj_bias": jax.random.normal(k2, (3 * embed_dim,),
                                          jnp.float32) * 0.02,
        "out_proj_weight": jax.random.normal(k3, (embed_dim, embed_dim),
                                             jnp.float32) * scale,
        "out_proj_bias": jax.random.normal(k4, (embed_dim,),
                                           jnp.float32) * 0.02,
    }


# ----------------------------------------------------------------------------
if __name__ == "__main__":
    key = jax.random.PRNGKey(0)
    kx, ke, kp = jax.random.split(key, 3)

    B, Sx, Se = 2, 8, 16
    x = jax.random.normal(kx, (B, Sx, EMBED_DIM), jnp.float32)
    encoded = jax.random.normal(ke, (B, Se, EMBED_DIM), jnp.float32)
    params = init_params(kp)

    fwd = jax.jit(mha_encoder_decoder_attention)
    ref = jax.block_until_ready(reference(x, encoded, params))

    # Default perf path: bf16 MXU operands, f32 accumulation + f32 softmax.
    prep_bf16 = prepare_params(params, jnp.bfloat16)
    out = jax.block_until_ready(fwd(x, encoded, prep_bf16))
    assert out.shape == (B, Sx, EMBED_DIM)
    assert jnp.allclose(out, ref, rtol=5e-2, atol=5e-2), "bf16 path mismatch"

    # Full-f32 path: tighter structural correctness check.
    prep_f32 = prepare_params(params, jnp.float32)
    out32 = jax.block_until_ready(fwd(x, encoded, prep_f32))
    assert jnp.allclose(out32, ref, rtol=2e-2, atol=2e-2), "f32 path mismatch"

    # Masked path (partially masked rows; fully-masked rows NaN like PyTorch).
    mask = jnp.zeros((B, Se), jnp.bool_).at[0, Se - 4:].set(True)
    outm = jax.block_until_ready(fwd(x, encoded, prep_bf16, mask))
    refm = jax.block_until_ready(reference(x, encoded, params, mask))
    assert jnp.allclose(outm, refm, rtol=5e-2, atol=5e-2), "masked path mismatch"

    print("KERNEL_OK")
</pallas_src>

<mosaic_0001>
module attributes {stable_mosaic.version = 11 : i64} {
  func.func @_linear_kernel(%arg0: i32, %arg1: memref<16x512xf32, #tpu.memory_space<vmem>>, %arg2: memref<512x512xbf16, #tpu.memory_space<vmem>>, %arg3: memref<1x512xf32, #tpu.memory_space<vmem>>, %arg4: memref<16x512xf32, #tpu.memory_space<vmem>>) attributes {dimension_semantics = [#tpu.dimension_semantics<parallel>], iteration_bounds = array<i64: 1>, scalar_prefetch = 0 : i64, scratch_operands = 0 : i64, tpu.core_type = #tpu.core_type<tc>, window_params = [{transform_indices = @transform_0, window_bounds = array<i64: 16, 512>}, {pipeline_mode = #tpu.pipeline_mode<synchronous>, transform_indices = @transform_1, window_bounds = array<i64: 512, 512>}, {pipeline_mode = #tpu.pipeline_mode<synchronous>, transform_indices = @transform_2, window_bounds = array<i64: 1, 512>}, {transform_indices = @transform_3, window_bounds = array<i64: 16, 512>}]} {
    %c0 = arith.constant 0 : index
    %c0_0 = arith.constant 0 : index
    %0 = vector.load %arg2[%c0, %c0_0] : memref<512x512xbf16, #tpu.memory_space<vmem>>, vector<512x512xbf16>
    %c0_1 = arith.constant 0 : index
    %c0_2 = arith.constant 0 : index
    %1 = vector.load %arg1[%c0_1, %c0_2] : memref<16x512xf32, #tpu.memory_space<vmem>>, vector<16x512xf32>
    %2 = arith.truncf %1 : vector<16x512xf32> to vector<16x512xbf16>
    %cst = arith.constant dense<0.000000e+00> : vector<16x512xf32>
    %3 = tpu.matmul %2, %0, %cst {dimension_numbers = #tpu.dot_dimension_numbers<[1], [0], [0], [1], [0, 0, 1, 1], [], []>} : vector<16x512xbf16>, vector<512x512xbf16>, vector<16x512xf32> -> vector<16x512xf32>
    %c0_3 = arith.constant 0 : index
    %c0_4 = arith.constant 0 : index
    %4 = vector.load %arg3[%c0_3, %c0_4] : memref<1x512xf32, #tpu.memory_space<vmem>>, vector<1x512xf32>
    %5 = vector.broadcast %4 : vector<1x512xf32> to vector<16x512xf32>
    %6 = arith.addf %3, %5 : vector<16x512xf32>
    %c0_5 = arith.constant 0 : index
    %c0_6 = arith.constant 0 : index
    %7 = vector.load %arg4[%c0_5, %c0_6] : memref<16x512xf32, #tpu.memory_space<vmem>>, vector<16x512xf32>
    tpu.vector_store %arg4[%c0_5, %c0_6], %6 {strides = array<i32>} : memref<16x512xf32, #tpu.memory_space<vmem>>, vector<16x512xf32>,
    return
  }
  func.func @transform_0(%arg0: i32) -> (i32, i32) {
    %c0_i32 = arith.constant 0 : i32
    %c0_i32_0 = arith.constant 0 : i32
    return %arg0, %c0_i32 : i32, i32
  }
  func.func @transform_1(%arg0: i32) -> (i32, i32) {
    %c0_i32 = arith.constant 0 : i32
    %c0_i32_0 = arith.constant 0 : i32
    %c0_i32_1 = arith.constant 0 : i32
    return %c0_i32, %c0_i32_0 : i32, i32
  }
  func.func @transform_2(%arg0: i32) -> (i32, i32) {
    %c0_i32 = arith.constant 0 : i32
    %c0_i32_0 = arith.constant 0 : i32
    %c0_i32_1 = arith.constant 0 : i32
    return %c0_i32, %c0_i32_0 : i32, i32
  }
  func.func @transform_3(%arg0: i32) -> (i32, i32) {
    %c0_i32 = arith.constant 0 : i32
    %c0_i32_0 = arith.constant 0 : i32
    return %arg0, %c0_i32 : i32, i32
  }
}

module attributes {stable_mosaic.version = 11 : i64} {
  func.func @_linear_kernel(%arg0: i32, %arg1: memref<32x512xf32, #tpu.memory_space<vmem>>, %arg2: memref<512x1024xbf16, #tpu.memory_space<vmem>>, %arg3: memref<1x1024xf32, #tpu.memory_space<vmem>>, %arg4: memref<32x1024xf32, #tpu.memory_space<vmem>>) attributes {dimension_semantics = [#tpu.dimension_semantics<parallel>], iteration_bounds = array<i64: 1>, scalar_prefetch = 0 : i64, scratch_operands = 0 : i64, tpu.core_type = #tpu.core_type<tc>, window_params = [{transform_indices = @transform_0, window_bounds = array<i64: 32, 512>}, {pipeline_mode = #tpu.pipeline_mode<synchronous>, transform_indices = @transform_1, window_bounds = array<i64: 512, 1024>}, {pipeline_mode = #tpu.pipeline_mode<synchronous>, transform_indices = @transform_2, window_bounds = array<i64: 1, 1024>}, {transform_indices = @transform_3, window_bounds = array<i64: 32, 1024>}]} {
    %c0 = arith.constant 0 : index
    %c0_0 = arith.constant 0 : index
    %0 = vector.load %arg2[%c0, %c0_0] : memref<512x1024xbf16, #tpu.memory_space<vmem>>, vector<512x1024xbf16>
    %c0_1 = arith.constant 0 : index
    %c0_2 = arith.constant 0 : index
    %1 = vector.load %arg1[%c0_1, %c0_2] : memref<32x512xf32, #tpu.memory_space<vmem>>, vector<32x512xf32>
    %2 = arith.truncf %1 : vector<32x512xf32> to vector<32x512xbf16>
    %cst = arith.constant dense<0.000000e+00> : vector<32x1024xf32>
    %3 = tpu.matmul %2, %0, %cst {dimension_numbers = #tpu.dot_dimension_numbers<[1], [0], [0], [1], [0, 0, 1, 1], [], []>} : vector<32x512xbf16>, vector<512x1024xbf16>, vector<32x1024xf32> -> vector<32x1024xf32>
    %c0_3 = arith.constant 0 : index
    %c0_4 = arith.constant 0 : index
    %4 = vector.load %arg3[%c0_3, %c0_4] : memref<1x1024xf32, #tpu.memory_space<vmem>>, vector<1x1024xf32>
    %5 = vector.broadcast %4 : vector<1x1024xf32> to vector<32x1024xf32>
    %6 = arith.addf %3, %5 : vector<32x1024xf32>
    %c0_5 = arith.constant 0 : index
    %c0_6 = arith.constant 0 : index
    %7 = vector.load %arg4[%c0_5, %c0_6] : memref<32x1024xf32, #tpu.memory_space<vmem>>, vector<32x1024xf32>
    tpu.vector_store %arg4[%c0_5, %c0_6], %6 {strides = array<i32>} : memref<32x1024xf32, #tpu.memory_space<vmem>>, vector<32x1024xf32>,
    return
  }
  func.func @transform_0(%arg0: i32) -> (i32, i32) {
    %c0_i32 = arith.constant 0 : i32
    %c0_i32_0 = arith.constant 0 : i32
    return %arg0, %c0_i32 : i32, i32
  }
  func.func @transform_1(%arg0: i32) -> (i32, i32) {
    %c0_i32 = arith.constant 0 : i32
    %c0_i32_0 = arith.constant 0 : i32
    %c0_i32_1 = arith.constant 0 : i32
    return %c0_i32, %c0_i32_0 : i32, i32
  }
  func.func @transform_2(%arg0: i32) -> (i32, i32) {
    %c0_i32 = arith.constant 0 : i32
    %c0_i32_0 = arith.constant 0 : i32
    %c0_i32_1 = arith.constant 0 : i32
    return %c0_i32, %c0_i32_0 : i32, i32
  }
  func.func @transform_3(%arg0: i32) -> (i32, i32) {
    %c0_i32 = arith.constant 0 : i32
    %c0_i32_0 = arith.constant 0 : i32
    return %arg0, %c0_i32 : i32, i32
  }
}

module attributes {stable_mosaic.version = 11 : i64} {
  func.func @_attn_kernel(%arg0: i32, %arg1: memref<1x8x512xf32, #tpu.memory_space<vmem>>, %arg2: memref<1x16x1024xf32, #tpu.memory_space<vmem>>, %arg3: memref<512x512xbf16, #tpu.memory_space<vmem>>, %arg4: memref<1x512xf32, #tpu.memory_space<vmem>>, %arg5: memref<1x8x512xf32, #tpu.memory_space<vmem>>) attributes {dimension_semantics = [#tpu.dimension_semantics<parallel>], iteration_bounds = array<i64: 2>, scalar_prefetch = 0 : i64, scratch_operands = 0 : i64, tpu.core_type = #tpu.core_type<tc>, window_params = [{transform_indices = @transform_0, window_bounds = array<i64: 1, 8, 512>}, {transform_indices = @transform_1, window_bounds = array<i64: 1, 16, 1024>}, {pipeline_mode = #tpu.pipeline_mode<synchronous>, transform_indices = @transform_2, window_bounds = array<i64: 512, 512>}, {pipeline_mode = #tpu.pipeline_mode<synchronous>, transform_indices = @transform_3, window_bounds = array<i64: 1, 512>}, {transform_indices = @transform_4, window_bounds = array<i64: 1, 8, 512>}]} {
    %c0 = arith.constant 0 : index
    %c0_0 = arith.constant 0 : index
    %c0_1 = arith.constant 0 : index
    %0 = vector.load %arg1[%c0, %c0_0, %c0_1] : memref<1x8x512xf32, #tpu.memory_space<vmem>>, vector<1x8x512xf32>
    %1 = vector.shape_cast %0 : vector<1x8x512xf32> to vector<8x512xf32>
    %2 = arith.truncf %1 : vector<8x512xf32> to vector<8x512xbf16>
    %c0_2 = arith.constant 0 : index
    %c0_3 = arith.constant 0 : index
    %c0_4 = arith.constant 0 : index
    %3 = vector.load %arg2[%c0_2, %c0_3, %c0_4] : memref<1x16x1024xf32, #tpu.memory_space<vmem>>, vector<1x16x512xf32>
    %4 = vector.shape_cast %3 : vector<1x16x512xf32> to vector<16x512xf32>
    %5 = arith.truncf %4 : vector<16x512xf32> to vector<16x512xbf16>
    %c0_5 = arith.constant 0 : index
    %c0_6 = arith.constant 0 : index
    %c512 = arith.constant 512 : index
    %6 = vector.load %arg2[%c0_5, %c0_6, %c512] : memref<1x16x1024xf32, #tpu.memory_space<vmem>>, vector<1x16x512xf32>
    %7 = vector.shape_cast %6 : vector<1x16x512xf32> to vector<16x512xf32>
    %8 = arith.truncf %7 : vector<16x512xf32> to vector<16x512xbf16>
    %9 = vector.shape_cast %2 : vector<8x512xbf16> to vector<8x8x64xbf16>
    %10 = tpu.transpose %9, [1, 0, 2] : vector<8x8x64xbf16> -> vector<8x8x64xbf16>
    %11 = vector.shape_cast %5 : vector<16x512xbf16> to vector<16x8x64xbf16>
    %12 = tpu.transpose %11, [1, 0, 2] : vector<16x8x64xbf16> -> vector<8x16x64xbf16>
    %13 = vector.shape_cast %8 : vector<16x512xbf16> to vector<16x8x64xbf16>
    %14 = tpu.transpose %13, [1, 0, 2] : vector<16x8x64xbf16> -> vector<8x16x64xbf16>
    "tpu.trace_start"() <{level = 10 : i32, message = "hqd,hkd->hqk"}> : () -> ()
    %cst = arith.constant dense<0.000000e+00> : vector<8x8x16xf32>
    %15 = tpu.matmul %10, %12, %cst {dimension_numbers = #tpu.dot_dimension_numbers<[2], [2], [1], [1], [0, 0, 0, 1, 1, 1], [0], [0]>} : vector<8x8x64xbf16>, vector<8x16x64xbf16>, vector<8x8x16xf32> -> vector<8x8x16xf32>
    "tpu.trace_stop"() : () -> ()
    %cst_7 = arith.constant 1.250000e-01 : f32
    %16 = vector.broadcast %cst_7 : f32 to vector<8x8x16xf32>
    %17 = arith.mulf %15, %16 : vector<8x8x16xf32>
    %cst_8 = arith.constant dense<0xFF800000> : vector<8x8xf32>
    %18 = vector.multi_reduction <maximumf>, %17, %cst_8 [2] : vector<8x8x16xf32> to vector<8x8xf32>
    %19 = vector.shape_cast %18 : vector<8x8xf32> to vector<8x8x1xf32>
    %20 = vector.broadcast %19 : vector<8x8x1xf32> to vector<8x8x16xf32>
    %21 = arith.subf %17, %20 : vector<8x8x16xf32>
    %22 = math.exp %21 : vector<8x8x16xf32>
    %cst_9 = arith.constant dense<0.000000e+00> : vector<8x8xf32>
    %23 = vector.multi_reduction <add>, %22, %cst_9 [2] : vector<8x8x16xf32> to vector<8x8xf32>
    %24 = vector.shape_cast %23 : vector<8x8xf32> to vector<8x8x1xf32>
    %25 = tpu.reciprocal %24 {approx = true} : vector<8x8x1xf32> -> vector<8x8x1xf32>
    %26 = arith.truncf %22 : vector<8x8x16xf32> to vector<8x8x16xbf16>
    "tpu.trace_start"() <{level = 10 : i32, message = "hqk,hkd->hqd"}> : () -> ()
    %cst_10 = arith.constant dense<0.000000e+00> : vector<8x8x64xf32>
    %27 = tpu.matmul %26, %14, %cst_10 {dimension_numbers = #tpu.dot_dimension_numbers<[2], [1], [1], [2], [0, 0, 0, 1, 1, 2], [0], [0]>} : vector<8x8x16xbf16>, vector<8x16x64xbf16>, vector<8x8x64xf32> -> vector<8x8x64xf32>
    "tpu.trace_stop"() : () -> ()
    %28 = vector.broadcast %25 : vector<8x8x1xf32> to vector<8x8x64xf32>
    %29 = arith.mulf %27, %28 : vector<8x8x64xf32>
    %30 = tpu.transpose %29, [1, 0, 2] : vector<8x8x64xf32> -> vector<8x8x64xf32>
    %31 = vector.shape_cast %30 : vector<8x8x64xf32> to vector<8x512xf32>
    %32 = arith.truncf %31 : vector<8x512xf32> to vector<8x512xbf16>
    %c0_11 = arith.constant 0 : index
    %c0_12 = arith.constant 0 : index
    %33 = vector.load %arg3[%c0_11, %c0_12] : memref<512x512xbf16, #tpu.memory_space<vmem>>, vector<512x512xbf16>
    %cst_13 = arith.constant dense<0.000000e+00> : vector<8x512xf32>
    %34 = tpu.matmul %32, %33, %cst_13 {dimension_numbers = #tpu.dot_dimension_numbers<[1], [0], [0], [1], [0, 0, 1, 1], [], []>} : vector<8x512xbf16>, vector<512x512xbf16>, vector<8x512xf32> -> vector<8x512xf32>
    %c0_14 = arith.constant 0 : index
    %c0_15 = arith.constant 0 : index
    %35 = vector.load %arg4[%c0_14, %c0_15] : memref<1x512xf32, #tpu.memory_space<vmem>>, vector<1x512xf32>
    %36 = vector.broadcast %35 : vector<1x512xf32> to vector<8x512xf32>
    %37 = arith.addf %34, %36 : vector<8x512xf32>
    %c0_16 = arith.constant 0 : index
    %c0_17 = arith.constant 0 : index
    %c0_18 = arith.constant 0 : index
    %38 = vector.load %arg5[%c0_16, %c0_17, %c0_18] : memref<1x8x512xf32, #tpu.memory_space<vmem>>, vector<1x8x512xf32>
    %39 = vector.shape_cast %38 : vector<1x8x512xf32> to vector<8x512xf32>
    %40 = vector.shape_cast %37 : vector<8x512xf32> to vector<1x8x512xf32>
    tpu.vector_store %arg5[%c0_16, %c0_17, %c0_18], %40 {strides = array<i32>} : memref<1x8x512xf32, #tpu.memory_space<vmem>>, vector<1x8x512xf32>,
    return
  }
  func.func @transform_0(%arg0: i32) -> (i32, i32, i32) {
    %c0_i32 = arith.constant 0 : i32
    %c0_i32_0 = arith.constant 0 : i32
    %c0_i32_1 = arith.constant 0 : i32
    return %arg0, %c0_i32, %c0_i32_0 : i32, i32, i32
  }
  func.func @transform_1(%arg0: i32) -> (i32, i32, i32) {
    %c0_i32 = arith.constant 0 : i32
    %c0_i32_0 = arith.constant 0 : i32
    %c0_i32_1 = arith.constant 0 : i32
    return %arg0, %c0_i32, %c0_i32_0 : i32, i32, i32
  }
  func.func @transform_2(%arg0: i32) -> (i32, i32) {
    %c0_i32 = arith.constant 0 : i32
    %c0_i32_0 = arith.constant 0 : i32
    %c0_i32_1 = arith.constant 0 : i32
    return %c0_i32, %c0_i32_0 : i32, i32
  }
  func.func @transform_3(%arg0: i32) -> (i32, i32) {
    %c0_i32 = arith.constant 0 : i32
    %c0_i32_0 = arith.constant 0 : i32
    %c0_i32_1 = arith.constant 0 : i32
    return %c0_i32, %c0_i32_0 : i32, i32
  }
  func.func @transform_4(%arg0: i32) -> (i32, i32, i32) {
    %c0_i32 = arith.constant 0 : i32
    %c0_i32_0 = arith.constant 0 : i32
    %c0_i32_1 = arith.constant 0 : i32
    return %arg0, %c0_i32, %c0_i32_0 : i32, i32, i32
  }
}

</mosaic_0001>

<bundles_post_ra>
// kernel: mha_encoder_decoder_attention.3
= control target key start
LH: loop header
LB: loop body
LE: loop exit
PB: predicated region body
PF: predicated region fallthrough
CT: control target
= control target key end

     0   :  { %8 = vsyncpa [#allocation3], 0  ;;  %s1861_s0 = inlined_call_operand.hbm [shape: f32[16,512], index: 0, kind: input, shape index: {}]   ;;  %s1862_s1 = inlined_call_operand.hbm [shape: bf16[512,512], index: 1, kind: input, shape index: {}]   ;;  %s1863_s2 = inlined_call_operand.vmem [shape: f32[1,512], index: 2, kind: input, shape index: {}]   ;;  %s1864_s3 = inlined_call_operand.vmem [shape: f32[16,512], index: 3, kind: output, shape index: {}]  }
   0x1   :  { %s14_s14 = sshll.u32 %s1861_s0, 4  ;;  %s15_s14 = int_to_ptr.hbm [resolvable:$true] %s14_s14 }
   0x2   :  { %9 = vsyncpa [#allocation5], 0  ;;  %s1772_s15 = smov [#allocation2]   ;;  %s27_s19 = sshll.u32 %s1862_s1, 4  ;;  %s28_s19 = int_to_ptr.hbm [resolvable:$true] %s27_s19 }
   0x3   :  { %s16_s16 = sshll.u32 %s1772_s15, 4  ;;  %s1773_s20 = smov 512   ;;  %s17_s16 = int_to_ptr.vmem [resolvable:$true] %s16_s16 }
   0x4   :  { %s1774_s21 = smov 32   ;;  %s1775_s22 = smov [#allocation4]  }
   0x5   :  { %22 = dma.hbm_to_vmem [thread:$0]  %s15_s14, 1024, %s17_s16, [#allocation3], %s1773_s20, %s1773_s20, %s1774_s21  }
   0x6   :  { %s29_s23 = sshll.u32 %s1775_s22, 4  ;;  %s1776_s24 = smov 256   ;;  %s30_s23 = int_to_ptr.vmem [resolvable:$true] %s29_s23 }
   0x7   :  { %s1777_s25 = smov 16  }
   0x8   :  { %35 = dma.hbm_to_vmem [thread:$0]  %s28_s19, 16384, %s30_s23, [#allocation5], %s1776_s24, %s1776_s24, %s1777_s25  }
   0x9   :  { %1768 = dma.done.wait [#allocation3], 1024  }
   0xa   :  { %1769 = vsyncadd [#allocation3], 4294966272 }
   0xb   :  { %1770 = dma.done.wait [#allocation5], 16384  }
   0xc   :  { %1771 = vsyncadd [#allocation5], 4294950912  ;;  %v1188_v0 = vld [vmem:[#allocation4 + $0xe0] sm:$0xf]  ;;  %v1616_v1 = vld [vmem:[#allocation4 + $0xec] sm:$0xf0] }
   0xd   :  { %v1316_v2 = vld [vmem:[#allocation4 + $0x1e0] sm:$0xf]  ;;  %v1189_v3 = vor.u32 %v1616_v1, %v1188_v0  ;;  %v1648_v4 = vld [vmem:[#allocation4 + $0x1ec] sm:$0xf0] }
   0xe   :  { %v1444_v5 = vld [vmem:[#allocation4 + $0x2e0] sm:$0xf]  ;;  %v1680_v6 = vld [vmem:[#allocation4 + $0x2ec] sm:$0xf0]  ;;  %v1317_v7 = vor.u32 %v1648_v4, %v1316_v2 }
   0xf   :  { %v1445_v8 = vor.u32 %v1680_v6, %v1444_v5  ;;  %v1572_v9 = vld [vmem:[#allocation4 + $0x3e0] sm:$0xf]  ;;  %v1712_v10 = vld [vmem:[#allocation4 + $0x3ec] sm:$0xf0]  ;;  %836 = vmatpush.bf16.msra.mxu0 %v1189_v3 }
  0x10   :  { %v1172_v11 = vld [vmem:[#allocation4 + $0xc0] sm:$0xf]  ;;  %v1573_v12 = vor.u32 %v1712_v10, %v1572_v9  ;;  %v1612_v13 = vld [vmem:[#allocation4 + $0xcc] sm:$0xf0]  ;;  %850 = vmatpush.bf16.msra.mxu1 %v1317_v7 }
  0x11   :  { %v1300_v14 = vld [vmem:[#allocation4 + $0x1c0] sm:$0xf]  ;;  %v1644_v15 = vld [vmem:[#allocation4 + $0x1cc] sm:$0xf0]  ;;  %864 = vmatpush.bf16.msra.mxu2 %v1445_v8  ;;  %v1173_v16 = vor.u32 %v1612_v13, %v1172_v11 }
  0x12   :  { %v1301_v17 = vor.u32 %v1644_v15, %v1300_v14  ;;  %v1428_v18 = vld [vmem:[#allocation4 + $0x2c0] sm:$0xf]  ;;  %v1676_v19 = vld [vmem:[#allocation4 + $0x2cc] sm:$0xf0]  ;;  %878 = vmatpush.bf16.msra.mxu3 %v1573_v12 }
  0x13   :  { %v1556_v20 = vld [vmem:[#allocation4 + $0x3c0] sm:$0xf]  ;;  %v1429_v21 = vor.u32 %v1676_v19, %v1428_v18  ;;  %v1708_v22 = vld [vmem:[#allocation4 + $0x3cc] sm:$0xf0]  ;;  %837 = vmatpush.bf16.msra.mxu0 %v1173_v16 }
  0x14   :  { %v1156_v23 = vld [vmem:[#allocation4 + $0xa0] sm:$0xf]  ;;  %v1608_v24 = vld [vmem:[#allocation4 + $0xac] sm:$0xf0]  ;;  %v1557_v25 = vor.u32 %v1708_v22, %v1556_v20  ;;  %851 = vmatpush.bf16.msra.mxu1 %v1301_v17 }
  0x15   :  { %v1284_v26 = vld [vmem:[#allocation4 + $0x1a0] sm:$0xf]  ;;  %v1640_v27 = vld [vmem:[#allocation4 + $0x1ac] sm:$0xf0]  ;;  %v1157_v29 = vor.u32 %v1608_v24, %v1156_v23  ;;  %865 = vmatpush.bf16.msra.mxu2 %v1429_v21 }
  0x16   :  { %v1412_v28 = vld [vmem:[#allocation4 + $0x2a0] sm:$0xf]  ;;  %v1672_v30 = vld [vmem:[#allocation4 + $0x2ac] sm:$0xf0]  ;;  %v1285_v33 = vor.u32 %v1640_v27, %v1284_v26  ;;  %879 = vmatpush.bf16.msra.mxu3 %v1557_v25 }
  0x17   :  { %v1540_v31 = vld [vmem:[#allocation4 + $0x3a0] sm:$0xf]  ;;  %v1704_v32 = vld [vmem:[#allocation4 + $0x3ac] sm:$0xf0]  ;;  %v1413_v34 = vor.u32 %v1672_v30, %v1412_v28  ;;  %838 = vmatpush.bf16.msra.mxu0 %v1157_v29  ;;  %v1614_v28 = vld [vmem:[#allocation4 + $0xe4] sm:$0xf] }
  0x18   :  { %v1140_v35 = vld [vmem:[#allocation4 + $0x80] sm:$0xf]  ;;  %v1604_v36 = vld [vmem:[#allocation4 + $0x8c] sm:$0xf0]  ;;  %v1541_v38 = vor.u32 %v1704_v32, %v1540_v31  ;;  %852 = vmatpush.bf16.msra.mxu1 %v1285_v33  ;;  %v1190_v29 = vld [vmem:[#allocation4 + $0xf0] sm:$0xf0] }
  0x19   :  { %v1268_v37 = vld [vmem:[#allocation4 + $0x180] sm:$0xf]  ;;  %v1636_v39 = vld [vmem:[#allocation4 + $0x18c] sm:$0xf0]  ;;  %v1141_v44 = vor.u32 %v1604_v36, %v1140_v35  ;;  %866 = vmatpush.bf16.msra.mxu2 %v1413_v34  ;;  %v1646_v30 = vld [vmem:[#allocation4 + $0x1e4] sm:$0xf] }
  0x1a   :  { %v1396_v40 = vld [vmem:[#allocation4 + $0x280] sm:$0xf]  ;;  %v1668_v41 = vld [vmem:[#allocation4 + $0x28c] sm:$0xf0]  ;;  %v1269_v45 = vor.u32 %v1636_v39, %v1268_v37  ;;  %880 = vmatpush.bf16.msra.mxu3 %v1541_v38  ;;  %v1318_v32 = vld [vmem:[#allocation4 + $0x1f0] sm:$0xf0] }
  0x1b   :  { %v1524_v42 = vld [vmem:[#allocation4 + $0x380] sm:$0xf]  ;;  %v1700_v43 = vld [vmem:[#allocation4 + $0x38c] sm:$0xf0]  ;;  %v1397_v46 = vor.u32 %v1668_v41, %v1396_v40  ;;  %839 = vmatpush.bf16.msra.mxu0 %v1141_v44  ;;  %v1678_v33 = vld [vmem:[#allocation4 + $0x2e4] sm:$0xf]  ;;  %v1193_v40 = vor.u32 %v1614_v28, %v1190_v29  ;;  %v1321_v41 = vor.u32 %v1646_v30, %v1318_v32 }
  0x1c   :  { %v1124_v47 = vld [vmem:[#allocation4 + $0x60] sm:$0xf]  ;;  %v1600_v48 = vld [vmem:[#allocation4 + $0x6c] sm:$0xf0]  ;;  %v1525_v50 = vor.u32 %v1700_v43, %v1524_v42  ;;  %853 = vmatpush.bf16.msra.mxu1 %v1269_v45  ;;  %v1446_v34 = vld [vmem:[#allocation4 + $0x2f0] sm:$0xf0] }
  0x1d   :  { %v1252_v49 = vld [vmem:[#allocation4 + $0x160] sm:$0xf]  ;;  %v1632_v51 = vld [vmem:[#allocation4 + $0x16c] sm:$0xf0]  ;;  %v1125_v56 = vor.u32 %v1600_v48, %v1124_v47  ;;  %867 = vmatpush.bf16.msra.mxu2 %v1397_v46  ;;  %v1710_v37 = vld [vmem:[#allocation4 + $0x3e4] sm:$0xf]  ;;  %v1449_v42 = vor.u32 %v1678_v33, %v1446_v34 }
  0x1e   :  { %v1380_v52 = vld [vmem:[#allocation4 + $0x260] sm:$0xf]  ;;  %v1664_v53 = vld [vmem:[#allocation4 + $0x26c] sm:$0xf0]  ;;  %v1253_v57 = vor.u32 %v1632_v51, %v1252_v49  ;;  %881 = vmatpush.bf16.msra.mxu3 %v1525_v50  ;;  %v1574_v38 = vld [vmem:[#allocation4 + $0x3f0] sm:$0xf0] }
  0x1f   :  { %v1508_v54 = vld [vmem:[#allocation4 + $0x360] sm:$0xf]  ;;  %v1696_v55 = vld [vmem:[#allocation4 + $0x36c] sm:$0xf0]  ;;  %v1381_v58 = vor.u32 %v1664_v53, %v1380_v52  ;;  %840 = vmatpush.bf16.msra.mxu0 %v1125_v56  ;;  %v1610_v43 = vld [vmem:[#allocation4 + $0xc4] sm:$0xf]  ;;  %v1577_v46 = vor.u32 %v1710_v37, %v1574_v38 }
  0x20   :  { %v1108_v59 = vld [vmem:[#allocation4 + $0x40] sm:$0xf]  ;;  %v1596_v60 = vld [vmem:[#allocation4 + $0x4c] sm:$0xf0]  ;;  %v1509_v62 = vor.u32 %v1696_v55, %v1508_v54  ;;  %854 = vmatpush.bf16.msra.mxu1 %v1253_v57  ;;  %v1174_v44 = vld [vmem:[#allocation4 + $0xd0] sm:$0xf0] }
  0x21   :  { %v1236_v61 = vld [vmem:[#allocation4 + $0x140] sm:$0xf]  ;;  %v1628_v63 = vld [vmem:[#allocation4 + $0x14c] sm:$0xf0]  ;;  %v1109_v4 = vor.u32 %v1596_v60, %v1108_v59  ;;  %868 = vmatpush.bf16.msra.mxu2 %v1381_v58  ;;  %v1642_v45 = vld [vmem:[#allocation4 + $0x1c4] sm:$0xf]  ;;  %v1177_v52 = vor.u32 %v1610_v43, %v1174_v44 }
  0x22   :  { %v1364_v0 = vld [vmem:[#allocation4 + $0x240] sm:$0xf]  ;;  %v1660_v1 = vld [vmem:[#allocation4 + $0x24c] sm:$0xf0]  ;;  %v1237_v5 = vor.u32 %v1628_v63, %v1236_v61  ;;  %882 = vmatpush.bf16.msra.mxu3 %v1509_v62  ;;  %v1302_v47 = vld [vmem:[#allocation4 + $0x1d0] sm:$0xf0] }
  0x23   :  { %v1492_v2 = vld [vmem:[#allocation4 + $0x340] sm:$0xf]  ;;  %v1692_v3 = vld [vmem:[#allocation4 + $0x34c] sm:$0xf0]  ;;  %v1365_v6 = vor.u32 %v1660_v1, %v1364_v0  ;;  %841 = vmatpush.bf16.msra.mxu0 %v1109_v4  ;;  %v1674_v48 = vld [vmem:[#allocation4 + $0x2c4] sm:$0xf]  ;;  %v1305_v54 = vor.u32 %v1642_v45, %v1302_v47 }
  0x24   :  { %v1092_v7 = vld [vmem:[#allocation4 + $0x20] sm:$0xf]  ;;  %v1592_v8 = vld [vmem:[#allocation4 + $0x2c] sm:$0xf0]  ;;  %v1493_v10 = vor.u32 %v1692_v3, %v1492_v2  ;;  %855 = vmatpush.bf16.msra.mxu1 %v1237_v5  ;;  %v1430_v49 = vld [vmem:[#allocation4 + $0x2d0] sm:$0xf0] }
  0x25   :  { %v1220_v9 = vld [vmem:[#allocation4 + $0x120] sm:$0xf]  ;;  %v1624_v11 = vld [vmem:[#allocation4 + $0x12c] sm:$0xf0]  ;;  %v1093_v16 = vor.u32 %v1592_v8, %v1092_v7  ;;  %869 = vmatpush.bf16.msra.mxu2 %v1365_v6  ;;  %v1706_v50 = vld [vmem:[#allocation4 + $0x3c4] sm:$0xf]  ;;  %v1433_v55 = vor.u32 %v1674_v48, %v1430_v49 }
  0x26   :  { %v1348_v12 = vld [vmem:[#allocation4 + $0x220] sm:$0xf]  ;;  %v1656_v13 = vld [vmem:[#allocation4 + $0x22c] sm:$0xf0]  ;;  %v1221_v19 = vor.u32 %v1624_v11, %v1220_v9  ;;  %883 = vmatpush.bf16.msra.mxu3 %v1493_v10  ;;  %v1558_v51 = vld [vmem:[#allocation4 + $0x3d0] sm:$0xf0] }
  0x27   :  { %v1476_v14 = vld [vmem:[#allocation4 + $0x320] sm:$0xf]  ;;  %v1688_v15 = vld [vmem:[#allocation4 + $0x32c] sm:$0xf0]  ;;  %v1349_v20 = vor.u32 %v1656_v13, %v1348_v12  ;;  %842 = vmatpush.bf16.msra.mxu0 %v1093_v16  ;;  %v1606_v53 = vld [vmem:[#allocation4 + $0xa4] sm:$0xf]  ;;  %v1561_v59 = vor.u32 %v1706_v50, %v1558_v51 }
  0x28   :  { %v1076_v17 = vld [vmem:[#allocation4] sm:$0xf]  ;;  %v1588_v18 = vld [vmem:[#allocation4 + $0xc] sm:$0xf0]  ;;  %v1477_v24 = vor.u32 %v1688_v15, %v1476_v14  ;;  %856 = vmatpush.bf16.msra.mxu1 %v1221_v19  ;;  %v1158_v56 = vld [vmem:[#allocation4 + $0xb0] sm:$0xf0] }
  0x29   :  { %v1204_v21 = vld [vmem:[#allocation4 + $0x100] sm:$0xf]  ;;  %v1620_v22 = vld [vmem:[#allocation4 + $0x10c] sm:$0xf0]  ;;  %v1077_v31 = vor.u32 %v1588_v18, %v1076_v17  ;;  %870 = vmatpush.bf16.msra.mxu2 %v1349_v20  ;;  %v1638_v57 = vld [vmem:[#allocation4 + $0x1a4] sm:$0xf]  ;;  %v1161_v2 = vor.u32 %v1606_v53, %v1158_v56 }
  0x2a   :  { %v1332_v23 = vld [vmem:[#allocation4 + $0x200] sm:$0xf]  ;;  %v1652_v25 = vld [vmem:[#allocation4 + $0x20c] sm:$0xf0]  ;;  %v1205_v35 = vor.u32 %v1620_v22, %v1204_v21  ;;  %884 = vmatpush.bf16.msra.mxu3 %v1477_v24  ;;  %v1286_v58 = vld [vmem:[#allocation4 + $0x1b0] sm:$0xf0] }
  0x2b   :  { %v1460_v26 = vld [vmem:[#allocation4 + $0x300] sm:$0xf]  ;;  %v1684_v27 = vld [vmem:[#allocation4 + $0x30c] sm:$0xf0]  ;;  %v1333_v36 = vor.u32 %v1652_v25, %v1332_v23  ;;  %843 = vmatpush.bf16.msra.mxu0 %v1077_v31  ;;  %v1670_v60 = vld [vmem:[#allocation4 + $0x2a4] sm:$0xf]  ;;  %v1289_v7 = vor.u32 %v1638_v57, %v1286_v58 }
  0x2c   :  { %v1461_v39 = vor.u32 %v1684_v27, %v1460_v26  ;;  %857 = vmatpush.bf16.msra.mxu1 %v1205_v35  ;;  %v1414_v61 = vld [vmem:[#allocation4 + $0x2b0] sm:$0xf0]  ;;  %v1702_v62 = vld [vmem:[#allocation4 + $0x3a4] sm:$0xf]  ;;  %v177_v12 = vld [vmem:[#allocation2 + $0x18] sm:$0xff] }
  0x2d   :  { %871 = vmatpush.bf16.msra.mxu2 %v1333_v36  ;;  %v1542_v63 = vld [vmem:[#allocation4 + $0x3b0] sm:$0xf0]  ;;  %v1602_v0 = vld [vmem:[#allocation4 + $0x84] sm:$0xf]  ;;  %v1417_v8 = vor.u32 %v1670_v60, %v1414_v61  ;;  %v181_v17 = vld [vmem:[#allocation2 + $0x38] sm:$0xff] }
  0x2e   :  { %885 = vmatpush.bf16.msra.mxu3 %v1461_v39  ;;  %v1142_v1 = vld [vmem:[#allocation4 + $0x90] sm:$0xf0]  ;;  %v1634_v3 = vld [vmem:[#allocation4 + $0x184] sm:$0xf]  ;;  %v1545_v13 = vor.u32 %v1702_v62, %v1542_v63  ;;  %v1809_v20 = vpack.c.bf16 %v181_v17, %v177_v12  ;;  %v175_v27 = vld [vmem:[#allocation2 + $0x8] sm:$0xff] }
  0x2f   :  { %892 = vmatpush.bf16.msrb.mxu0 %v1193_v40  ;;  %v1270_v4 = vld [vmem:[#allocation4 + $0x190] sm:$0xf0]  ;;  %v174_v10 = vld [vmem:[#allocation2] sm:$0xff]  ;;  %v1145_v21 = vor.u32 %v1602_v0, %v1142_v1  ;;  %v179_v28 = vld [vmem:[#allocation2 + $0x28] sm:$0xff] }
  0x30   :  { %906 = vmatpush.bf16.msrb.mxu1 %v1321_v41  ;;  %v176_v5 = vld [vmem:[#allocation2 + $0x10] sm:$0xff]  ;;  %v178_v11 = vld [vmem:[#allocation2 + $0x20] sm:$0xff]  ;;  %v1273_v24 = vor.u32 %v1634_v3, %v1270_v4  ;;  %v1812_v33 = vpack.c.bf16 %v179_v28, %v175_v27  ;;  %v1613_v27 = vld [vmem:[#allocation4 + $0xd4] sm:$0xf0] }
  0x31   :  { %920 = vmatpush.bf16.msrb.mxu2 %v1449_v42  ;;  %v180_v6 = vld [vmem:[#allocation2 + $0x30] sm:$0xff]  ;;  %v1666_v14 = vld [vmem:[#allocation4 + $0x284] sm:$0xf]  ;;  %v1806_v16 = vpack.c.bf16 %v178_v11, %v174_v10  ;;  %886 = vmatmul.bf16.vlgmr.msra.gmra.mxu3 %v1809_v20  ;;  %v1617_v10 = vld [vmem:[#allocation4 + $0xf4] sm:$0xf0] }
  0x32   :  { %934 = vmatpush.bf16.msrb.mxu3 %v1577_v46  ;;  %v1804_v9 = vpack.c.bf16 %v180_v6, %v176_v5  ;;  %v1398_v15 = vld [vmem:[#allocation4 + $0x290] sm:$0xf0]  ;;  %v1698_v18 = vld [vmem:[#allocation4 + $0x384] sm:$0xf]  ;;  %858 = vmatmul.bf16.vlgmr.msra.gmra.mxu1 %v1812_v33  ;;  %v1324_v11 = vld [vmem:[#allocation4 + $0x1e8] sm:$0xf] }
  0x33   :  { %893 = vmatpush.bf16.msrb.mxu0 %v1177_v52  ;;  %v1526_v19 = vld [vmem:[#allocation4 + $0x390] sm:$0xf0]  ;;  %v1598_v22 = vld [vmem:[#allocation4 + $0x64] sm:$0xf]  ;;  %v1401_v25 = vor.u32 %v1666_v14, %v1398_v15  ;;  %v1452_v14 = vld [vmem:[#allocation4 + $0x2e8] sm:$0xf] }
  0x34   :  { %907 = vmatpush.bf16.msrb.mxu1 %v1305_v54  ;;  %872 = vmatmul.bf16.vlgmr.msra.gmra.mxu2 %v1804_v9  ;;  %v1126_v23 = vld [vmem:[#allocation4 + $0x70] sm:$0xf0]  ;;  %v1630_v26 = vld [vmem:[#allocation4 + $0x164] sm:$0xf]  ;;  %v1529_v29 = vor.u32 %v1698_v18, %v1526_v19  ;;  %v1681_v15 = vld [vmem:[#allocation4 + $0x2f4] sm:$0xf0] }
  0x35   :  { %921 = vmatpush.bf16.msrb.mxu2 %v1433_v55  ;;  %v1254_v30 = vld [vmem:[#allocation4 + $0x170] sm:$0xf0]  ;;  %v1662_v31 = vld [vmem:[#allocation4 + $0x264] sm:$0xf]  ;;  %844 = vmatmul.bf16.vlgmr.msra.gmra.mxu0 %v1806_v16  ;;  %v1129_v36 = vor.u32 %v1598_v22, %v1126_v23  ;;  %v1580_v19 = vld [vmem:[#allocation4 + $0x3e8] sm:$0xf] }
  0x36   :  { %935 = vmatpush.bf16.msrb.mxu3 %v1561_v59  ;;  %v1382_v32 = vld [vmem:[#allocation4 + $0x270] sm:$0xf0]  ;;  %v1694_v34 = vld [vmem:[#allocation4 + $0x364] sm:$0xf]  ;;  %v1257_v37 = vor.u32 %v1630_v26, %v1254_v30  ;;  %v1180_v26 = vld [vmem:[#allocation4 + $0xc8] sm:$0xf] }
  0x37   :  { %894 = vmatpush.bf16.msrb.mxu0 %v1161_v2  ;;  %v1510_v35 = vld [vmem:[#allocation4 + $0x370] sm:$0xf0]  ;;  %v1385_v38 = vor.u32 %v1662_v31, %v1382_v32  ;;  %v1594_v39 = vld [vmem:[#allocation4 + $0x44] sm:$0xf]  ;;  %v1308_v28 = vld [vmem:[#allocation4 + $0x1c8] sm:$0xf] }
  0x38   :  { %908 = vmatpush.bf16.msrb.mxu1 %v1289_v7  ;;  %v1110_v40 = vld [vmem:[#allocation4 + $0x50] sm:$0xf0]  ;;  %v1626_v41 = vld [vmem:[#allocation4 + $0x144] sm:$0xf]  ;;  %v1513_v42 = vor.u32 %v1694_v34, %v1510_v35  ;;  %v1645_v30 = vld [vmem:[#allocation4 + $0x1d4] sm:$0xf0] }
  0x39   :  { %922 = vmatpush.bf16.msrb.mxu2 %v1417_v8  ;;  %v1238_v43 = vld [vmem:[#allocation4 + $0x150] sm:$0xf0]  ;;  %v1658_v44 = vld [vmem:[#allocation4 + $0x244] sm:$0xf]  ;;  %v1113_v48 = vor.u32 %v1594_v39, %v1110_v40  ;;  %v1196_v8 = vld [vmem:[#allocation4 + $0xe8] sm:$0xf] }
  0x3a   :  { %936 = vmatpush.bf16.msrb.mxu3 %v1545_v13  ;;  %v1366_v45 = vld [vmem:[#allocation4 + $0x250] sm:$0xf0]  ;;  %v1690_v46 = vld [vmem:[#allocation4 + $0x344] sm:$0xf]  ;;  %v1241_v49 = vor.u32 %v1626_v41, %v1238_v43  ;;  %v1649_v13 = vld [vmem:[#allocation4 + $0x1f4] sm:$0xf0]  ;;  %v1197_v23 = vor.u32 %v1617_v10, %v1196_v8 }
  0x3b   :  { %895 = vmatpush.bf16.msrb.mxu0 %v1145_v21  ;;  %v1494_v47 = vld [vmem:[#allocation4 + $0x350] sm:$0xf0]  ;;  %v1369_v50 = vor.u32 %v1658_v44, %v1366_v45  ;;  %v1590_v51 = vld [vmem:[#allocation4 + $0x24] sm:$0xf]  ;;  %v1713_v21 = vld [vmem:[#allocation4 + $0x3f4] sm:$0xf0] }
  0x3c   :  { %909 = vmatpush.bf16.msrb.mxu1 %v1273_v24  ;;  %v1094_v52 = vld [vmem:[#allocation4 + $0x30] sm:$0xf0]  ;;  %v1622_v53 = vld [vmem:[#allocation4 + $0x124] sm:$0xf]  ;;  %v1497_v54 = vor.u32 %v1690_v46, %v1494_v47  ;;  %v1325_v24 = vor.u32 %v1649_v13, %v1324_v11  ;;  %v1436_v31 = vld [vmem:[#allocation4 + $0x2c8] sm:$0xf] }
  0x3d   :  { %923 = vmatpush.bf16.msrb.mxu2 %v1401_v25  ;;  %v1222_v55 = vld [vmem:[#allocation4 + $0x130] sm:$0xf0]  ;;  %v1654_v56 = vld [vmem:[#allocation4 + $0x224] sm:$0xf]  ;;  %v1097_v60 = vor.u32 %v1590_v51, %v1094_v52  ;;  %v1453_v25 = vor.u32 %v1681_v15, %v1452_v14  ;;  %v1677_v32 = vld [vmem:[#allocation4 + $0x2d4] sm:$0xf0] }
  0x3e   :  { %937 = vmatpush.bf16.msrb.mxu3 %v1529_v29  ;;  %v1350_v57 = vld [vmem:[#allocation4 + $0x230] sm:$0xf0]  ;;  %v1686_v58 = vld [vmem:[#allocation4 + $0x324] sm:$0xf]  ;;  %v1225_v63 = vor.u32 %v1622_v53, %v1222_v55  ;;  %v1581_v29 = vor.u32 %v1713_v21, %v1580_v19  ;;  %v1564_v34 = vld [vmem:[#allocation4 + $0x3c8] sm:$0xf] }
  0x3f   :  { %896 = vmatpush.bf16.msrb.mxu0 %v1129_v36  ;;  %v1478_v59 = vld [vmem:[#allocation4 + $0x330] sm:$0xf0]  ;;  %v1586_v61 = vld [vmem:[#allocation4 + $0x4] sm:$0xf]  ;;  %v1353_v0 = vor.u32 %v1654_v56, %v1350_v57  ;;  %v1709_v35 = vld [vmem:[#allocation4 + $0x3d4] sm:$0xf0]  ;;  %v1181_v36 = vor.u32 %v1613_v27, %v1180_v26 }
  0x40   :  { %910 = vmatpush.bf16.msrb.mxu1 %v1257_v37  ;;  %v1078_v62 = vld [vmem:[#allocation4 + $0x10] sm:$0xf0]  ;;  %v1618_v1 = vld [vmem:[#allocation4 + $0x104] sm:$0xf]  ;;  %v1481_v4 = vor.u32 %v1686_v58, %v1478_v59  ;;  %v1309_v37 = vor.u32 %v1645_v30, %v1308_v28  ;;  %v1164_v39 = vld [vmem:[#allocation4 + $0xa8] sm:$0xf] }
  0x41   :  { %924 = vmatpush.bf16.msrb.mxu2 %v1385_v38  ;;  %v1206_v2 = vld [vmem:[#allocation4 + $0x110] sm:$0xf0]  ;;  %v1650_v3 = vld [vmem:[#allocation4 + $0x204] sm:$0xf]  ;;  %v1081_v12 = vor.u32 %v1586_v61, %v1078_v62  ;;  %v1437_v38 = vor.u32 %v1677_v32, %v1436_v31  ;;  %v1609_v40 = vld [vmem:[#allocation4 + $0xb4] sm:$0xf0] }
  0x42   :  { %938 = vmatpush.bf16.msrb.mxu3 %v1513_v42  ;;  %v1334_v5 = vld [vmem:[#allocation4 + $0x210] sm:$0xf0]  ;;  %v1682_v6 = vld [vmem:[#allocation4 + $0x304] sm:$0xf]  ;;  %v1209_v17 = vor.u32 %v1618_v1, %v1206_v2  ;;  %v1292_v41 = vld [vmem:[#allocation4 + $0x1a8] sm:$0xf]  ;;  %v1565_v42 = vor.u32 %v1709_v35, %v1564_v34 }
  0x43   :  { %897 = vmatpush.bf16.msrb.mxu0 %v1113_v48  ;;  %v1462_v7 = vld [vmem:[#allocation4 + $0x310] sm:$0xf0]  ;;  %v1337_v18 = vor.u32 %v1650_v3, %v1334_v5  ;;  %v1641_v43 = vld [vmem:[#allocation4 + $0x1b4] sm:$0xf0]  ;;  %v1420_v44 = vld [vmem:[#allocation4 + $0x2a8] sm:$0xf]  ;;  %v1165_v48 = vor.u32 %v1609_v40, %v1164_v39 }
  0x44   :  { %911 = vmatpush.bf16.msrb.mxu1 %v1241_v49  ;;  %v1465_v22 = vor.u32 %v1682_v6, %v1462_v7  ;;  %v1673_v45 = vld [vmem:[#allocation4 + $0x2b4] sm:$0xf0]  ;;  %v1548_v46 = vld [vmem:[#allocation4 + $0x3a8] sm:$0xf]  ;;  %v1293_v49 = vor.u32 %v1641_v43, %v1292_v41 }
  0x45   :  { %925 = vmatpush.bf16.msrb.mxu2 %v1369_v50  ;;  %v1705_v47 = vld [vmem:[#allocation4 + $0x3b4] sm:$0xf0]  ;;  %v1421_v50 = vor.u32 %v1673_v45, %v1420_v44  ;;  %v1148_v51 = vld [vmem:[#allocation4 + $0x88] sm:$0xf] }
  0x46   :  { %939 = vmatpush.bf16.msrb.mxu3 %v1497_v54  ;;  %v1605_v52 = vld [vmem:[#allocation4 + $0x94] sm:$0xf0]  ;;  %v1276_v53 = vld [vmem:[#allocation4 + $0x188] sm:$0xf]  ;;  %v1549_v54 = vor.u32 %v1705_v47, %v1548_v46 }
  0x47   :  { %898 = vmatpush.bf16.msrb.mxu0 %v1097_v60  ;;  %v1637_v55 = vld [vmem:[#allocation4 + $0x194] sm:$0xf0]  ;;  %v1404_v56 = vld [vmem:[#allocation4 + $0x288] sm:$0xf]  ;;  %v1149_v60 = vor.u32 %v1605_v52, %v1148_v51  ;;  %v1326_v52 = vld [vmem:[#allocation4 + $0x1f8] sm:$0xf0] }
  0x48   :  { %912 = vmatpush.bf16.msrb.mxu1 %v1225_v63  ;;  %v1669_v57 = vld [vmem:[#allocation4 + $0x294] sm:$0xf0]  ;;  %v1532_v58 = vld [vmem:[#allocation4 + $0x388] sm:$0xf]  ;;  %v1277_v61 = vor.u32 %v1637_v55, %v1276_v53  ;;  %v1679_v53 = vld [vmem:[#allocation4 + $0x2ec] sm:$0xf] }
  0x49   :  { %926 = vmatpush.bf16.msrb.mxu2 %v1353_v0  ;;  %v1701_v59 = vld [vmem:[#allocation4 + $0x394] sm:$0xf0]  ;;  %v1405_v62 = vor.u32 %v1669_v57, %v1404_v56  ;;  %v1132_v63 = vld [vmem:[#allocation4 + $0x68] sm:$0xf]  ;;  %v1711_v57 = vld [vmem:[#allocation4 + $0x3ec] sm:$0xf] }
  0x4a   :  { %940 = vmatpush.bf16.msrb.mxu3 %v1481_v4  ;;  %v1601_v0 = vld [vmem:[#allocation4 + $0x74] sm:$0xf0]  ;;  %v1260_v1 = vld [vmem:[#allocation4 + $0x168] sm:$0xf]  ;;  %v1533_v2 = vor.u32 %v1701_v59, %v1532_v58  ;;  %v1582_v58 = vld [vmem:[#allocation4 + $0x3f8] sm:$0xf0] }
  0x4b   :  { %899 = vmatpush.bf16.msrb.mxu0 %v1081_v12  ;;  %v1633_v3 = vld [vmem:[#allocation4 + $0x174] sm:$0xf0]  ;;  %v1388_v4 = vld [vmem:[#allocation4 + $0x268] sm:$0xf]  ;;  %v1133_v8 = vor.u32 %v1601_v0, %v1132_v63  ;;  %v1611_v63 = vld [vmem:[#allocation4 + $0xcc] sm:$0xf] }
  0x4c   :  { %913 = vmatpush.bf16.msrb.mxu1 %v1209_v17  ;;  %v1665_v5 = vld [vmem:[#allocation4 + $0x274] sm:$0xf0]  ;;  %v1516_v6 = vld [vmem:[#allocation4 + $0x368] sm:$0xf]  ;;  %v1261_v10 = vor.u32 %v1633_v3, %v1260_v1  ;;  %v1182_v0 = vld [vmem:[#allocation4 + $0xd8] sm:$0xf0] }
  0x4d   :  { %927 = vmatpush.bf16.msrb.mxu2 %v1337_v18  ;;  %v1697_v7 = vld [vmem:[#allocation4 + $0x374] sm:$0xf0]  ;;  %v1389_v11 = vor.u32 %v1665_v5, %v1388_v4  ;;  %v1116_v12 = vld [vmem:[#allocation4 + $0x48] sm:$0xf]  ;;  %v1643_v1 = vld [vmem:[#allocation4 + $0x1cc] sm:$0xf] }
  0x4e   :  { %941 = vmatpush.bf16.msrb.mxu3 %v1465_v22  ;;  %900 = vmatmul.bf16.vlgmr.msrb.gmra.mxu0 %v1806_v16  ;;  %v1597_v13 = vld [vmem:[#allocation4 + $0x54] sm:$0xf0]  ;;  %v1244_v14 = vld [vmem:[#allocation4 + $0x148] sm:$0xf]  ;;  %v1517_v15 = vor.u32 %v1697_v7, %v1516_v6  ;;  %v1310_v3 = vld [vmem:[#allocation4 + $0x1d8] sm:$0xf0] }
  0x4f   :  { %948 = vmatpush.bf16.msra.mxu0 %v1197_v23  ;;  %914 = vmatmul.bf16.vlgmr.msrb.gmra.mxu1 %v1812_v33  ;;  %v1629_v17 = vld [vmem:[#allocation4 + $0x154] sm:$0xf0]  ;;  %v1372_v18 = vld [vmem:[#allocation4 + $0x248] sm:$0xf]  ;;  %v1117_v23 = vor.u32 %v1597_v13, %v1116_v12  ;;  %v1675_v4 = vld [vmem:[#allocation4 + $0x2cc] sm:$0xf] }
  0x50   :  { %962 = vmatpush.bf16.msra.mxu1 %v1325_v24  ;;  %928 = vmatmul.bf16.vlgmr.msrb.gmra.mxu2 %v1804_v9  ;;  %v1661_v19 = vld [vmem:[#allocation4 + $0x254] sm:$0xf0]  ;;  %v1500_v21 = vld [vmem:[#allocation4 + $0x348] sm:$0xf]  ;;  %v1245_v24 = vor.u32 %v1629_v17, %v1244_v14  ;;  %v1438_v5 = vld [vmem:[#allocation4 + $0x2d8] sm:$0xf0] }
  0x51   :  { %976 = vmatpush.bf16.msra.mxu2 %v1453_v25  ;;  %942 = vmatmul.bf16.vlgmr.msrb.gmra.mxu3 %v1809_v20  ;;  %v1693_v22 = vld [vmem:[#allocation4 + $0x354] sm:$0xf0]  ;;  %v1373_v25 = vor.u32 %v1661_v19, %v1372_v18  ;;  %v1100_v26 = vld [vmem:[#allocation4 + $0x28] sm:$0xf]  ;;  %v1707_v6 = vld [vmem:[#allocation4 + $0x3cc] sm:$0xf] }
  0x52   :  { %990 = vmatpush.bf16.msra.mxu3 %v1581_v29  ;;  %v1593_v27 = vld [vmem:[#allocation4 + $0x34] sm:$0xf0]  ;;  %v1228_v28 = vld [vmem:[#allocation4 + $0x128] sm:$0xf]  ;;  %v1501_v29 = vor.u32 %v1693_v22, %v1500_v21  ;;  %v1566_v7 = vld [vmem:[#allocation4 + $0x3d8] sm:$0xf0] }
  0x53   :  { %949 = vmatpush.bf16.msra.mxu0 %v1181_v36  ;;  %v1625_v30 = vld [vmem:[#allocation4 + $0x134] sm:$0xf0]  ;;  %v1356_v31 = vld [vmem:[#allocation4 + $0x228] sm:$0xf]  ;;  %v1101_v36 = vor.u32 %v1593_v27, %v1100_v26  ;;  %v1607_v12 = vld [vmem:[#allocation4 + $0xac] sm:$0xf] }
  0x54   :  { %963 = vmatpush.bf16.msra.mxu1 %v1309_v37  ;;  %v1657_v32 = vld [vmem:[#allocation4 + $0x234] sm:$0xf0]  ;;  %v1484_v34 = vld [vmem:[#allocation4 + $0x328] sm:$0xf]  ;;  %v1229_v39 = vor.u32 %v1625_v30, %v1228_v28  ;;  %v1166_v13 = vld [vmem:[#allocation4 + $0xb8] sm:$0xf0] }
  0x55   :  { %977 = vmatpush.bf16.msra.mxu2 %v1437_v38  ;;  %v1689_v35 = vld [vmem:[#allocation4 + $0x334] sm:$0xf0]  ;;  %v1084_v37 = vld [vmem:[#allocation4 + $0x8] sm:$0xf]  ;;  %v1357_v40 = vor.u32 %v1657_v32, %v1356_v31  ;;  %v1639_v14 = vld [vmem:[#allocation4 + $0x1ac] sm:$0xf] }
  0x56   :  { %991 = vmatpush.bf16.msra.mxu3 %v1565_v42  ;;  %v1589_v38 = vld [vmem:[#allocation4 + $0x14] sm:$0xf0]  ;;  %v1212_v41 = vld [vmem:[#allocation4 + $0x108] sm:$0xf]  ;;  %v1485_v44 = vor.u32 %v1689_v35, %v1484_v34  ;;  %v1294_v17 = vld [vmem:[#allocation4 + $0x1b8] sm:$0xf0] }
  0x57   :  { %950 = vmatpush.bf16.msra.mxu0 %v1165_v48  ;;  %v1621_v42 = vld [vmem:[#allocation4 + $0x114] sm:$0xf0]  ;;  %v1340_v43 = vld [vmem:[#allocation4 + $0x208] sm:$0xf]  ;;  %v1615_v48 = vld [vmem:[#allocation4 + $0xec] sm:$0xf]  ;;  %v1085_v51 = vor.u32 %v1589_v38, %v1084_v37 }
  0x58   :  { %964 = vmatpush.bf16.msra.mxu1 %v1293_v49  ;;  %v1653_v45 = vld [vmem:[#allocation4 + $0x214] sm:$0xf0]  ;;  %v1468_v46 = vld [vmem:[#allocation4 + $0x308] sm:$0xf]  ;;  %v1198_v49 = vld [vmem:[#allocation4 + $0xf8] sm:$0xf0]  ;;  %v1213_v55 = vor.u32 %v1621_v42, %v1212_v41 }
  0x59   :  { %978 = vmatpush.bf16.msra.mxu2 %v1421_v50  ;;  %v1685_v47 = vld [vmem:[#allocation4 + $0x314] sm:$0xf0]  ;;  %v1647_v50 = vld [vmem:[#allocation4 + $0x1ec] sm:$0xf]  ;;  %v1341_v56 = vor.u32 %v1653_v45, %v1340_v43  ;;  %v1422_v19 = vld [vmem:[#allocation4 + $0x2b8] sm:$0xf0] }
  0x5a   :  { %992 = vmatpush.bf16.msra.mxu3 %v1549_v54  ;;  %v1454_v54 = vld [vmem:[#allocation4 + $0x2f8] sm:$0xf0]  ;;  %v1469_v59 = vor.u32 %v1685_v47, %v1468_v46  ;;  %v1671_v18 = vld [vmem:[#allocation4 + $0x2ac] sm:$0xf] }
  0x5b   :  { %951 = vmatpush.bf16.msra.mxu0 %v1149_v60  ;;  %v1201_v60 = vor.u32 %v1615_v48, %v1198_v49  ;;  %v1703_v21 = vld [vmem:[#allocation4 + $0x3ac] sm:$0xf]  ;;  %v1550_v22 = vld [vmem:[#allocation4 + $0x3b8] sm:$0xf0] }
  0x5c   :  { %965 = vmatpush.bf16.msra.mxu1 %v1277_v61  ;;  %v1329_v61 = vor.u32 %v1647_v50, %v1326_v52  ;;  %v1603_v26 = vld [vmem:[#allocation4 + $0x8c] sm:$0xf]  ;;  %v1150_v27 = vld [vmem:[#allocation4 + $0x98] sm:$0xf0] }
  0x5d   :  { %979 = vmatpush.bf16.msra.mxu2 %v1405_v62  ;;  %v1457_v62 = vor.u32 %v1679_v53, %v1454_v54  ;;  %v1635_v28 = vld [vmem:[#allocation4 + $0x18c] sm:$0xf]  ;;  %v1278_v30 = vld [vmem:[#allocation4 + $0x198] sm:$0xf0] }
  0x5e   :  { %993 = vmatpush.bf16.msra.mxu3 %v1533_v2  ;;  %v1585_v2 = vor.u32 %v1711_v57, %v1582_v58  ;;  %v1667_v31 = vld [vmem:[#allocation4 + $0x28c] sm:$0xf]  ;;  %v1406_v32 = vld [vmem:[#allocation4 + $0x298] sm:$0xf0]  ;;  %v1281_v37 = vor.u32 %v1635_v28, %v1278_v30 }
  0x5f   :  { %952 = vmatpush.bf16.msra.mxu0 %v1133_v8  ;;  %v1185_v8 = vor.u32 %v1611_v63, %v1182_v0  ;;  %v1699_v34 = vld [vmem:[#allocation4 + $0x38c] sm:$0xf]  ;;  %v1534_v35 = vld [vmem:[#allocation4 + $0x398] sm:$0xf0]  ;;  %v1409_v38 = vor.u32 %v1667_v31, %v1406_v32 }
  0x60   :  { %966 = vmatpush.bf16.msra.mxu1 %v1261_v10  ;;  %v1313_v10 = vor.u32 %v1643_v1, %v1310_v3  ;;  %v1631_v41 = vld [vmem:[#allocation4 + $0x16c] sm:$0xf]  ;;  %v1537_v42 = vor.u32 %v1699_v34, %v1534_v35  ;;  %v1262_v43 = vld [vmem:[#allocation4 + $0x178] sm:$0xf0] }
  0x61   :  { %980 = vmatpush.bf16.msra.mxu2 %v1389_v11  ;;  %v1441_v11 = vor.u32 %v1675_v4, %v1438_v5  ;;  %v1390_v45 = vld [vmem:[#allocation4 + $0x278] sm:$0xf0]  ;;  %v1695_v46 = vld [vmem:[#allocation4 + $0x36c] sm:$0xf]  ;;  %v1265_v49 = vor.u32 %v1631_v41, %v1262_v43 }
  0x62   :  { %994 = vmatpush.bf16.msra.mxu3 %v1517_v15  ;;  %v1569_v15 = vor.u32 %v1707_v6, %v1566_v7  ;;  %v1518_v47 = vld [vmem:[#allocation4 + $0x378] sm:$0xf0]  ;;  %v1627_v53 = vld [vmem:[#allocation4 + $0x14c] sm:$0xf] }
  0x63   :  { %953 = vmatpush.bf16.msra.mxu0 %v1117_v23  ;;  %v1169_v23 = vor.u32 %v1607_v12, %v1166_v13  ;;  %v1118_v52 = vld [vmem:[#allocation4 + $0x58] sm:$0xf0]  ;;  %v1521_v54 = vor.u32 %v1695_v46, %v1518_v47  ;;  %v1691_v58 = vld [vmem:[#allocation4 + $0x34c] sm:$0xf] }
  0x64   :  { %967 = vmatpush.bf16.msra.mxu1 %v1245_v24  ;;  %v1297_v24 = vor.u32 %v1639_v14, %v1294_v17  ;;  %v1374_v57 = vld [vmem:[#allocation4 + $0x258] sm:$0xf0]  ;;  %v1591_v63 = vld [vmem:[#allocation4 + $0x2c] sm:$0xf] }
  0x65   :  { %981 = vmatpush.bf16.msra.mxu2 %v1373_v25  ;;  %v1425_v25 = vor.u32 %v1671_v18, %v1422_v19  ;;  %v1102_v0 = vld [vmem:[#allocation4 + $0x38] sm:$0xf0]  ;;  %v1623_v1 = vld [vmem:[#allocation4 + $0x12c] sm:$0xf] }
  0x66   :  { %995 = vmatpush.bf16.msra.mxu3 %v1501_v29  ;;  %v1553_v29 = vor.u32 %v1703_v21, %v1550_v22  ;;  %v1230_v3 = vld [vmem:[#allocation4 + $0x138] sm:$0xf0]  ;;  %v1655_v4 = vld [vmem:[#allocation4 + $0x22c] sm:$0xf] }
  0x67   :  { %954 = vmatpush.bf16.msra.mxu0 %v1101_v36  ;;  %v1153_v36 = vor.u32 %v1603_v26, %v1150_v27  ;;  %v1358_v5 = vld [vmem:[#allocation4 + $0x238] sm:$0xf0]  ;;  %v1687_v6 = vld [vmem:[#allocation4 + $0x32c] sm:$0xf]  ;;  %v1831_v27 = vld [vmem:[%s1863_s2] sm:$0xf] }
  0x68   :  { %968 = vmatpush.bf16.msra.mxu1 %v1229_v39  ;;  %v1599_v39 = vld [vmem:[#allocation4 + $0x6c] sm:$0xf]  ;;  %v1486_v7 = vld [vmem:[#allocation4 + $0x338] sm:$0xf0]  ;;  %v188_v28 = vperm.slane %v1831_v27, 0 }
  0x69   :  { %982 = vmatpush.bf16.msra.mxu2 %v1357_v40  ;;  %v1134_v40 = vld [vmem:[#allocation4 + $0x78] sm:$0xf0]  ;;  %v1587_v12 = vld [vmem:[#allocation4 + $0xc] sm:$0xf] }
  0x6a   :  { %996 = vmatpush.bf16.msra.mxu3 %v1485_v44  ;;  %v1663_v44 = vld [vmem:[#allocation4 + $0x26c] sm:$0xf]  ;;  %v1137_v48 = vor.u32 %v1599_v39, %v1134_v40  ;;  %v1086_v13 = vld [vmem:[#allocation4 + $0x18] sm:$0xf0] }
  0x6b   :  { %955 = vmatpush.bf16.msra.mxu0 %v1085_v51  ;;  %v1393_v50 = vor.u32 %v1663_v44, %v1390_v45  ;;  %v1595_v51 = vld [vmem:[#allocation4 + $0x4c] sm:$0xf]  ;;  %v1214_v17 = vld [vmem:[#allocation4 + $0x118] sm:$0xf0] }
  0x6c   :  { %969 = vmatpush.bf16.msra.mxu1 %v1213_v55  ;;  %v1246_v55 = vld [vmem:[#allocation4 + $0x158] sm:$0xf0]  ;;  %v1619_v14 = vld [vmem:[#allocation4 + $0x10c] sm:$0xf] }
  0x6d   :  { %983 = vmatpush.bf16.msra.mxu2 %v1341_v56  ;;  %v1659_v56 = vld [vmem:[#allocation4 + $0x24c] sm:$0xf]  ;;  %v1342_v19 = vld [vmem:[#allocation4 + $0x218] sm:$0xf0] }
  0x6e   :  { %997 = vmatpush.bf16.msra.mxu3 %v1469_v59  ;;  %956 = vmatmul.bf16.vlgmr.msra.gmra.mxu0 %v1806_v16  ;;  %v1502_v59 = vld [vmem:[#allocation4 + $0x358] sm:$0xf0]  ;;  %v1651_v18 = vld [vmem:[#allocation4 + $0x20c] sm:$0xf] }
  0x6f   :  { %1004 = vmatpush.bf16.msrb.mxu0 %v1201_v60  ;;  %970 = vmatmul.bf16.vlgmr.msra.gmra.mxu1 %v1812_v33  ;;  %v1121_v60 = vor.u32 %v1595_v51, %v1118_v52  ;;  %v1683_v21 = vld [vmem:[#allocation4 + $0x30c] sm:$0xf]  ;;  %v1470_v22 = vld [vmem:[#allocation4 + $0x318] sm:$0xf0] }
  0x70   :  { %1018 = vmatpush.bf16.msrb.mxu1 %v1329_v61  ;;  %984 = vmatmul.bf16.vlgmr.msra.gmra.mxu2 %v1804_v9  ;;  %v1249_v61 = vor.u32 %v1627_v53, %v1246_v55  ;;  %v1473_v26 = vor.u32 %v1683_v21, %v1470_v22 }
  0x71   :  { %1032 = vmatpush.bf16.msrb.mxu2 %v1457_v62  ;;  %998 = vmatmul.bf16.vlgmr.msra.gmra.mxu3 %v1809_v20  ;;  %v1377_v62 = vor.u32 %v1659_v56, %v1374_v57 }
  0x72   :  { %1046 = vmatpush.bf16.msrb.mxu3 %v1585_v2  ;;  %v1505_v2 = vor.u32 %v1691_v58, %v1502_v59  ;;  %v190_v59 = vperm.slane %v1831_v27, 2 }
  0x73   :  { %1005 = vmatpush.bf16.msrb.mxu0 %v1185_v8  ;;  %v1105_v8 = vor.u32 %v1591_v63, %v1102_v0 }
  0x74   :  { %1019 = vmatpush.bf16.msrb.mxu1 %v1313_v10  ;;  %v1233_v10 = vor.u32 %v1623_v1, %v1230_v3 }
  0x75   :  { %1033 = vmatpush.bf16.msrb.mxu2 %v1441_v11  ;;  %v1361_v11 = vor.u32 %v1655_v4, %v1358_v5 }
  0x76   :  { %1047 = vmatpush.bf16.msrb.mxu3 %v1569_v15  ;;  %v1489_v15 = vor.u32 %v1687_v6, %v1486_v7 }
  0x77   :  { %1006 = vmatpush.bf16.msrb.mxu0 %v1169_v23  ;;  %v1089_v23 = vor.u32 %v1587_v12, %v1086_v13  ;;  %v191_v13 = vperm.slane %v1831_v27, 3 }
  0x78   :  { %1020 = vmatpush.bf16.msrb.mxu1 %v1297_v24  ;;  %v1217_v24 = vor.u32 %v1619_v14, %v1214_v17 }
  0x79   :  { %1034 = vmatpush.bf16.msrb.mxu2 %v1425_v25  ;;  %v1345_v25 = vor.u32 %v1651_v18, %v1342_v19 }
  0x7a   :  { %1048 = vmatpush.bf16.msrb.mxu3 %v1553_v29 }
  0x7b   :  { %1007 = vmatpush.bf16.msrb.mxu0 %v1153_v36 }
  0x7c   :  { %1021 = vmatpush.bf16.msrb.mxu1 %v1281_v37 }
  0x7d   :  { %1035 = vmatpush.bf16.msrb.mxu2 %v1409_v38 }
  0x7e   :  { %1049 = vmatpush.bf16.msrb.mxu3 %v1537_v42  ;;  %v189_v42 = vperm.slane %v1831_v27, 1 }
  0x7f   :  { %1008 = vmatpush.bf16.msrb.mxu0 %v1137_v48 }
  0x80   :  { %1022 = vmatpush.bf16.msrb.mxu1 %v1265_v49 }
  0x81   :  { %1036 = vmatpush.bf16.msrb.mxu2 %v1393_v50 }
  0x82   :  { %1050 = vmatpush.bf16.msrb.mxu3 %v1521_v54 }
  0x83   :  { %1009 = vmatpush.bf16.msrb.mxu0 %v1121_v60 }
  0x84   :  { %1023 = vmatpush.bf16.msrb.mxu1 %v1249_v61 }
  0x85   :  { %1037 = vmatpush.bf16.msrb.mxu2 %v1377_v62 }
  0x86   :  { %1051 = vmatpush.bf16.msrb.mxu3 %v1505_v2 }
  0x87   :  { %1010 = vmatpush.bf16.msrb.mxu0 %v1105_v8 }
  0x88   :  { %1024 = vmatpush.bf16.msrb.mxu1 %v1233_v10 }
  0x89   :  { %1038 = vmatpush.bf16.msrb.mxu2 %v1361_v11 }
  0x8a   :  { %1052 = vmatpush.bf16.msrb.mxu3 %v1489_v15 }
  0x8b   :  { %1011 = vmatpush.bf16.msrb.mxu0 %v1089_v23 }
  0x8c   :  { %1025 = vmatpush.bf16.msrb.mxu1 %v1217_v24 }
  0x8d   :  { %1039 = vmatpush.bf16.msrb.mxu2 %v1345_v25 }
  0x8e   :  { %1053 = vmatpush.bf16.msrb.mxu3 %v1473_v26  ;;  %1012 = vmatmul.bf16.vlgmr.msrb.gmra.mxu0 %v1806_v16 }
  0x8f   :  { %1026 = vmatmul.bf16.vlgmr.msrb.gmra.mxu1 %v1812_v33 }
  0x90   :  { %1040 = vmatmul.bf16.vlgmr.msrb.gmra.mxu2 %v1804_v9 }
  0x91   :  { %1054 = vmatmul.bf16.vlgmr.msrb.gmra.mxu3 %v1809_v20 }
  0xaf   :  { %v859_v31 = vpop.f32.mrf.mxu1 }
  0xb2   :  { %v845_v29 = vpop.f32.mrf.mxu0 }
  0xb3   :  { %v846_v30 = vadd.f32 %v845_v29, %v188_v28 }
  0xb4   :  { %v887_v16 = vpop.f32.mrf.mxu3 }
  0xb5   :  { %v860_v32 = vadd.f32 %v859_v31, %v846_v30 }
  0xb7   :  { %v873_v34 = vpop.f32.mrf.mxu2  ;;  %v861_v9 = vpop.f32.mrf.mxu1 }
  0xb8   :  { %v874_v35 = vadd.f32 %v873_v34, %v860_v32 }
  0xba   :  { %v888_v36 = vadd.f32 %v887_v16, %v874_v35  ;;  %v847_v33 = vpop.f32.mrf.mxu0 }
  0xbb   :  { %v848_v37 = vadd.f32 %v847_v33, %v188_v28 }
  0xbc   :  { %1060 = vst [vmem:[%s1864_s3] sm:$0xff] %v888_v36  ;;  %v889_v40 = vpop.f32.mrf.mxu3 }
  0xbd   :  { %v862_v20 = vadd.f32 %v861_v9, %v848_v37 }
  0xbf   :  { %v875_v38 = vpop.f32.mrf.mxu2 }
  0xc0   :  { %v876_v39 = vadd.f32 %v875_v38, %v862_v20 }
  0xc2   :  { %v890_v41 = vadd.f32 %v889_v40, %v876_v39 }
  0xc4   :  { %1064 = vst [vmem:[%s1864_s3 + $0x20] sm:$0xff] %v890_v41 }
  0xcb   :  { %v901_v43 = vpop.f32.mrf.mxu0 }
  0xcc   :  { %v902_v44 = vadd.f32 %v901_v43, %v189_v42  ;;  %v915_v45 = vpop.f32.mrf.mxu1 }
  0xce   :  { %v916_v46 = vadd.f32 %v915_v45, %v902_v44 }
  0xd3   :  { %v929_v47 = vpop.f32.mrf.mxu2  ;;  %v903_v51 = vpop.f32.mrf.mxu0 }
  0xd4   :  { %v930_v48 = vadd.f32 %v929_v47, %v916_v46  ;;  %v943_v49 = vpop.f32.mrf.mxu3  ;;  %v904_v52 = vadd.f32 %v903_v51, %v189_v42  ;;  %v917_v53 = vpop.f32.mrf.mxu1 }
  0xd6   :  { %v944_v50 = vadd.f32 %v943_v49, %v930_v48  ;;  %v918_v54 = vadd.f32 %v917_v53, %v904_v52 }
  0xd8   :  { %1061 = vst [vmem:[%s1864_s3 + $0x8] sm:$0xff] %v944_v50 }
  0xdb   :  { %v931_v55 = vpop.f32.mrf.mxu2 }
  0xdc   :  { %v932_v56 = vadd.f32 %v931_v55, %v918_v54  ;;  %v945_v57 = vpop.f32.mrf.mxu3 }
  0xde   :  { %v946_v58 = vadd.f32 %v945_v57, %v932_v56 }
  0xe0   :  { %1065 = vst [vmem:[%s1864_s3 + $0x28] sm:$0xff] %v946_v58 }
  0xeb   :  { %v957_v60 = vpop.f32.mrf.mxu0 }
  0xec   :  { %v958_v61 = vadd.f32 %v957_v60, %v190_v59  ;;  %v971_v62 = vpop.f32.mrf.mxu1 }
  0xee   :  { %v972_v63 = vadd.f32 %v971_v62, %v958_v61 }
  0xf3   :  { %v985_v0 = vpop.f32.mrf.mxu2  ;;  %v959_v4 = vpop.f32.mrf.mxu0 }
  0xf4   :  { %v986_v1 = vadd.f32 %v985_v0, %v972_v63  ;;  %v999_v2 = vpop.f32.mrf.mxu3  ;;  %v960_v5 = vadd.f32 %v959_v4, %v190_v59  ;;  %v973_v6 = vpop.f32.mrf.mxu1 }
  0xf6   :  { %v1000_v3 = vadd.f32 %v999_v2, %v986_v1  ;;  %v974_v7 = vadd.f32 %v973_v6, %v960_v5 }
  0xf8   :  { %1062 = vst [vmem:[%s1864_s3 + $0x10] sm:$0xff] %v1000_v3 }
  0xfb   :  { %v987_v8 = vpop.f32.mrf.mxu2 }
  0xfc   :  { %v988_v10 = vadd.f32 %v987_v8, %v974_v7  ;;  %v1001_v11 = vpop.f32.mrf.mxu3 }
  0xfe   :  { %v1002_v12 = vadd.f32 %v1001_v11, %v988_v10 }
 0x100   :  { %1066 = vst [vmem:[%s1864_s3 + $0x30] sm:$0xff] %v1002_v12 }
 0x10b   :  { %v1013_v14 = vpop.f32.mrf.mxu0 }
 0x10c   :  { %v1014_v15 = vadd.f32 %v1013_v14, %v191_v13  ;;  %v1027_v17 = vpop.f32.mrf.mxu1 }
 0x10e   :  { %v1028_v18 = vadd.f32 %v1027_v17, %v1014_v15 }
 0x113   :  { %v1041_v19 = vpop.f32.mrf.mxu2  ;;  %v1015_v23 = vpop.f32.mrf.mxu0 }
 0x114   :  { %v1042_v21 = vadd.f32 %v1041_v19, %v1028_v18  ;;  %v1055_v22 = vpop.f32.mrf.mxu3  ;;  %v1016_v25 = vadd.f32 %v1015_v23, %v191_v13  ;;  %v1029_v26 = vpop.f32.mrf.mxu1 }
 0x116   :  { %v1056_v24 = vadd.f32 %v1055_v22, %v1042_v21  ;;  %v1030_v28 = vadd.f32 %v1029_v26, %v1016_v25 }
 0x118   :  { %1063 = vst [vmem:[%s1864_s3 + $0x18] sm:$0xff] %v1056_v24 }
 0x11b   :  { %v1043_v29 = vpop.f32.mrf.mxu2 }
 0x11c   :  { %v1044_v30 = vadd.f32 %v1043_v29, %v1030_v28  ;;  %v1057_v31 = vpop.f32.mrf.mxu3 }
 0x11e   :  { %v1058_v27 = vadd.f32 %v1057_v31, %v1044_v30 }
 0x120   :  { %1067 = vst [vmem:[%s1864_s3 + $0x38] sm:$0xff] %v1058_v27 }
 0x121   :  { %1072 = vsyncpa [#allocation3], 1 }
 0x122   :  { %1073 = vsyncpa [#allocation5], 1 }

// kernel: mha_encoder_decoder_attention.4
= control target key start
LH: loop header
LB: loop body
LE: loop exit
PB: predicated region body
PF: predicated region fallthrough
CT: control target
= control target key end

     0   :  { %8 = vsyncpa [#allocation3], 0  ;;  %s3563_s15 = smov [#allocation2]   ;;  %s3564_s17 = smov 512   ;;  %s3849_s0 = inlined_call_operand.vmem [shape: f32[32,512], index: 0, kind: input, shape index: {}]   ;;  %s3850_s1 = inlined_call_operand.hbm [shape: bf16[512,1024], index: 1, kind: input, shape index: {}]   ;;  %s3851_s2 = inlined_call_operand.vmem [shape: f32[1,1024], index: 2, kind: input, shape index: {}]   ;;  %s3852_s3 = inlined_call_operand.vmem [shape: f32[32,1024], index: 3, kind: output, shape index: {}]  }
   0x1   :  { %s15_s14 = sshll.u32 %s3850_s1, 4  ;;  %s17_s16 = sshll.u32 %s3563_s15, 4  ;;  %s16_s14 = int_to_ptr.hbm [resolvable:$true] %s15_s14  ;;  %s18_s16 = int_to_ptr.vmem [resolvable:$true] %s17_s16 }
   0x2   :  { %s3565_s18 = smov 32  }
   0x3   :  { %23 = dma.hbm_to_vmem [thread:$0]  %s16_s14, 32768, %s18_s16, [#allocation3], %s3564_s17, %s3564_s17, %s3565_s18  }
   0x4   :  { %3561 = dma.done.wait [#allocation3], 32768  }
   0x5   :  { %3562 = vsyncadd [#allocation3], 4294934528  ;;  %v2479_v0 = vld [vmem:[#allocation2 + $0x1c0] sm:$0xf] }
   0x6   :  { %v3337_v1 = vld [vmem:[#allocation2 + $0x1dc] sm:$0xf0] }
   0x7   :  { %v2735_v2 = vld [vmem:[#allocation2 + $0x3c0] sm:$0xf]  ;;  %v2480_v3 = vor.u32 %v3337_v1, %v2479_v0 }
   0x8   :  { %v3401_v4 = vld [vmem:[#allocation2 + $0x3dc] sm:$0xf0] }
   0x9   :  { %v2991_v5 = vld [vmem:[#allocation2 + $0x5c0] sm:$0xf]  ;;  %v2736_v7 = vor.u32 %v3401_v4, %v2735_v2  ;;  %1608 = vmatpush.bf16.msra.mxu0 %v2480_v3 }
   0xa   :  { %v3465_v6 = vld [vmem:[#allocation2 + $0x5dc] sm:$0xf0] }
   0xb   :  { %v2992_v8 = vor.u32 %v3465_v6, %v2991_v5  ;;  %v3247_v9 = vld [vmem:[#allocation2 + $0x7c0] sm:$0xf]  ;;  %1627 = vmatpush.bf16.msra.mxu1 %v2736_v7 }
   0xc   :  { %v3529_v10 = vld [vmem:[#allocation2 + $0x7dc] sm:$0xf0] }
   0xd   :  { %v2447_v11 = vld [vmem:[#allocation2 + $0x180] sm:$0xf]  ;;  %v3248_v12 = vor.u32 %v3529_v10, %v3247_v9  ;;  %1646 = vmatpush.bf16.msra.mxu2 %v2992_v8 }
   0xe   :  { %v3329_v13 = vld [vmem:[#allocation2 + $0x19c] sm:$0xf0] }
   0xf   :  { %v2703_v14 = vld [vmem:[#allocation2 + $0x380] sm:$0xf]  ;;  %v2448_v16 = vor.u32 %v3329_v13, %v2447_v11  ;;  %1665 = vmatpush.bf16.msra.mxu3 %v3248_v12 }
  0x10   :  { %v3393_v15 = vld [vmem:[#allocation2 + $0x39c] sm:$0xf0] }
  0x11   :  { %v2704_v17 = vor.u32 %v3393_v15, %v2703_v14  ;;  %v2959_v18 = vld [vmem:[#allocation2 + $0x580] sm:$0xf]  ;;  %1609 = vmatpush.bf16.msra.mxu0 %v2448_v16 }
  0x12   :  { %v3457_v19 = vld [vmem:[#allocation2 + $0x59c] sm:$0xf0] }
  0x13   :  { %v3215_v20 = vld [vmem:[#allocation2 + $0x780] sm:$0xf]  ;;  %v2960_v21 = vor.u32 %v3457_v19, %v2959_v18  ;;  %1628 = vmatpush.bf16.msra.mxu1 %v2704_v17 }
  0x14   :  { %v3521_v22 = vld [vmem:[#allocation2 + $0x79c] sm:$0xf0] }
  0x15   :  { %v2415_v23 = vld [vmem:[#allocation2 + $0x140] sm:$0xf]  ;;  %v3216_v25 = vor.u32 %v3521_v22, %v3215_v20  ;;  %1647 = vmatpush.bf16.msra.mxu2 %v2960_v21 }
  0x16   :  { %v3321_v24 = vld [vmem:[#allocation2 + $0x15c] sm:$0xf0] }
  0x17   :  { %v2671_v26 = vld [vmem:[#allocation2 + $0x340] sm:$0xf]  ;;  %v2416_v29 = vor.u32 %v3321_v24, %v2415_v23  ;;  %1666 = vmatpush.bf16.msra.mxu3 %v3216_v25 }
  0x18   :  { %v3385_v27 = vld [vmem:[#allocation2 + $0x35c] sm:$0xf0] }
  0x19   :  { %v2927_v28 = vld [vmem:[#allocation2 + $0x540] sm:$0xf]  ;;  %v2672_v33 = vor.u32 %v3385_v27, %v2671_v26  ;;  %1610 = vmatpush.bf16.msra.mxu0 %v2416_v29 }
  0x1a   :  { %v3449_v30 = vld [vmem:[#allocation2 + $0x55c] sm:$0xf0] }
  0x1b   :  { %v3183_v31 = vld [vmem:[#allocation2 + $0x740] sm:$0xf]  ;;  %v2928_v34 = vor.u32 %v3449_v30, %v2927_v28  ;;  %1629 = vmatpush.bf16.msra.mxu1 %v2672_v33  ;;  %v287_v30 = vld [vmem:[%s3849_s0 + $0x8] sm:$0xff]  ;;  %v2993_v33 = vld [vmem:[#allocation2 + $0x5e0] sm:$0xf0] }
  0x1c   :  { %v3513_v32 = vld [vmem:[#allocation2 + $0x75c] sm:$0xf0] }
  0x1d   :  { %v2383_v35 = vld [vmem:[#allocation2 + $0x100] sm:$0xf]  ;;  %v3184_v38 = vor.u32 %v3513_v32, %v3183_v31  ;;  %1648 = vmatpush.bf16.msra.mxu2 %v2928_v34  ;;  %v291_v31 = vld [vmem:[%s3849_s0 + $0x28] sm:$0xff]  ;;  %v3461_v32 = vld [vmem:[#allocation2 + $0x5c4] sm:$0xf] }
  0x1e   :  { %v3313_v36 = vld [vmem:[#allocation2 + $0x11c] sm:$0xf0] }
  0x1f   :  { %v2639_v37 = vld [vmem:[#allocation2 + $0x300] sm:$0xf]  ;;  %v2384_v44 = vor.u32 %v3313_v36, %v2383_v35  ;;  %1667 = vmatpush.bf16.msra.mxu3 %v3184_v38  ;;  %v288_v35 = vld [vmem:[%s3849_s0 + $0x10] sm:$0xff]  ;;  %v3397_v36 = vld [vmem:[#allocation2 + $0x3c4] sm:$0xf] }
  0x20   :  { %v3377_v39 = vld [vmem:[#allocation2 + $0x31c] sm:$0xf0] }
  0x21   :  { %v2895_v40 = vld [vmem:[#allocation2 + $0x500] sm:$0xf]  ;;  %v2640_v45 = vor.u32 %v3377_v39, %v2639_v37  ;;  %1611 = vmatpush.bf16.msra.mxu0 %v2384_v44  ;;  %v2737_v37 = vld [vmem:[#allocation2 + $0x3e0] sm:$0xf0]  ;;  %v2996_v44 = vor.u32 %v3461_v32, %v2993_v33  ;;  %v296_v32 = vld [vmem:[%s3849_s0 + $0x50] sm:$0xff] }
  0x22   :  { %v3441_v41 = vld [vmem:[#allocation2 + $0x51c] sm:$0xf0]  ;;  %v3365_v33 = vld [vmem:[#allocation2 + $0x2c4] sm:$0xf] }
  0x23   :  { %v3151_v42 = vld [vmem:[#allocation2 + $0x700] sm:$0xf]  ;;  %v2896_v46 = vor.u32 %v3441_v41, %v2895_v40  ;;  %1630 = vmatpush.bf16.msra.mxu1 %v2640_v45  ;;  %v292_v40 = vld [vmem:[%s3849_s0 + $0x30] sm:$0xff]  ;;  %v289_v41 = vld [vmem:[%s3849_s0 + $0x18] sm:$0xff] }
  0x24   :  { %v3505_v43 = vld [vmem:[#allocation2 + $0x71c] sm:$0xf0]  ;;  %v3333_v45 = vld [vmem:[#allocation2 + $0x1c4] sm:$0xf] }
  0x25   :  { %v2351_v47 = vld [vmem:[#allocation2 + $0xc0] sm:$0xf]  ;;  %v3152_v50 = vor.u32 %v3505_v43, %v3151_v42  ;;  %1649 = vmatpush.bf16.msra.mxu2 %v2896_v46  ;;  %v293_v42 = vld [vmem:[%s3849_s0 + $0x38] sm:$0xff]  ;;  %v2481_v46 = vld [vmem:[#allocation2 + $0x1e0] sm:$0xf0] }
  0x26   :  { %v3305_v48 = vld [vmem:[#allocation2 + $0xdc] sm:$0xf0] }
  0x27   :  { %v2607_v49 = vld [vmem:[#allocation2 + $0x2c0] sm:$0xf]  ;;  %v2352_v56 = vor.u32 %v3305_v48, %v2351_v47  ;;  %1668 = vmatpush.bf16.msra.mxu3 %v3152_v50  ;;  %v3525_v47 = vld [vmem:[#allocation2 + $0x7c4] sm:$0xf] }
  0x28   :  { %v3369_v51 = vld [vmem:[#allocation2 + $0x2dc] sm:$0xf0]  ;;  %v3249_v50 = vld [vmem:[#allocation2 + $0x7e0] sm:$0xf0] }
  0x29   :  { %v2863_v52 = vld [vmem:[#allocation2 + $0x4c0] sm:$0xf]  ;;  %v2608_v57 = vor.u32 %v3369_v51, %v2607_v49  ;;  %1612 = vmatpush.bf16.msra.mxu0 %v2352_v56  ;;  %v2740_v49 = vor.u32 %v3397_v36, %v2737_v37  ;;  %v3453_v51 = vld [vmem:[#allocation2 + $0x584] sm:$0xf]  ;;  %v300_v36 = vld [vmem:[%s3849_s0 + $0x70] sm:$0xff] }
  0x2a   :  { %v3433_v53 = vld [vmem:[#allocation2 + $0x4dc] sm:$0xf0]  ;;  %v2705_v56 = vld [vmem:[#allocation2 + $0x3a0] sm:$0xf0]  ;;  %v297_v37 = vld [vmem:[%s3849_s0 + $0x58] sm:$0xff] }
  0x2b   :  { %v3119_v54 = vld [vmem:[#allocation2 + $0x6c0] sm:$0xf]  ;;  %v2864_v58 = vor.u32 %v3433_v53, %v2863_v52  ;;  %1631 = vmatpush.bf16.msra.mxu1 %v2608_v57  ;;  %v2961_v52 = vld [vmem:[#allocation2 + $0x5a0] sm:$0xf0]  ;;  %v3615_v53 = vpack.c.bf16 %v291_v31, %v287_v30  ;;  %v3619_v57 = vpack.c.bf16 %v293_v42, %v289_v41 }
  0x2c   :  { %v3497_v55 = vld [vmem:[#allocation2 + $0x6dc] sm:$0xf0]  ;;  %v3429_v30 = vld [vmem:[#allocation2 + $0x4c4] sm:$0xf] }
  0x2d   :  { %v2319_v59 = vld [vmem:[#allocation2 + $0x80] sm:$0xf]  ;;  %v3120_v62 = vor.u32 %v3497_v55, %v3119_v54  ;;  %1650 = vmatpush.bf16.msra.mxu2 %v2864_v58  ;;  %v3617_v54 = vpack.c.bf16 %v292_v40, %v288_v35  ;;  %v3389_v55 = vld [vmem:[#allocation2 + $0x384] sm:$0xf]  ;;  %v2484_v58 = vor.u32 %v3333_v45, %v2481_v46 }
  0x2e   :  { %v3297_v60 = vld [vmem:[#allocation2 + $0x9c] sm:$0xf0]  ;;  %v2865_v31 = vld [vmem:[#allocation2 + $0x4e0] sm:$0xf0] }
  0x2f   :  { %v2575_v61 = vld [vmem:[#allocation2 + $0x280] sm:$0xf]  ;;  %v2320_v4 = vor.u32 %v3297_v60, %v2319_v59  ;;  %1669 = vmatpush.bf16.msra.mxu3 %v3120_v62  ;;  %v3252_v59 = vor.u32 %v3525_v47, %v3249_v50  ;;  %v2964_v60 = vor.u32 %v3453_v51, %v2961_v52  ;;  %v2449_v62 = vld [vmem:[#allocation2 + $0x1a0] sm:$0xf0]  ;;  %v2868_v40 = vor.u32 %v3429_v30, %v2865_v31  ;;  %v2487_v31 = vld [vmem:[#allocation2 + $0x1c8] sm:$0xf] }
  0x30   :  { %v3361_v63 = vld [vmem:[#allocation2 + $0x29c] sm:$0xf0]  ;;  %v3301_v41 = vld [vmem:[#allocation2 + $0xc4] sm:$0xf]  ;;  %v3653_v51 = vpack.c.bf16 %v300_v36, %v296_v32  ;;  %v3338_v32 = vld [vmem:[#allocation2 + $0x1e4] sm:$0xf0] }
  0x31   :  { %v2831_v0 = vld [vmem:[#allocation2 + $0x480] sm:$0xf]  ;;  %v2576_v5 = vor.u32 %v3361_v63, %v2575_v61  ;;  %1613 = vmatpush.bf16.msra.mxu0 %v2320_v4  ;;  %v3325_v61 = vld [vmem:[#allocation2 + $0x184] sm:$0xf]  ;;  %v2967_v36 = vld [vmem:[#allocation2 + $0x588] sm:$0xf] }
  0x32   :  { %v3425_v1 = vld [vmem:[#allocation2 + $0x49c] sm:$0xf0]  ;;  %v3517_v63 = vld [vmem:[#allocation2 + $0x784] sm:$0xf] }
  0x33   :  { %v3087_v2 = vld [vmem:[#allocation2 + $0x680] sm:$0xf]  ;;  %v2832_v6 = vor.u32 %v3425_v1, %v2831_v0  ;;  %1632 = vmatpush.bf16.msra.mxu1 %v2576_v5  ;;  %v2708_v0 = vor.u32 %v3389_v55, %v2705_v56  ;;  %v3217_v1 = vld [vmem:[#allocation2 + $0x7a0] sm:$0xf0] }
  0x34   :  { %v3489_v3 = vld [vmem:[#allocation2 + $0x69c] sm:$0xf0]  ;;  %v3381_v4 = vld [vmem:[#allocation2 + $0x344] sm:$0xf] }
  0x35   :  { %v2287_v7 = vld [vmem:[#allocation2 + $0x40] sm:$0xf]  ;;  %v3088_v10 = vor.u32 %v3489_v3, %v3087_v2  ;;  %1651 = vmatpush.bf16.msra.mxu2 %v2832_v6  ;;  %v3445_v2 = vld [vmem:[#allocation2 + $0x544] sm:$0xf]  ;;  %v2452_v6 = vor.u32 %v3325_v61, %v2449_v62 }
  0x36   :  { %v3289_v8 = vld [vmem:[#allocation2 + $0x5c] sm:$0xf0]  ;;  %v2929_v3 = vld [vmem:[#allocation2 + $0x560] sm:$0xf0] }
  0x37   :  { %v2543_v9 = vld [vmem:[#allocation2 + $0x240] sm:$0xf]  ;;  %v2288_v17 = vor.u32 %v3289_v8, %v2287_v7  ;;  %1670 = vmatpush.bf16.msra.mxu3 %v3088_v10  ;;  %v2673_v5 = vld [vmem:[#allocation2 + $0x360] sm:$0xf0]  ;;  %v3220_v7 = vor.u32 %v3517_v63, %v3217_v1  ;;  %v2932_v8 = vor.u32 %v3445_v2, %v2929_v3 }
  0x38   :  { %v3353_v11 = vld [vmem:[#allocation2 + $0x25c] sm:$0xf0]  ;;  %v2417_v10 = vld [vmem:[#allocation2 + $0x160] sm:$0xf0] }
  0x39   :  { %v2799_v12 = vld [vmem:[#allocation2 + $0x440] sm:$0xf]  ;;  %v2544_v21 = vor.u32 %v3353_v11, %v2543_v9  ;;  %1614 = vmatpush.bf16.msra.mxu0 %v2288_v17  ;;  %v3317_v9 = vld [vmem:[#allocation2 + $0x144] sm:$0xf] }
  0x3a   :  { %v3417_v13 = vld [vmem:[#allocation2 + $0x45c] sm:$0xf0]  ;;  %v3509_v11 = vld [vmem:[#allocation2 + $0x744] sm:$0xf] }
  0x3b   :  { %v3055_v14 = vld [vmem:[#allocation2 + $0x640] sm:$0xf]  ;;  %v2800_v22 = vor.u32 %v3417_v13, %v2799_v12  ;;  %1633 = vmatpush.bf16.msra.mxu1 %v2544_v21  ;;  %v2676_v12 = vor.u32 %v3381_v4, %v2673_v5  ;;  %v3185_v13 = vld [vmem:[#allocation2 + $0x760] sm:$0xf0] }
  0x3c   :  { %v3481_v15 = vld [vmem:[#allocation2 + $0x65c] sm:$0xf0]  ;;  %v2641_v17 = vld [vmem:[#allocation2 + $0x320] sm:$0xf0] }
  0x3d   :  { %v2255_v16 = vld [vmem:[#allocation2] sm:$0xf]  ;;  %v3056_v26 = vor.u32 %v3481_v15, %v3055_v14  ;;  %1652 = vmatpush.bf16.msra.mxu2 %v2800_v22  ;;  %v3437_v14 = vld [vmem:[#allocation2 + $0x504] sm:$0xf]  ;;  %v3188_v22 = vor.u32 %v3509_v11, %v3185_v13 }
  0x3e   :  { %v3281_v18 = vld [vmem:[#allocation2 + $0x1c] sm:$0xf0]  ;;  %v2897_v15 = vld [vmem:[#allocation2 + $0x520] sm:$0xf0] }
  0x3f   :  { %v2511_v19 = vld [vmem:[#allocation2 + $0x200] sm:$0xf]  ;;  %v2256_v34 = vor.u32 %v3281_v18, %v2255_v16  ;;  %1671 = vmatpush.bf16.msra.mxu3 %v3056_v26  ;;  %v3373_v16 = vld [vmem:[#allocation2 + $0x304] sm:$0xf]  ;;  %v2420_v18 = vor.u32 %v3317_v9, %v2417_v10 }
  0x40   :  { %v3345_v20 = vld [vmem:[#allocation2 + $0x21c] sm:$0xf0]  ;;  %v3501_v21 = vld [vmem:[#allocation2 + $0x704] sm:$0xf] }
  0x41   :  { %v2767_v23 = vld [vmem:[#allocation2 + $0x400] sm:$0xf]  ;;  %v2512_v38 = vor.u32 %v3345_v20, %v2511_v19  ;;  %1615 = vmatpush.bf16.msra.mxu0 %v2256_v34  ;;  %v3309_v19 = vld [vmem:[#allocation2 + $0x104] sm:$0xf] }
  0x42   :  { %v3409_v24 = vld [vmem:[#allocation2 + $0x41c] sm:$0xf0]  ;;  %v2385_v20 = vld [vmem:[#allocation2 + $0x120] sm:$0xf0] }
  0x43   :  { %v3023_v25 = vld [vmem:[#allocation2 + $0x600] sm:$0xf]  ;;  %v2768_v39 = vor.u32 %v3409_v24, %v2767_v23  ;;  %1634 = vmatpush.bf16.msra.mxu1 %v2512_v38  ;;  %v2900_v23 = vor.u32 %v3437_v14, %v2897_v15  ;;  %v3153_v24 = vld [vmem:[#allocation2 + $0x720] sm:$0xf0]  ;;  %v2388_v35 = vor.u32 %v3309_v19, %v2385_v20  ;;  %v301_v38 = vld [vmem:[%s3849_s0 + $0x78] sm:$0xff] }
  0x44   :  { %v3473_v27 = vld [vmem:[#allocation2 + $0x61c] sm:$0xf0]  ;;  %v2609_v34 = vld [vmem:[#allocation2 + $0x2e0] sm:$0xf0]  ;;  %v3655_v56 = vpack.c.bf16 %v301_v38, %v297_v37  ;;  %v3466_v19 = vld [vmem:[#allocation2 + $0x5e4] sm:$0xf0] }
  0x45   :  { %v286_v28 = vld [vmem:[%s3849_s0] sm:$0xff]  ;;  %v3024_v43 = vor.u32 %v3473_v27, %v3023_v25  ;;  %1653 = vmatpush.bf16.msra.mxu2 %v2768_v39  ;;  %1684 = vmatpush.bf16.msrb.mxu0 %v2484_v58  ;;  %v2644_v27 = vor.u32 %v3373_v16, %v2641_v17  ;;  %v3156_v39 = vor.u32 %v3501_v21, %v3153_v24  ;;  %v3458_v37 = vld [vmem:[#allocation2 + $0x5a4] sm:$0xf0] }
  0x46   :  { %v290_v29 = vld [vmem:[%s3849_s0 + $0x20] sm:$0xff]  ;;  %1635 = vmatmul.bf16.vlgmr.msra.gmra.mxu1 %v3615_v53  ;;  %v2612_v45 = vor.u32 %v3365_v33, %v2609_v34  ;;  %v3255_v33 = vld [vmem:[#allocation2 + $0x7c8] sm:$0xf] }
  0x47   :  { %v3613_v48 = vpack.c.bf16 %v290_v29, %v286_v28  ;;  %1672 = vmatpush.bf16.msra.mxu3 %v3024_v43  ;;  %1703 = vmatpush.bf16.msrb.mxu1 %v2740_v49  ;;  %v294_v25 = vld [vmem:[%s3849_s0 + $0x40] sm:$0xff]  ;;  %v295_v28 = vld [vmem:[%s3849_s0 + $0x48] sm:$0xff] }
  0x48   :  { %1654 = vmatmul.bf16.vlgmr.msra.gmra.mxu2 %v3617_v54  ;;  %v298_v26 = vld [vmem:[%s3849_s0 + $0x60] sm:$0xff]  ;;  %v299_v29 = vld [vmem:[%s3849_s0 + $0x68] sm:$0xff] }
  0x49   :  { %1722 = vmatpush.bf16.msrb.mxu2 %v2996_v44  ;;  %1616 = vmatmul.bf16.vlgmr.msra.gmra.mxu0 %v3613_v48  ;;  %v2353_v42 = vld [vmem:[#allocation2 + $0xe0] sm:$0xf0]  ;;  %v3649_v44 = vpack.c.bf16 %v298_v26, %v294_v25  ;;  %v3651_v50 = vpack.c.bf16 %v299_v29, %v295_v28 }
  0x4a   :  { %1673 = vmatmul.bf16.vlgmr.msra.gmra.mxu3 %v3619_v57  ;;  %1685 = vmatpush.bf16.msrb.mxu0 %v2452_v6  ;;  %v3493_v43 = vld [vmem:[#allocation2 + $0x6c4] sm:$0xf]  ;;  %v2356_v58 = vor.u32 %v3301_v41, %v2353_v42  ;;  %v2455_v41 = vld [vmem:[#allocation2 + $0x188] sm:$0xf] }
  0x4b   :  { %1741 = vmatpush.bf16.msrb.mxu3 %v3252_v59  ;;  %1704 = vmatpush.bf16.msrb.mxu1 %v2708_v0  ;;  %v3121_v46 = vld [vmem:[#allocation2 + $0x6e0] sm:$0xf0]  ;;  %v3330_v42 = vld [vmem:[#allocation2 + $0x1a4] sm:$0xf0] }
  0x4c   :  { %v3421_v47 = vld [vmem:[#allocation2 + $0x484] sm:$0xf]  ;;  %v3124_v59 = vor.u32 %v3493_v43, %v3121_v46  ;;  %v2711_v46 = vld [vmem:[#allocation2 + $0x388] sm:$0xf] }
  0x4d   :  { %1723 = vmatpush.bf16.msrb.mxu2 %v2964_v60  ;;  %v2833_v49 = vld [vmem:[#allocation2 + $0x4a0] sm:$0xf0] }
  0x4e   :  { %1686 = vmatpush.bf16.msrb.mxu0 %v2420_v18  ;;  %v3357_v52 = vld [vmem:[#allocation2 + $0x284] sm:$0xf]  ;;  %v2836_v60 = vor.u32 %v3421_v47, %v2833_v49  ;;  %v2999_v18 = vld [vmem:[#allocation2 + $0x5c8] sm:$0xf] }
  0x4f   :  { %1742 = vmatpush.bf16.msrb.mxu3 %v3220_v7  ;;  %1705 = vmatpush.bf16.msrb.mxu1 %v2676_v12  ;;  %v2577_v55 = vld [vmem:[#allocation2 + $0x2a0] sm:$0xf0]  ;;  %v3000_v30 = vor.u32 %v3466_v19, %v2999_v18  ;;  %v3394_v47 = vld [vmem:[#allocation2 + $0x3a4] sm:$0xf0] }
  0x50   :  { %v3293_v61 = vld [vmem:[#allocation2 + $0x84] sm:$0xf]  ;;  %v2580_v0 = vor.u32 %v3357_v52, %v2577_v55  ;;  %v3223_v49 = vld [vmem:[#allocation2 + $0x788] sm:$0xf] }
  0x51   :  { %1724 = vmatpush.bf16.msrb.mxu2 %v2932_v8  ;;  %v2321_v62 = vld [vmem:[#allocation2 + $0xa0] sm:$0xf0]  ;;  %v3522_v52 = vld [vmem:[#allocation2 + $0x7a4] sm:$0xf0] }
  0x52   :  { %1687 = vmatpush.bf16.msrb.mxu0 %v2388_v35  ;;  %v3485_v63 = vld [vmem:[#allocation2 + $0x684] sm:$0xf]  ;;  %v2324_v6 = vor.u32 %v3293_v61, %v2321_v62  ;;  %v3530_v35 = vld [vmem:[#allocation2 + $0x7e4] sm:$0xf0] }
  0x53   :  { %1743 = vmatpush.bf16.msrb.mxu3 %v3188_v22  ;;  %1706 = vmatpush.bf16.msrb.mxu1 %v2644_v27  ;;  %v3089_v1 = vld [vmem:[#allocation2 + $0x6a0] sm:$0xf0]  ;;  %v2743_v22 = vld [vmem:[#allocation2 + $0x3c8] sm:$0xf]  ;;  %v3256_v43 = vor.u32 %v3530_v35, %v3255_v33 }
  0x54   :  { %v3413_v2 = vld [vmem:[#allocation2 + $0x444] sm:$0xf]  ;;  %v3092_v8 = vor.u32 %v3485_v63, %v3089_v1  ;;  %v2935_v55 = vld [vmem:[#allocation2 + $0x548] sm:$0xf]  ;;  %v3224_v63 = vor.u32 %v3522_v52, %v3223_v49 }
  0x55   :  { %1725 = vmatpush.bf16.msrb.mxu2 %v2900_v23  ;;  %v2801_v3 = vld [vmem:[#allocation2 + $0x460] sm:$0xf0]  ;;  %v3402_v23 = vld [vmem:[#allocation2 + $0x3e4] sm:$0xf0] }
  0x56   :  { %1640 = vmatmul.bf16.gmra.mxu1 %v3651_v50  ;;  %v3349_v4 = vld [vmem:[#allocation2 + $0x244] sm:$0xf]  ;;  %1688 = vmatpush.bf16.msrb.mxu0 %v2356_v58  ;;  %v2804_v9 = vor.u32 %v3413_v2, %v2801_v3  ;;  %v2744_v34 = vor.u32 %v3402_v23, %v2743_v22  ;;  %v3450_v58 = vld [vmem:[#allocation2 + $0x564] sm:$0xf0] }
  0x57   :  { %1744 = vmatpush.bf16.msrb.mxu3 %v3156_v39  ;;  %1707 = vmatpush.bf16.msrb.mxu1 %v2612_v45  ;;  %v2545_v5 = vld [vmem:[#allocation2 + $0x260] sm:$0xf0]  ;;  %v2968_v45 = vor.u32 %v3458_v37, %v2967_v36  ;;  %v2423_v61 = vld [vmem:[#allocation2 + $0x148] sm:$0xf] }
  0x58   :  { %1659 = vmatmul.bf16.gmra.mxu2 %v3653_v51  ;;  %v3285_v7 = vld [vmem:[#allocation2 + $0x44] sm:$0xf]  ;;  %v2548_v13 = vor.u32 %v3349_v4, %v2545_v5  ;;  %v3322_v62 = vld [vmem:[#allocation2 + $0x164] sm:$0xf0] }
  0x59   :  { %1726 = vmatpush.bf16.msrb.mxu2 %v2868_v40  ;;  %1621 = vmatmul.bf16.gmra.mxu0 %v3649_v44  ;;  %v2289_v10 = vld [vmem:[#allocation2 + $0x60] sm:$0xf0]  ;;  %v2488_v40 = vor.u32 %v3338_v32, %v2487_v31  ;;  %v2679_v1 = vld [vmem:[#allocation2 + $0x348] sm:$0xf] }
  0x5a   :  { %1678 = vmatmul.bf16.gmra.mxu3 %v3655_v56  ;;  %v3477_v11 = vld [vmem:[#allocation2 + $0x644] sm:$0xf]  ;;  %1689 = vmatpush.bf16.msrb.mxu0 %v2324_v6  ;;  %v2292_v20 = vor.u32 %v3285_v7, %v2289_v10  ;;  %v3386_v2 = vld [vmem:[#allocation2 + $0x364] sm:$0xf0]  ;;  %v2424_v7 = vor.u32 %v3322_v62, %v2423_v61 }
  0x5b   :  { %1745 = vmatpush.bf16.msrb.mxu3 %v3124_v59  ;;  %v3057_v12 = vld [vmem:[#allocation2 + $0x660] sm:$0xf0]  ;;  %1708 = vmatpush.bf16.msrb.mxu1 %v2580_v0  ;;  %v2456_v59 = vor.u32 %v3330_v42, %v2455_v41  ;;  %v2936_v0 = vor.u32 %v3450_v58, %v2935_v55  ;;  %v3191_v3 = vld [vmem:[#allocation2 + $0x748] sm:$0xf] }
  0x5c   :  { %v3405_v14 = vld [vmem:[#allocation2 + $0x404] sm:$0xf]  ;;  %v3060_v24 = vor.u32 %v3477_v11, %v3057_v12  ;;  %v3514_v4 = vld [vmem:[#allocation2 + $0x764] sm:$0xf0] }
  0x5d   :  { %1727 = vmatpush.bf16.msrb.mxu2 %v2836_v60  ;;  %v2769_v15 = vld [vmem:[#allocation2 + $0x420] sm:$0xf0]  ;;  %v2712_v60 = vor.u32 %v3394_v47, %v2711_v46  ;;  %v2903_v5 = vld [vmem:[#allocation2 + $0x508] sm:$0xf]  ;;  %v3192_v11 = vor.u32 %v3514_v4, %v3191_v3 }
  0x5e   :  { %v3341_v16 = vld [vmem:[#allocation2 + $0x204] sm:$0xf]  ;;  %v2772_v25 = vor.u32 %v3405_v14, %v2769_v15  ;;  %1690 = vmatpush.bf16.msrb.mxu0 %v2292_v20  ;;  %v3442_v6 = vld [vmem:[#allocation2 + $0x524] sm:$0xf0] }
  0x5f   :  { %v2513_v17 = vld [vmem:[#allocation2 + $0x220] sm:$0xf0]  ;;  %1746 = vmatpush.bf16.msrb.mxu3 %v3092_v8  ;;  %1709 = vmatpush.bf16.msrb.mxu1 %v2548_v13  ;;  %v2680_v8 = vor.u32 %v3386_v2, %v2679_v1  ;;  %v3314_v10 = vld [vmem:[#allocation2 + $0x124] sm:$0xf0]  ;;  %v2904_v12 = vor.u32 %v3442_v6, %v2903_v5 }
  0x60   :  { %v3277_v21 = vld [vmem:[#allocation2 + $0x4] sm:$0xf]  ;;  %v2516_v29 = vor.u32 %v3341_v16, %v2513_v17  ;;  %v2647_v13 = vld [vmem:[#allocation2 + $0x308] sm:$0xf] }
  0x61   :  { %1728 = vmatpush.bf16.msrb.mxu2 %v2804_v9  ;;  %v2257_v26 = vld [vmem:[#allocation2 + $0x20] sm:$0xf0]  ;;  %v2391_v9 = vld [vmem:[#allocation2 + $0x108] sm:$0xf] }
  0x62   :  { %v3469_v27 = vld [vmem:[#allocation2 + $0x604] sm:$0xf]  ;;  %v2260_v38 = vor.u32 %v3277_v21, %v2257_v26  ;;  %v3378_v14 = vld [vmem:[#allocation2 + $0x324] sm:$0xf0]  ;;  %v2392_v19 = vor.u32 %v3314_v10, %v2391_v9 }
  0x63   :  { %v3025_v28 = vld [vmem:[#allocation2 + $0x620] sm:$0xf0]  ;;  %1747 = vmatpush.bf16.msrb.mxu3 %v3060_v24  ;;  %1710 = vmatpush.bf16.msrb.mxu1 %v2516_v29  ;;  %v3159_v15 = vld [vmem:[#allocation2 + $0x708] sm:$0xf]  ;;  %v2648_v20 = vor.u32 %v3378_v14, %v2647_v13  ;;  %v2489_v13 = vld [vmem:[#allocation2 + $0x1e8] sm:$0xf0] }
  0x64   :  { %v3028_v39 = vor.u32 %v3469_v27, %v3025_v28  ;;  %1691 = vmatpush.bf16.msrb.mxu0 %v2260_v38  ;;  %v3506_v16 = vld [vmem:[#allocation2 + $0x724] sm:$0xf0]  ;;  %v3398_v14 = vld [vmem:[#allocation2 + $0x3cc] sm:$0xf] }
  0x65   :  { %1729 = vmatpush.bf16.msrb.mxu2 %v2772_v25  ;;  %v2871_v17 = vld [vmem:[#allocation2 + $0x4c8] sm:$0xf]  ;;  %v3160_v23 = vor.u32 %v3506_v16, %v3159_v15  ;;  %v2745_v15 = vld [vmem:[#allocation2 + $0x3e8] sm:$0xf0] }
  0x66   :  { %1711 = vmatmul.bf16.vlgmr.msrb.gmra.mxu1 %v3615_v53  ;;  %v3434_v18 = vld [vmem:[#allocation2 + $0x4e4] sm:$0xf0]  ;;  %v3526_v16 = vld [vmem:[#allocation2 + $0x7cc] sm:$0xf] }
  0x67   :  { %1779 = vmatpush.bf16.msra.mxu1 %v2744_v34  ;;  %1748 = vmatpush.bf16.msrb.mxu3 %v3028_v39  ;;  %v2359_v21 = vld [vmem:[#allocation2 + $0xc8] sm:$0xf]  ;;  %v2872_v24 = vor.u32 %v3434_v18, %v2871_v17  ;;  %v3257_v17 = vld [vmem:[#allocation2 + $0x7e8] sm:$0xf0] }
  0x68   :  { %1760 = vmatpush.bf16.msra.mxu0 %v2488_v40  ;;  %1730 = vmatmul.bf16.vlgmr.msrb.gmra.mxu2 %v3617_v54  ;;  %v3306_v22 = vld [vmem:[#allocation2 + $0xe4] sm:$0xf0] }
  0x69   :  { %1798 = vmatpush.bf16.msra.mxu2 %v3000_v30  ;;  %1692 = vmatmul.bf16.vlgmr.msrb.gmra.mxu0 %v3613_v48  ;;  %v2615_v25 = vld [vmem:[#allocation2 + $0x2c8] sm:$0xf]  ;;  %v2360_v31 = vor.u32 %v3306_v22, %v2359_v21  ;;  %v2969_v21 = vld [vmem:[#allocation2 + $0x5a8] sm:$0xf0] }
  0x6a   :  { %1749 = vmatmul.bf16.vlgmr.msrb.gmra.mxu3 %v3619_v57  ;;  %v3370_v26 = vld [vmem:[#allocation2 + $0x2e4] sm:$0xf0] }
  0x6b   :  { %1817 = vmatpush.bf16.msra.mxu3 %v3256_v43  ;;  %1780 = vmatpush.bf16.msra.mxu1 %v2712_v60  ;;  %v3127_v27 = vld [vmem:[#allocation2 + $0x6c8] sm:$0xf]  ;;  %v2616_v32 = vor.u32 %v3370_v26, %v2615_v25  ;;  %v3260_v25 = vor.u32 %v3526_v16, %v3257_v17  ;;  %v3326_v26 = vld [vmem:[#allocation2 + $0x18c] sm:$0xf] }
  0x6c   :  { %1761 = vmatpush.bf16.msra.mxu0 %v2456_v59  ;;  %v3498_v28 = vld [vmem:[#allocation2 + $0x6e4] sm:$0xf0]  ;;  %v3294_v16 = vld [vmem:[#allocation2 + $0x8c] sm:$0xf] }
  0x6d   :  { %1799 = vmatpush.bf16.msra.mxu2 %v2968_v45  ;;  %v2839_v29 = vld [vmem:[#allocation2 + $0x488] sm:$0xf]  ;;  %v3128_v35 = vor.u32 %v3498_v28, %v3127_v27  ;;  %v2457_v27 = vld [vmem:[#allocation2 + $0x1a8] sm:$0xf0] }
  0x6e   :  { %v3426_v30 = vld [vmem:[#allocation2 + $0x4a4] sm:$0xf0]  ;;  %v2329_v17 = vld [vmem:[#allocation2 + $0xa8] sm:$0xf0] }
  0x6f   :  { %1818 = vmatpush.bf16.msra.mxu3 %v3224_v63  ;;  %1781 = vmatpush.bf16.msra.mxu1 %v2680_v8  ;;  %v2327_v33 = vld [vmem:[#allocation2 + $0x88] sm:$0xf]  ;;  %v2840_v36 = vor.u32 %v3426_v30, %v2839_v29  ;;  %v3462_v63 = vld [vmem:[#allocation2 + $0x5cc] sm:$0xf] }
  0x70   :  { %1762 = vmatpush.bf16.msra.mxu0 %v2424_v7  ;;  %v3298_v34 = vld [vmem:[#allocation2 + $0xa4] sm:$0xf0]  ;;  %v3390_v29 = vld [vmem:[#allocation2 + $0x38c] sm:$0xf] }
  0x71   :  { %1800 = vmatpush.bf16.msra.mxu2 %v2936_v0  ;;  %v2583_v37 = vld [vmem:[#allocation2 + $0x288] sm:$0xf]  ;;  %v2328_v43 = vor.u32 %v3298_v34, %v2327_v33  ;;  %v3001_v0 = vld [vmem:[#allocation2 + $0x5e8] sm:$0xf0] }
  0x72   :  { %v3362_v38 = vld [vmem:[#allocation2 + $0x2a4] sm:$0xf0]  ;;  %v2713_v30 = vld [vmem:[#allocation2 + $0x3a8] sm:$0xf0] }
  0x73   :  { %1819 = vmatpush.bf16.msra.mxu3 %v3192_v11  ;;  %1782 = vmatpush.bf16.msra.mxu1 %v2648_v20  ;;  %v3095_v39 = vld [vmem:[#allocation2 + $0x688] sm:$0xf]  ;;  %v2584_v45 = vor.u32 %v3362_v38, %v2583_v37  ;;  %v3004_v11 = vor.u32 %v3462_v63, %v3001_v0  ;;  %v3454_v20 = vld [vmem:[#allocation2 + $0x58c] sm:$0xf]  ;;  %v2716_v38 = vor.u32 %v3390_v29, %v2713_v30 }
  0x74   :  { %1763 = vmatpush.bf16.msra.mxu0 %v2392_v19  ;;  %v3490_v40 = vld [vmem:[#allocation2 + $0x6a4] sm:$0xf0]  ;;  %v2972_v28 = vor.u32 %v3454_v20, %v2969_v21  ;;  %v3225_v33 = vld [vmem:[#allocation2 + $0x7a8] sm:$0xf0] }
  0x75   :  { %1801 = vmatpush.bf16.msra.mxu2 %v2904_v12  ;;  %v2807_v41 = vld [vmem:[#allocation2 + $0x448] sm:$0xf]  ;;  %v3096_v49 = vor.u32 %v3490_v40, %v3095_v39  ;;  %v3334_v12 = vld [vmem:[#allocation2 + $0x1cc] sm:$0xf] }
  0x76   :  { %v3418_v42 = vld [vmem:[#allocation2 + $0x464] sm:$0xf0]  ;;  %1716 = vmatmul.bf16.gmra.mxu1 %v3651_v50  ;;  %v3446_v34 = vld [vmem:[#allocation2 + $0x54c] sm:$0xf] }
  0x77   :  { %1820 = vmatpush.bf16.msra.mxu3 %v3160_v23  ;;  %1783 = vmatpush.bf16.msra.mxu1 %v2616_v32  ;;  %v2295_v46 = vld [vmem:[#allocation2 + $0x48] sm:$0xf]  ;;  %v2808_v52 = vor.u32 %v3418_v42, %v2807_v41  ;;  %v2492_v23 = vor.u32 %v3334_v12, %v2489_v13  ;;  %v3518_v32 = vld [vmem:[#allocation2 + $0x78c] sm:$0xf] }
  0x78   :  { %1764 = vmatpush.bf16.msra.mxu0 %v2360_v31  ;;  %v3290_v47 = vld [vmem:[#allocation2 + $0x64] sm:$0xf0]  ;;  %1735 = vmatmul.bf16.gmra.mxu2 %v3653_v51  ;;  %v2460_v31 = vor.u32 %v3326_v26, %v2457_v27  ;;  %v2425_v37 = vld [vmem:[#allocation2 + $0x168] sm:$0xf0]  ;;  %v3228_v39 = vor.u32 %v3518_v32, %v3225_v33 }
  0x79   :  { %1802 = vmatpush.bf16.msra.mxu2 %v2872_v24  ;;  %v2551_v55 = vld [vmem:[#allocation2 + $0x248] sm:$0xf]  ;;  %1697 = vmatmul.bf16.gmra.mxu0 %v3649_v44  ;;  %v2296_v1 = vor.u32 %v3290_v47, %v2295_v46  ;;  %v2748_v24 = vor.u32 %v3398_v14, %v2745_v15  ;;  %v3382_v40 = vld [vmem:[#allocation2 + $0x34c] sm:$0xf] }
  0x7a   :  { %v3354_v58 = vld [vmem:[#allocation2 + $0x264] sm:$0xf0]  ;;  %1754 = vmatmul.bf16.gmra.mxu3 %v3655_v56  ;;  %v2681_v41 = vld [vmem:[#allocation2 + $0x368] sm:$0xf0] }
  0x7b   :  { %1821 = vmatpush.bf16.msra.mxu3 %v3128_v35  ;;  %v3063_v59 = vld [vmem:[#allocation2 + $0x648] sm:$0xf]  ;;  %1784 = vmatpush.bf16.msra.mxu1 %v2584_v45  ;;  %v2552_v2 = vor.u32 %v3354_v58, %v2551_v55  ;;  %v2937_v35 = vld [vmem:[#allocation2 + $0x568] sm:$0xf0]  ;;  %v2684_v58 = vor.u32 %v3382_v40, %v2681_v41 }
  0x7c   :  { %v3482_v60 = vld [vmem:[#allocation2 + $0x664] sm:$0xf0]  ;;  %1765 = vmatpush.bf16.msra.mxu0 %v2328_v43  ;;  %v2940_v42 = vor.u32 %v3446_v34, %v2937_v35  ;;  %v3510_v45 = vld [vmem:[#allocation2 + $0x74c] sm:$0xf] }
  0x7d   :  { %1803 = vmatpush.bf16.msra.mxu2 %v2840_v36  ;;  %v2775_v61 = vld [vmem:[#allocation2 + $0x408] sm:$0xf]  ;;  %v3064_v6 = vor.u32 %v3482_v60, %v3063_v59  ;;  %v3318_v36 = vld [vmem:[#allocation2 + $0x14c] sm:$0xf] }
  0x7e   :  { %v3410_v62 = vld [vmem:[#allocation2 + $0x424] sm:$0xf0]  ;;  %v2428_v43 = vor.u32 %v3318_v36, %v2425_v37  ;;  %v3193_v46 = vld [vmem:[#allocation2 + $0x768] sm:$0xf0] }
  0x7f   :  { %v2263_v3 = vld [vmem:[#allocation2 + $0x8] sm:$0xf]  ;;  %1822 = vmatpush.bf16.msra.mxu3 %v3096_v49  ;;  %v2776_v7 = vor.u32 %v3410_v62, %v2775_v61  ;;  %1785 = vmatpush.bf16.msra.mxu1 %v2552_v2  ;;  %v3438_v47 = vld [vmem:[#allocation2 + $0x50c] sm:$0xf]  ;;  %v3196_v59 = vor.u32 %v3510_v45, %v3193_v46  ;;  %v2495_v45 = vld [vmem:[#allocation2 + $0x1d0] sm:$0xf] }
  0x80   :  { %v3282_v4 = vld [vmem:[#allocation2 + $0x24] sm:$0xf0]  ;;  %1766 = vmatpush.bf16.msra.mxu0 %v2296_v1  ;;  %v2905_v49 = vld [vmem:[#allocation2 + $0x528] sm:$0xf0]  ;;  %v3339_v46 = vld [vmem:[#allocation2 + $0x1ec] sm:$0xf0] }
  0x81   :  { %v2519_v5 = vld [vmem:[#allocation2 + $0x208] sm:$0xf]  ;;  %1804 = vmatpush.bf16.msra.mxu2 %v2808_v52  ;;  %v2264_v18 = vor.u32 %v3282_v4, %v2263_v3  ;;  %v3310_v52 = vld [vmem:[#allocation2 + $0x10c] sm:$0xf]  ;;  %v2908_v62 = vor.u32 %v3438_v47, %v2905_v49 }
  0x82   :  { %v3346_v8 = vld [vmem:[#allocation2 + $0x224] sm:$0xf0]  ;;  %v2393_v55 = vld [vmem:[#allocation2 + $0x128] sm:$0xf0] }
  0x83   :  { %v3031_v9 = vld [vmem:[#allocation2 + $0x608] sm:$0xf]  ;;  %v2520_v19 = vor.u32 %v3346_v8, %v2519_v5  ;;  %1823 = vmatpush.bf16.msra.mxu3 %v3064_v6  ;;  %v3374_v60 = vld [vmem:[#allocation2 + $0x30c] sm:$0xf]  ;;  %v2396_v63 = vor.u32 %v3310_v52, %v2393_v55 }
  0x84   :  { %v3474_v10 = vld [vmem:[#allocation2 + $0x624] sm:$0xf0]  ;;  %1767 = vmatpush.bf16.msra.mxu0 %v2264_v18  ;;  %v2649_v61 = vld [vmem:[#allocation2 + $0x328] sm:$0xf0] }
  0x85   :  { %1805 = vmatpush.bf16.msra.mxu2 %v2776_v7  ;;  %v3032_v22 = vor.u32 %v3474_v10, %v3031_v9  ;;  %1786 = vmatpush.bf16.msra.mxu1 %v2520_v19  ;;  %v3502_v0 = vld [vmem:[#allocation2 + $0x70c] sm:$0xf]  ;;  %v2652_v6 = vor.u32 %v3374_v60, %v2649_v61 }
  0x86   :  { %v3161_v1 = vld [vmem:[#allocation2 + $0x728] sm:$0xf0] }
  0x87   :  { %1824 = vmatpush.bf16.msra.mxu3 %v3032_v22  ;;  %v3430_v2 = vld [vmem:[#allocation2 + $0x4cc] sm:$0xf]  ;;  %v3164_v7 = vor.u32 %v3502_v0, %v3161_v1  ;;  %v2496_v1 = vor.u32 %v3339_v46, %v2495_v45 }
  0x88   :  { %1836 = vmatpush.bf16.msrb.mxu0 %v2492_v23  ;;  %1787 = vmatmul.bf16.vlgmr.msra.gmra.mxu1 %v3615_v53  ;;  %v2873_v3 = vld [vmem:[#allocation2 + $0x4e8] sm:$0xf0]  ;;  %v2332_v23 = vor.u32 %v3294_v16, %v2329_v17  ;;  %v3231_v16 = vld [vmem:[#allocation2 + $0x790] sm:$0xf] }
  0x89   :  { %1874 = vmatpush.bf16.msrb.mxu2 %v3004_v11  ;;  %1855 = vmatpush.bf16.msrb.mxu1 %v2748_v24  ;;  %v3302_v4 = vld [vmem:[#allocation2 + $0xcc] sm:$0xf]  ;;  %v2876_v10 = vor.u32 %v3430_v2, %v2873_v3  ;;  %v3263_v2 = vld [vmem:[#allocation2 + $0x7d0] sm:$0xf] }
  0x8a   :  { %1768 = vmatmul.bf16.vlgmr.msra.gmra.mxu0 %v3613_v48  ;;  %1806 = vmatmul.bf16.vlgmr.msra.gmra.mxu2 %v3617_v54  ;;  %v2361_v5 = vld [vmem:[#allocation2 + $0xe8] sm:$0xf0]  ;;  %v3531_v3 = vld [vmem:[#allocation2 + $0x7ec] sm:$0xf0] }
  0x8b   :  { %1893 = vmatpush.bf16.msrb.mxu3 %v3260_v25  ;;  %v3366_v8 = vld [vmem:[#allocation2 + $0x2cc] sm:$0xf]  ;;  %v2364_v11 = vor.u32 %v3302_v4, %v2361_v5  ;;  %v2975_v4 = vld [vmem:[#allocation2 + $0x590] sm:$0xf] }
  0x8c   :  { %1837 = vmatpush.bf16.msrb.mxu0 %v2460_v31  ;;  %1825 = vmatmul.bf16.vlgmr.msra.gmra.mxu3 %v3619_v57  ;;  %v2617_v9 = vld [vmem:[#allocation2 + $0x2e8] sm:$0xf0]  ;;  %v3459_v5 = vld [vmem:[#allocation2 + $0x5ac] sm:$0xf0] }
  0x8d   :  { %1875 = vmatpush.bf16.msrb.mxu2 %v2972_v28  ;;  %1856 = vmatpush.bf16.msrb.mxu1 %v2716_v38  ;;  %v3494_v12 = vld [vmem:[#allocation2 + $0x6cc] sm:$0xf]  ;;  %v2620_v18 = vor.u32 %v3366_v8, %v2617_v9  ;;  %v3523_v17 = vld [vmem:[#allocation2 + $0x7ac] sm:$0xf0] }
  0x8e   :  { %v3129_v13 = vld [vmem:[#allocation2 + $0x6e8] sm:$0xf0] }
  0x8f   :  { %1894 = vmatpush.bf16.msrb.mxu3 %v3228_v39  ;;  %v3422_v14 = vld [vmem:[#allocation2 + $0x48c] sm:$0xf]  ;;  %v3132_v19 = vor.u32 %v3494_v12, %v3129_v13  ;;  %v2719_v12 = vld [vmem:[#allocation2 + $0x390] sm:$0xf]  ;;  %v2976_v13 = vor.u32 %v3459_v5, %v2975_v4 }
  0x90   :  { %1838 = vmatpush.bf16.msrb.mxu0 %v2428_v43  ;;  %v2841_v15 = vld [vmem:[#allocation2 + $0x4a8] sm:$0xf0]  ;;  %v3467_v43 = vld [vmem:[#allocation2 + $0x5ec] sm:$0xf0] }
  0x91   :  { %1876 = vmatpush.bf16.msrb.mxu2 %v2940_v42  ;;  %1857 = vmatpush.bf16.msrb.mxu1 %v2684_v58  ;;  %v3358_v20 = vld [vmem:[#allocation2 + $0x28c] sm:$0xf]  ;;  %v2844_v22 = vor.u32 %v3422_v14, %v2841_v15  ;;  %v3007_v42 = vld [vmem:[#allocation2 + $0x5d0] sm:$0xf] }
  0x92   :  { %v2585_v21 = vld [vmem:[#allocation2 + $0x2a8] sm:$0xf0]  ;;  %v3008_v0 = vor.u32 %v3467_v43, %v3007_v42  ;;  %v3395_v15 = vld [vmem:[#allocation2 + $0x3ac] sm:$0xf0] }
  0x93   :  { %1895 = vmatpush.bf16.msrb.mxu3 %v3196_v59  ;;  %v3486_v24 = vld [vmem:[#allocation2 + $0x68c] sm:$0xf]  ;;  %v2588_v30 = vor.u32 %v3358_v20, %v2585_v21  ;;  %v2720_v20 = vor.u32 %v3395_v15, %v2719_v12  ;;  %v3232_v21 = vor.u32 %v3523_v17, %v3231_v16  ;;  %v2879_v42 = vld [vmem:[#allocation2 + $0x4d0] sm:$0xf] }
  0x94   :  { %1839 = vmatpush.bf16.msrb.mxu0 %v2396_v63  ;;  %v3097_v25 = vld [vmem:[#allocation2 + $0x6a8] sm:$0xf0]  ;;  %v3403_v63 = vld [vmem:[#allocation2 + $0x3ec] sm:$0xf0] }
  0x95   :  { %1877 = vmatpush.bf16.msrb.mxu2 %v2908_v62  ;;  %1858 = vmatpush.bf16.msrb.mxu1 %v2652_v6  ;;  %v3414_v26 = vld [vmem:[#allocation2 + $0x44c] sm:$0xf]  ;;  %v3100_v31 = vor.u32 %v3486_v24, %v3097_v25  ;;  %v2751_v62 = vld [vmem:[#allocation2 + $0x3d0] sm:$0xf] }
  0x96   :  { %v2809_v27 = vld [vmem:[#allocation2 + $0x468] sm:$0xf0]  ;;  %v2463_v6 = vld [vmem:[#allocation2 + $0x190] sm:$0xf] }
  0x97   :  { %1896 = vmatpush.bf16.msrb.mxu3 %v3164_v7  ;;  %v3286_v28 = vld [vmem:[#allocation2 + $0x4c] sm:$0xf]  ;;  %v2812_v35 = vor.u32 %v3414_v26, %v2809_v27  ;;  %v3331_v7 = vld [vmem:[#allocation2 + $0x1ac] sm:$0xf0] }
  0x98   :  { %1840 = vmatpush.bf16.msrb.mxu0 %v2364_v11  ;;  %v2297_v29 = vld [vmem:[#allocation2 + $0x68] sm:$0xf0]  ;;  %1792 = vmatmul.bf16.gmra.mxu1 %v3651_v50  ;;  %v3264_v11 = vor.u32 %v3531_v3, %v3263_v2  ;;  %v2464_v14 = vor.u32 %v3331_v7, %v2463_v6  ;;  %v2687_v24 = vld [vmem:[#allocation2 + $0x350] sm:$0xf] }
  0x99   :  { %1878 = vmatpush.bf16.msrb.mxu2 %v2876_v10  ;;  %1859 = vmatpush.bf16.msrb.mxu1 %v2620_v18  ;;  %v3350_v32 = vld [vmem:[#allocation2 + $0x24c] sm:$0xf]  ;;  %v2300_v36 = vor.u32 %v3286_v28, %v2297_v29  ;;  %v2752_v10 = vor.u32 %v3403_v63, %v2751_v62  ;;  %v2943_v18 = vld [vmem:[#allocation2 + $0x550] sm:$0xf] }
  0x9a   :  { %v2553_v33 = vld [vmem:[#allocation2 + $0x268] sm:$0xf0]  ;;  %1773 = vmatmul.bf16.gmra.mxu0 %v3649_v44  ;;  %1811 = vmatmul.bf16.gmra.mxu2 %v3653_v51  ;;  %v3387_v25 = vld [vmem:[#allocation2 + $0x36c] sm:$0xf0] }
  0x9b   :  { %1897 = vmatpush.bf16.msrb.mxu3 %v3132_v19  ;;  %v3478_v34 = vld [vmem:[#allocation2 + $0x64c] sm:$0xf]  ;;  %v2556_v47 = vor.u32 %v3350_v32, %v2553_v33  ;;  %v3451_v19 = vld [vmem:[#allocation2 + $0x56c] sm:$0xf0]  ;;  %v2688_v32 = vor.u32 %v3387_v25, %v2687_v24 }
  0x9c   :  { %1841 = vmatpush.bf16.msrb.mxu0 %v2332_v23  ;;  %v3065_v37 = vld [vmem:[#allocation2 + $0x668] sm:$0xf0]  ;;  %1830 = vmatmul.bf16.gmra.mxu3 %v3655_v56  ;;  %v3323_v23 = vld [vmem:[#allocation2 + $0x16c] sm:$0xf0]  ;;  %v2944_v28 = vor.u32 %v3451_v19, %v2943_v18 }
  0x9d   :  { %1879 = vmatpush.bf16.msrb.mxu2 %v2844_v22  ;;  %v3406_v38 = vld [vmem:[#allocation2 + $0x40c] sm:$0xf]  ;;  %1860 = vmatpush.bf16.msrb.mxu1 %v2588_v30  ;;  %v3068_v49 = vor.u32 %v3478_v34, %v3065_v37  ;;  %v2431_v22 = vld [vmem:[#allocation2 + $0x150] sm:$0xf] }
  0x9e   :  { %v2777_v39 = vld [vmem:[#allocation2 + $0x428] sm:$0xf0]  ;;  %v3199_v26 = vld [vmem:[#allocation2 + $0x750] sm:$0xf]  ;;  %v2432_v29 = vor.u32 %v3323_v23, %v2431_v22 }
  0x9f   :  { %v3278_v40 = vld [vmem:[#allocation2 + $0xc] sm:$0xf]  ;;  %1898 = vmatpush.bf16.msrb.mxu3 %v3100_v31  ;;  %v2780_v59 = vor.u32 %v3406_v38, %v2777_v39  ;;  %v3515_v27 = vld [vmem:[#allocation2 + $0x76c] sm:$0xf0] }
  0xa0   :  { %v2265_v41 = vld [vmem:[#allocation2 + $0x28] sm:$0xf0]  ;;  %1842 = vmatpush.bf16.msrb.mxu0 %v2300_v36  ;;  %v2911_v30 = vld [vmem:[#allocation2 + $0x510] sm:$0xf]  ;;  %v3200_v33 = vor.u32 %v3515_v27, %v3199_v26 }
  0xa1   :  { %v3342_v52 = vld [vmem:[#allocation2 + $0x20c] sm:$0xf]  ;;  %1880 = vmatpush.bf16.msrb.mxu2 %v2812_v35  ;;  %v2268_v60 = vor.u32 %v3278_v40, %v2265_v41  ;;  %1861 = vmatpush.bf16.msrb.mxu1 %v2556_v47  ;;  %v3443_v31 = vld [vmem:[#allocation2 + $0x52c] sm:$0xf0] }
  0xa2   :  { %v2521_v55 = vld [vmem:[#allocation2 + $0x228] sm:$0xf0]  ;;  %v2399_v34 = vld [vmem:[#allocation2 + $0x110] sm:$0xf]  ;;  %v2912_v40 = vor.u32 %v3443_v31, %v2911_v30 }
  0xa3   :  { %v3470_v58 = vld [vmem:[#allocation2 + $0x60c] sm:$0xf]  ;;  %1899 = vmatpush.bf16.msrb.mxu3 %v3068_v49  ;;  %v2524_v8 = vor.u32 %v3342_v52, %v2521_v55  ;;  %v3315_v35 = vld [vmem:[#allocation2 + $0x12c] sm:$0xf0] }
  0xa4   :  { %v3033_v61 = vld [vmem:[#allocation2 + $0x628] sm:$0xf0]  ;;  %1843 = vmatpush.bf16.msrb.mxu0 %v2268_v60  ;;  %v2655_v36 = vld [vmem:[#allocation2 + $0x310] sm:$0xf]  ;;  %v2400_v41 = vor.u32 %v3315_v35, %v2399_v34  ;;  %v3335_v34 = vld [vmem:[#allocation2 + $0x1d4] sm:$0xf] }
  0xa5   :  { %v3036_v9 = vor.u32 %v3470_v58, %v3033_v61  ;;  %1881 = vmatpush.bf16.msrb.mxu2 %v2780_v59  ;;  %1862 = vmatpush.bf16.msrb.mxu1 %v2524_v8  ;;  %v3379_v37 = vld [vmem:[#allocation2 + $0x32c] sm:$0xf0]  ;;  %v2497_v35 = vld [vmem:[#allocation2 + $0x1f0] sm:$0xf0] }
  0xa6   :  { %v3167_v38 = vld [vmem:[#allocation2 + $0x710] sm:$0xf]  ;;  %v2656_v45 = vor.u32 %v3379_v37, %v2655_v36  ;;  %v3399_v36 = vld [vmem:[#allocation2 + $0x3d4] sm:$0xf] }
  0xa7   :  { %1900 = vmatpush.bf16.msrb.mxu3 %v3036_v9  ;;  %v3507_v39 = vld [vmem:[#allocation2 + $0x72c] sm:$0xf0] }
  0xa8   :  { %1912 = vmatpush.bf16.msra.mxu0 %v2496_v1  ;;  %1863 = vmatmul.bf16.vlgmr.msrb.gmra.mxu1 %v3615_v53  ;;  %v3435_v43 = vld [vmem:[#allocation2 + $0x4ec] sm:$0xf0]  ;;  %v3168_v46 = vor.u32 %v3507_v39, %v3167_v38  ;;  %v2753_v39 = vld [vmem:[#allocation2 + $0x3f0] sm:$0xf0] }
  0xa9   :  { %1950 = vmatpush.bf16.msra.mxu2 %v3008_v0  ;;  %1931 = vmatpush.bf16.msra.mxu1 %v2752_v10  ;;  %v2367_v47 = vld [vmem:[#allocation2 + $0xd0] sm:$0xf]  ;;  %v2880_v60 = vor.u32 %v3435_v43, %v2879_v42 }
  0xaa   :  { %1844 = vmatmul.bf16.vlgmr.msrb.gmra.mxu0 %v3613_v48  ;;  %1882 = vmatmul.bf16.vlgmr.msrb.gmra.mxu2 %v3617_v54  ;;  %v3307_v49 = vld [vmem:[#allocation2 + $0xec] sm:$0xf0] }
  0xab   :  { %1969 = vmatpush.bf16.msra.mxu3 %v3264_v11  ;;  %v2623_v52 = vld [vmem:[#allocation2 + $0x2d0] sm:$0xf]  ;;  %v2368_v61 = vor.u32 %v3307_v49, %v2367_v47  ;;  %v2500_v47 = vor.u32 %v3335_v34, %v2497_v35  ;;  %v3455_v49 = vld [vmem:[#allocation2 + $0x594] sm:$0xf] }
  0xac   :  { %1913 = vmatpush.bf16.msra.mxu0 %v2464_v14  ;;  %1901 = vmatmul.bf16.vlgmr.msrb.gmra.mxu3 %v3619_v57  ;;  %v3371_v55 = vld [vmem:[#allocation2 + $0x2ec] sm:$0xf0] }
  0xad   :  { %1951 = vmatpush.bf16.msra.mxu2 %v2976_v13  ;;  %1932 = vmatpush.bf16.msra.mxu1 %v2720_v20  ;;  %v3135_v58 = vld [vmem:[#allocation2 + $0x6d0] sm:$0xf]  ;;  %v2624_v0 = vor.u32 %v3371_v55, %v2623_v52  ;;  %v2977_v52 = vld [vmem:[#allocation2 + $0x5b0] sm:$0xf0]  ;;  %v2756_v55 = vor.u32 %v3399_v36, %v2753_v39 }
  0xae   :  { %v3499_v59 = vld [vmem:[#allocation2 + $0x6ec] sm:$0xf0]  ;;  %v3367_v39 = vld [vmem:[#allocation2 + $0x2d4] sm:$0xf] }
  0xaf   :  { %1970 = vmatpush.bf16.msra.mxu3 %v3232_v21  ;;  %v2847_v62 = vld [vmem:[#allocation2 + $0x490] sm:$0xf]  ;;  %v3136_v1 = vor.u32 %v3499_v59, %v3135_v58  ;;  %v3327_v59 = vld [vmem:[#allocation2 + $0x194] sm:$0xf] }
  0xb0   :  { %1914 = vmatpush.bf16.msra.mxu0 %v2432_v29  ;;  %v3427_v63 = vld [vmem:[#allocation2 + $0x4ac] sm:$0xf0] }
  0xb1   :  { %1952 = vmatpush.bf16.msra.mxu2 %v2944_v28  ;;  %1933 = vmatpush.bf16.msra.mxu1 %v2688_v32  ;;  %v2335_v2 = vld [vmem:[#allocation2 + $0x90] sm:$0xf]  ;;  %v2848_v8 = vor.u32 %v3427_v63, %v2847_v62  ;;  %v3463_v32 = vld [vmem:[#allocation2 + $0x5d4] sm:$0xf] }
  0xb2   :  { %v3299_v3 = vld [vmem:[#allocation2 + $0xac] sm:$0xf0]  ;;  %v2721_v62 = vld [vmem:[#allocation2 + $0x3b0] sm:$0xf0] }
  0xb3   :  { %1971 = vmatpush.bf16.msra.mxu3 %v3200_v33  ;;  %v2591_v4 = vld [vmem:[#allocation2 + $0x290] sm:$0xf]  ;;  %v2336_v9 = vor.u32 %v3299_v3, %v2335_v2  ;;  %v3009_v33 = vld [vmem:[#allocation2 + $0x5f0] sm:$0xf0] }
  0xb4   :  { %1915 = vmatpush.bf16.msra.mxu0 %v2400_v41  ;;  %v3363_v5 = vld [vmem:[#allocation2 + $0x2ac] sm:$0xf0]  ;;  %v3265_v41 = vld [vmem:[#allocation2 + $0x7f0] sm:$0xf0] }
  0xb5   :  { %1953 = vmatpush.bf16.msra.mxu2 %v2912_v40  ;;  %1934 = vmatpush.bf16.msra.mxu1 %v2656_v45  ;;  %v3103_v6 = vld [vmem:[#allocation2 + $0x690] sm:$0xf]  ;;  %v2592_v12 = vor.u32 %v3363_v5, %v2591_v4  ;;  %v3527_v40 = vld [vmem:[#allocation2 + $0x7d4] sm:$0xf]  ;;  %v3688_v45 = vld [vmem:[%s3851_s2] sm:$0xff] }
  0xb6   :  { %v3491_v7 = vld [vmem:[#allocation2 + $0x6ac] sm:$0xf0]  ;;  %v3268_v58 = vor.u32 %v3527_v40, %v3265_v41  ;;  %v3519_v63 = vld [vmem:[#allocation2 + $0x794] sm:$0xf]  ;;  %v3691_v3 = vperm.slane %v3688_v45, 0 }
  0xb7   :  { %1972 = vmatpush.bf16.msra.mxu3 %v3168_v46  ;;  %v2815_v10 = vld [vmem:[#allocation2 + $0x450] sm:$0xf]  ;;  %v3104_v13 = vor.u32 %v3491_v7, %v3103_v6  ;;  %v3012_v46 = vor.u32 %v3463_v32, %v3009_v33  ;;  %v3447_v6 = vld [vmem:[#allocation2 + $0x554] sm:$0xf] }
  0xb8   :  { %1916 = vmatpush.bf16.msra.mxu0 %v2368_v61  ;;  %v3419_v11 = vld [vmem:[#allocation2 + $0x46c] sm:$0xf0]  ;;  %1868 = vmatmul.bf16.gmra.mxu1 %v3651_v50  ;;  %v3391_v61 = vld [vmem:[#allocation2 + $0x394] sm:$0xf] }
  0xb9   :  { %1954 = vmatpush.bf16.msra.mxu2 %v2880_v60  ;;  %1935 = vmatpush.bf16.msra.mxu1 %v2624_v0  ;;  %v2303_v14 = vld [vmem:[#allocation2 + $0x50] sm:$0xf]  ;;  %v2816_v21 = vor.u32 %v3419_v11, %v2815_v10  ;;  %v2465_v60 = vld [vmem:[#allocation2 + $0x1b0] sm:$0xf0]  ;;  %v2724_v4 = vor.u32 %v3391_v61, %v2721_v62 }
  0xba   :  { %v3291_v15 = vld [vmem:[#allocation2 + $0x6c] sm:$0xf0]  ;;  %1849 = vmatmul.bf16.gmra.mxu0 %v3649_v44  ;;  %1887 = vmatmul.bf16.gmra.mxu2 %v3653_v51  ;;  %v3233_v0 = vld [vmem:[#allocation2 + $0x7b0] sm:$0xf0]  ;;  %v2468_v2 = vor.u32 %v3327_v59, %v2465_v60 }
  0xbb   :  { %1973 = vmatpush.bf16.msra.mxu3 %v3136_v1  ;;  %v2559_v16 = vld [vmem:[#allocation2 + $0x250] sm:$0xf]  ;;  %v2304_v22 = vor.u32 %v3291_v15, %v2303_v14  ;;  %v2980_v1 = vor.u32 %v3455_v49, %v2977_v52  ;;  %v3236_v5 = vor.u32 %v3519_v63, %v3233_v0  ;;  %v2945_v7 = vld [vmem:[#allocation2 + $0x570] sm:$0xf0] }
  0xbc   :  { %v3355_v17 = vld [vmem:[#allocation2 + $0x26c] sm:$0xf0]  ;;  %1917 = vmatpush.bf16.msra.mxu0 %v2336_v9  ;;  %1906 = vmatmul.bf16.gmra.mxu3 %v3655_v56  ;;  %v2433_v9 = vld [vmem:[#allocation2 + $0x170] sm:$0xf0] }
  0xbd   :  { %v3071_v18 = vld [vmem:[#allocation2 + $0x650] sm:$0xf]  ;;  %1955 = vmatpush.bf16.msra.mxu2 %v2848_v8  ;;  %1936 = vmatpush.bf16.msra.mxu1 %v2592_v12  ;;  %v2560_v26 = vor.u32 %v3355_v17, %v2559_v16  ;;  %v3319_v8 = vld [vmem:[#allocation2 + $0x154] sm:$0xf]  ;;  %v2948_v17 = vor.u32 %v3447_v6, %v2945_v7 }
  0xbe   :  { %v3483_v19 = vld [vmem:[#allocation2 + $0x66c] sm:$0xf0]  ;;  %v3383_v10 = vld [vmem:[#allocation2 + $0x354] sm:$0xf] }
  0xbf   :  { %v2783_v20 = vld [vmem:[#allocation2 + $0x410] sm:$0xf]  ;;  %1974 = vmatpush.bf16.msra.mxu3 %v3104_v13  ;;  %v3072_v27 = vor.u32 %v3483_v19, %v3071_v18  ;;  %v2689_v12 = vld [vmem:[#allocation2 + $0x370] sm:$0xf0]  ;;  %v2436_v18 = vor.u32 %v3319_v8, %v2433_v9 }
  0xc0   :  { %v3411_v23 = vld [vmem:[#allocation2 + $0x42c] sm:$0xf0]  ;;  %1918 = vmatpush.bf16.msra.mxu0 %v2304_v22  ;;  %v3511_v13 = vld [vmem:[#allocation2 + $0x754] sm:$0xf] }
  0xc1   :  { %v2271_v24 = vld [vmem:[#allocation2 + $0x10] sm:$0xf]  ;;  %1956 = vmatpush.bf16.msra.mxu2 %v2816_v21  ;;  %v2784_v37 = vor.u32 %v3411_v23, %v2783_v20  ;;  %1937 = vmatpush.bf16.msra.mxu1 %v2560_v26  ;;  %v3201_v14 = vld [vmem:[#allocation2 + $0x770] sm:$0xf0]  ;;  %v2692_v21 = vor.u32 %v3383_v10, %v2689_v12 }
  0xc2   :  { %v3283_v25 = vld [vmem:[#allocation2 + $0x2c] sm:$0xf0]  ;;  %v3439_v19 = vld [vmem:[#allocation2 + $0x514] sm:$0xf]  ;;  %v3204_v22 = vor.u32 %v3511_v13, %v3201_v14 }
  0xc3   :  { %v2527_v28 = vld [vmem:[#allocation2 + $0x210] sm:$0xf]  ;;  %v2272_v38 = vor.u32 %v3283_v25, %v2271_v24  ;;  %1975 = vmatpush.bf16.msra.mxu3 %v3072_v27  ;;  %v1636_v16 = vpop.f32.mrf.mxu1  ;;  %v2913_v20 = vld [vmem:[#allocation2 + $0x530] sm:$0xf0] }
  0xc4   :  { %v3347_v29 = vld [vmem:[#allocation2 + $0x22c] sm:$0xf0]  ;;  %v3311_v23 = vld [vmem:[#allocation2 + $0x114] sm:$0xf] }
  0xc5   :  { %v3039_v30 = vld [vmem:[#allocation2 + $0x610] sm:$0xf]  ;;  %v2528_v42 = vor.u32 %v3347_v29, %v2527_v28  ;;  %1957 = vmatpush.bf16.msra.mxu2 %v2784_v37  ;;  %1919 = vmatpush.bf16.msra.mxu0 %v2272_v38  ;;  %v2401_v24 = vld [vmem:[#allocation2 + $0x130] sm:$0xf0] }
  0xc6   :  { %v3475_v31 = vld [vmem:[#allocation2 + $0x62c] sm:$0xf0]  ;;  %v1617_v11 = vpop.f32.mrf.mxu0  ;;  %v3375_v25 = vld [vmem:[#allocation2 + $0x314] sm:$0xf] }
  0xc7   :  { %v3040_v43 = vor.u32 %v3475_v31, %v3039_v30  ;;  %1938 = vmatpush.bf16.msra.mxu1 %v2528_v42  ;;  %v1618_v15 = vadd.f32 %v1617_v11, %v3691_v3  ;;  %v2657_v27 = vld [vmem:[#allocation2 + $0x330] sm:$0xf0]  ;;  %v2916_v30 = vor.u32 %v3439_v19, %v2913_v20  ;;  %v2404_v31 = vor.u32 %v3311_v23, %v2401_v24 }
  0xc8   :  { %v3503_v28 = vld [vmem:[#allocation2 + $0x714] sm:$0xf]  ;;  %v2660_v35 = vor.u32 %v3375_v25, %v2657_v27 }
  0xc9   :  { %1976 = vmatpush.bf16.msra.mxu3 %v3040_v43  ;;  %2026 = vmatpush.bf16.msrb.mxu2 %v3012_v46  ;;  %v1637_v26 = vadd.f32 %v1636_v16, %v1618_v15  ;;  %v3169_v29 = vld [vmem:[#allocation2 + $0x730] sm:$0xf0] }
  0xca   :  { %1988 = vmatpush.bf16.msrb.mxu0 %v2500_v47  ;;  %1939 = vmatmul.bf16.vlgmr.msra.gmra.mxu1 %v3615_v53  ;;  %v3431_v32 = vld [vmem:[#allocation2 + $0x4d4] sm:$0xf]  ;;  %v3172_v36 = vor.u32 %v3503_v28, %v3169_v29 }
  0xcb   :  { %2007 = vmatpush.bf16.msrb.mxu1 %v2756_v55  ;;  %1920 = vmatmul.bf16.vlgmr.msra.gmra.mxu0 %v3613_v48  ;;  %v2881_v33 = vld [vmem:[#allocation2 + $0x4f0] sm:$0xf0]  ;;  %v1655_v34 = vpop.f32.mrf.mxu2  ;;  %v1638_v49 = vpop.f32.mrf.mxu1 }
  0xcc   :  { %1958 = vmatmul.bf16.vlgmr.msra.gmra.mxu2 %v3617_v54  ;;  %1977 = vmatmul.bf16.vlgmr.msra.gmra.mxu3 %v3619_v57  ;;  %v3303_v37 = vld [vmem:[#allocation2 + $0xd4] sm:$0xf]  ;;  %v1656_v40 = vadd.f32 %v1655_v34, %v1637_v26  ;;  %v2884_v52 = vor.u32 %v3431_v32, %v2881_v33 }
  0xcd   :  { %2045 = vmatpush.bf16.msrb.mxu3 %v3268_v58  ;;  %2027 = vmatpush.bf16.msrb.mxu2 %v2980_v1  ;;  %v2369_v38 = vld [vmem:[#allocation2 + $0xf0] sm:$0xf0]  ;;  %v1674_v41 = vpop.f32.mrf.mxu3 }
  0xce   :  { %1989 = vmatpush.bf16.msrb.mxu0 %v2468_v2  ;;  %v1619_v42 = vpop.f32.mrf.mxu0  ;;  %v2625_v43 = vld [vmem:[#allocation2 + $0x2f0] sm:$0xf0]  ;;  %v1675_v55 = vadd.f32 %v1674_v41, %v1656_v40  ;;  %v2372_v59 = vor.u32 %v3303_v37, %v2369_v38  ;;  %v3015_v40 = vld [vmem:[#allocation2 + $0x5d8] sm:$0xf] }
  0xcf   :  { %2008 = vmatpush.bf16.msrb.mxu1 %v2724_v4  ;;  %v3495_v46 = vld [vmem:[#allocation2 + $0x6d4] sm:$0xf]  ;;  %v1620_v58 = vadd.f32 %v1619_v42, %v3691_v3  ;;  %v2628_v62 = vor.u32 %v3367_v39, %v2625_v43  ;;  %v3468_v41 = vld [vmem:[#allocation2 + $0x5f4] sm:$0xf0] }
  0xd0   :  { %v3137_v47 = vld [vmem:[#allocation2 + $0x6f0] sm:$0xf0]  ;;  %2216 = vst [vmem:[%s3852_s3] sm:$0xff] %v1675_v55  ;;  %v2503_v42 = vld [vmem:[#allocation2 + $0x1d8] sm:$0xf] }
  0xd1   :  { %2046 = vmatpush.bf16.msrb.mxu3 %v3236_v5  ;;  %2028 = vmatpush.bf16.msrb.mxu2 %v2948_v17  ;;  %v3423_v60 = vld [vmem:[#allocation2 + $0x494] sm:$0xf]  ;;  %v3140_v63 = vor.u32 %v3495_v46, %v3137_v47  ;;  %v1639_v7 = vadd.f32 %v1638_v49, %v1620_v58  ;;  %v3340_v43 = vld [vmem:[#allocation2 + $0x1f4] sm:$0xf0] }
  0xd2   :  { %1990 = vmatpush.bf16.msrb.mxu0 %v2436_v18  ;;  %v2849_v61 = vld [vmem:[#allocation2 + $0x4b0] sm:$0xf0]  ;;  %v2759_v46 = vld [vmem:[#allocation2 + $0x3d8] sm:$0xf] }
  0xd3   :  { %2009 = vmatpush.bf16.msrb.mxu1 %v2692_v21  ;;  %v3295_v0 = vld [vmem:[#allocation2 + $0x94] sm:$0xf]  ;;  %v2852_v8 = vor.u32 %v3423_v60, %v2849_v61  ;;  %v1657_v12 = vpop.f32.mrf.mxu2  ;;  %v1641_v25 = vpop.f32.mrf.mxu1  ;;  %v3271_v55 = vld [vmem:[#allocation2 + $0x7d8] sm:$0xf] }
  0xd4   :  { %v2337_v1 = vld [vmem:[#allocation2 + $0xb0] sm:$0xf0]  ;;  %v1658_v18 = vadd.f32 %v1657_v12, %v1639_v7  ;;  %v3532_v58 = vld [vmem:[#allocation2 + $0x7f4] sm:$0xf0] }
  0xd5   :  { %2047 = vmatpush.bf16.msrb.mxu3 %v3204_v22  ;;  %2029 = vmatpush.bf16.msrb.mxu2 %v2916_v30  ;;  %v3359_v2 = vld [vmem:[#allocation2 + $0x294] sm:$0xf]  ;;  %v2340_v9 = vor.u32 %v3295_v0, %v2337_v1  ;;  %v1676_v19 = vpop.f32.mrf.mxu3  ;;  %v3016_v1 = vor.u32 %v3468_v41, %v3015_v40  ;;  %v3444_v40 = vld [vmem:[#allocation2 + $0x534] sm:$0xf0] }
  0xd6   :  { %1991 = vmatpush.bf16.msrb.mxu0 %v2404_v31  ;;  %v2593_v4 = vld [vmem:[#allocation2 + $0x2b0] sm:$0xf0]  ;;  %v1622_v20 = vpop.f32.mrf.mxu0  ;;  %v1677_v28 = vadd.f32 %v1676_v19, %v1658_v18  ;;  %v2407_v41 = vld [vmem:[#allocation2 + $0x118] sm:$0xf] }
  0xd7   :  { %2010 = vmatpush.bf16.msrb.mxu1 %v2660_v35  ;;  %v3487_v5 = vld [vmem:[#allocation2 + $0x694] sm:$0xf]  ;;  %v2596_v13 = vor.u32 %v3359_v2, %v2593_v4  ;;  %v1623_v24 = vadd.f32 %v1622_v20, %v3691_v3  ;;  %v2504_v2 = vor.u32 %v3340_v43, %v2503_v42  ;;  %v2983_v4 = vld [vmem:[#allocation2 + $0x598] sm:$0xf] }
  0xd8   :  { %v3105_v6 = vld [vmem:[#allocation2 + $0x6b0] sm:$0xf0]  ;;  %2224 = vst [vmem:[%s3852_s3 + $0x40] sm:$0xff] %v1677_v28 }
  0xd9   :  { %2048 = vmatpush.bf16.msrb.mxu3 %v3172_v36  ;;  %2030 = vmatpush.bf16.msrb.mxu2 %v2884_v52  ;;  %v3415_v10 = vld [vmem:[#allocation2 + $0x454] sm:$0xf]  ;;  %v3108_v14 = vor.u32 %v3487_v5, %v3105_v6  ;;  %v1642_v39 = vadd.f32 %v1641_v25, %v1623_v24  ;;  %v3404_v52 = vld [vmem:[#allocation2 + $0x3f4] sm:$0xf0] }
  0xda   :  { %1992 = vmatpush.bf16.msrb.mxu0 %v2372_v59  ;;  %v2817_v11 = vld [vmem:[#allocation2 + $0x470] sm:$0xf0]  ;;  %1944 = vmatmul.bf16.gmra.mxu1 %v3651_v50  ;;  %v3460_v5 = vld [vmem:[#allocation2 + $0x5b4] sm:$0xf0]  ;;  %v2760_v7 = vor.u32 %v3404_v52, %v2759_v46 }
  0xdb   :  { %2011 = vmatpush.bf16.msrb.mxu1 %v2628_v62  ;;  %v3287_v15 = vld [vmem:[#allocation2 + $0x54] sm:$0xf]  ;;  %v2820_v29 = vor.u32 %v3415_v10, %v2817_v11  ;;  %1925 = vmatmul.bf16.gmra.mxu0 %v3649_v44  ;;  %v1660_v59 = vpop.f32.mrf.mxu2  ;;  %v1643_v6 = vpop.f32.mrf.mxu1  ;;  %v3332_v10 = vld [vmem:[#allocation2 + $0x1b4] sm:$0xf0] }
  0xdc   :  { %v2305_v16 = vld [vmem:[#allocation2 + $0x70] sm:$0xf0]  ;;  %1963 = vmatmul.bf16.gmra.mxu2 %v3653_v51  ;;  %1982 = vmatmul.bf16.gmra.mxu3 %v3655_v56  ;;  %v1661_v62 = vadd.f32 %v1660_v59, %v1642_v39  ;;  %v2727_v11 = vld [vmem:[#allocation2 + $0x398] sm:$0xf] }
  0xdd   :  { %2049 = vmatpush.bf16.msrb.mxu3 %v3140_v63  ;;  %v3351_v17 = vld [vmem:[#allocation2 + $0x254] sm:$0xf]  ;;  %2031 = vmatpush.bf16.msrb.mxu2 %v2852_v8  ;;  %v2308_v30 = vor.u32 %v3287_v15, %v2305_v16  ;;  %v1679_v63 = vpop.f32.mrf.mxu3  ;;  %v3272_v8 = vor.u32 %v3532_v58, %v3271_v55  ;;  %v3239_v15 = vld [vmem:[#allocation2 + $0x798] sm:$0xf] }
  0xde   :  { %v2561_v21 = vld [vmem:[#allocation2 + $0x270] sm:$0xf0]  ;;  %1993 = vmatpush.bf16.msrb.mxu0 %v2340_v9  ;;  %v1624_v0 = vpop.f32.mrf.mxu0  ;;  %v2471_v9 = vld [vmem:[#allocation2 + $0x198] sm:$0xf]  ;;  %v1680_v12 = vadd.f32 %v1679_v63, %v1661_v62 }
  0xdf   :  { %v3479_v22 = vld [vmem:[#allocation2 + $0x654] sm:$0xf]  ;;  %2012 = vmatpush.bf16.msrb.mxu1 %v2596_v13  ;;  %v2564_v34 = vor.u32 %v3351_v17, %v2561_v21  ;;  %v1625_v13 = vadd.f32 %v1624_v0, %v3691_v3  ;;  %v3524_v16 = vld [vmem:[#allocation2 + $0x7b4] sm:$0xf0]  ;;  %v2984_v17 = vor.u32 %v3460_v5, %v2983_v4  ;;  %v2472_v18 = vor.u32 %v3332_v10, %v2471_v9 }
  0xe0   :  { %v3073_v23 = vld [vmem:[#allocation2 + $0x670] sm:$0xf0]  ;;  %2232 = vst [vmem:[%s3852_s3 + $0x80] sm:$0xff] %v1680_v12  ;;  %v3240_v20 = vor.u32 %v3524_v16, %v3239_v15  ;;  %v3715_v21 = vperm.slane %v3688_v45, 1  ;;  %v2439_v25 = vld [vmem:[#allocation2 + $0x158] sm:$0xf] }
  0xe1   :  { %v3407_v26 = vld [vmem:[#allocation2 + $0x414] sm:$0xf]  ;;  %2050 = vmatpush.bf16.msrb.mxu3 %v3108_v14  ;;  %v3076_v35 = vor.u32 %v3479_v22, %v3073_v23  ;;  %2032 = vmatpush.bf16.msrb.mxu2 %v2820_v29  ;;  %v3396_v14 = vld [vmem:[#allocation2 + $0x3b4] sm:$0xf0]  ;;  %v1644_v3 = vadd.f32 %v1643_v6, %v1625_v13 }
  0xe2   :  { %v2785_v27 = vld [vmem:[#allocation2 + $0x430] sm:$0xf0]  ;;  %1994 = vmatpush.bf16.msrb.mxu0 %v2308_v30  ;;  %v2728_v19 = vor.u32 %v3396_v14, %v2727_v11  ;;  %v2951_v22 = vld [vmem:[#allocation2 + $0x558] sm:$0xf] }
  0xe3   :  { %v3279_v31 = vld [vmem:[#allocation2 + $0x14] sm:$0xf]  ;;  %v2788_v47 = vor.u32 %v3407_v26, %v2785_v27  ;;  %2013 = vmatpush.bf16.msrb.mxu1 %v2564_v34  ;;  %v3452_v23 = vld [vmem:[#allocation2 + $0x574] sm:$0xf0]  ;;  %v1662_v24 = vpop.f32.mrf.mxu2  ;;  %v1712_v34 = vpop.f32.mrf.mxu1 }
  0xe4   :  { %v2273_v32 = vld [vmem:[#allocation2 + $0x30] sm:$0xf0]  ;;  %v3324_v26 = vld [vmem:[#allocation2 + $0x174] sm:$0xf0]  ;;  %v1663_v28 = vadd.f32 %v1662_v24, %v1644_v3 }
  0xe5   :  { %v3343_v33 = vld [vmem:[#allocation2 + $0x214] sm:$0xf]  ;;  %v2276_v49 = vor.u32 %v3279_v31, %v2273_v32  ;;  %2051 = vmatpush.bf16.msrb.mxu3 %v3076_v35  ;;  %2033 = vmatpush.bf16.msrb.mxu2 %v2788_v47  ;;  %v2695_v27 = vld [vmem:[#allocation2 + $0x358] sm:$0xf]  ;;  %v1681_v29 = vpop.f32.mrf.mxu3 }
  0xe6   :  { %v2529_v36 = vld [vmem:[#allocation2 + $0x230] sm:$0xf0]  ;;  %v3388_v30 = vld [vmem:[#allocation2 + $0x374] sm:$0xf0]  ;;  %v1682_v35 = vadd.f32 %v1681_v29, %v1663_v28 }
  0xe7   :  { %v3471_v37 = vld [vmem:[#allocation2 + $0x614] sm:$0xf]  ;;  %v2532_v60 = vor.u32 %v3343_v33, %v2529_v36  ;;  %1995 = vmatpush.bf16.msrb.mxu0 %v2276_v49  ;;  %v3207_v31 = vld [vmem:[#allocation2 + $0x758] sm:$0xf]  ;;  %v1693_v33 = vpop.f32.mrf.mxu0  ;;  %v2696_v42 = vor.u32 %v3388_v30, %v2695_v27 }
  0xe8   :  { %v3041_v38 = vld [vmem:[#allocation2 + $0x630] sm:$0xf0]  ;;  %v3516_v32 = vld [vmem:[#allocation2 + $0x774] sm:$0xf0]  ;;  %v1694_v36 = vadd.f32 %v1693_v33, %v3715_v21  ;;  %2240 = vst [vmem:[%s3852_s3 + $0xc0] sm:$0xff] %v1682_v35 }
  0xe9   :  { %v3044_v61 = vor.u32 %v3471_v37, %v3041_v38  ;;  %2014 = vmatpush.bf16.msrb.mxu1 %v2532_v60  ;;  %2102 = vmatpush.bf16.msra.mxu2 %v3016_v1  ;;  %v2952_v37 = vor.u32 %v3452_v23, %v2951_v22  ;;  %v2440_v38 = vor.u32 %v3324_v26, %v2439_v25  ;;  %v2919_v39 = vld [vmem:[#allocation2 + $0x518] sm:$0xf] }
  0xea   :  { %v3208_v43 = vor.u32 %v3516_v32, %v3207_v31  ;;  %v3316_v46 = vld [vmem:[#allocation2 + $0x134] sm:$0xf0]  ;;  %v1713_v58 = vadd.f32 %v1712_v34, %v1694_v36  ;;  %v2920_v59 = vor.u32 %v3444_v40, %v2919_v39 }
  0xeb   :  { %2052 = vmatpush.bf16.msrb.mxu3 %v3044_v61  ;;  %2064 = vmatpush.bf16.msra.mxu0 %v2504_v2  ;;  %v2663_v47 = vld [vmem:[#allocation2 + $0x318] sm:$0xf]  ;;  %v2408_v60 = vor.u32 %v3316_v46, %v2407_v41  ;;  %v1731_v6 = vpop.f32.mrf.mxu2  ;;  %v1714_v12 = vpop.f32.mrf.mxu1 }
  0xec   :  { %v3380_v49 = vld [vmem:[#allocation2 + $0x334] sm:$0xf0]  ;;  %1996 = vmatmul.bf16.vlgmr.msrb.gmra.mxu0 %v3613_v48  ;;  %2015 = vmatmul.bf16.vlgmr.msrb.gmra.mxu1 %v3615_v53  ;;  %v1732_v10 = vadd.f32 %v1731_v6, %v1713_v58  ;;  %v3017_v6 = vld [vmem:[#allocation2 + $0x5f8] sm:$0xf0] }
  0xed   :  { %2083 = vmatpush.bf16.msra.mxu1 %v2760_v7  ;;  %2103 = vmatpush.bf16.msra.mxu2 %v2984_v17  ;;  %v3175_v52 = vld [vmem:[#allocation2 + $0x718] sm:$0xf]  ;;  %v2664_v0 = vor.u32 %v3380_v49, %v2663_v47  ;;  %v1750_v7 = vpop.f32.mrf.mxu3 }
  0xee   :  { %v3508_v55 = vld [vmem:[#allocation2 + $0x734] sm:$0xf0]  ;;  %2034 = vmatmul.bf16.vlgmr.msrb.gmra.mxu2 %v3617_v54  ;;  %2053 = vmatmul.bf16.vlgmr.msrb.gmra.mxu3 %v3619_v57 }
  0xef   :  { %2121 = vmatpush.bf16.msra.mxu3 %v3272_v8  ;;  %2065 = vmatpush.bf16.msra.mxu0 %v2472_v18  ;;  %v2887_v61 = vld [vmem:[#allocation2 + $0x4d8] sm:$0xf]  ;;  %v3176_v1 = vor.u32 %v3508_v55, %v3175_v52  ;;  %v1695_v11 = vpop.f32.mrf.mxu0  ;;  %v1751_v18 = vadd.f32 %v1750_v7, %v1732_v10  ;;  %v3336_v7 = vld [vmem:[#allocation2 + $0x1dc] sm:$0xf] }
  0xf0   :  { %v3436_v62 = vld [vmem:[#allocation2 + $0x4f4] sm:$0xf0]  ;;  %v3400_v10 = vld [vmem:[#allocation2 + $0x3dc] sm:$0xf] }
  0xf1   :  { %2084 = vmatpush.bf16.msra.mxu1 %v2728_v19  ;;  %2104 = vmatpush.bf16.msra.mxu2 %v2952_v37  ;;  %v2375_v63 = vld [vmem:[#allocation2 + $0xd8] sm:$0xf]  ;;  %v2888_v13 = vor.u32 %v3436_v62, %v2887_v61  ;;  %v1696_v19 = vadd.f32 %v1695_v11, %v3715_v21  ;;  %2217 = vst [vmem:[%s3852_s3 + $0x8] sm:$0xff] %v1751_v18 }
  0xf2   :  { %v3308_v2 = vld [vmem:[#allocation2 + $0xf4] sm:$0xf0] }
  0xf3   :  { %2122 = vmatpush.bf16.msra.mxu3 %v3240_v20  ;;  %2066 = vmatpush.bf16.msra.mxu0 %v2440_v38  ;;  %v2631_v4 = vld [vmem:[#allocation2 + $0x2d8] sm:$0xf]  ;;  %v2376_v14 = vor.u32 %v3308_v2, %v2375_v63  ;;  %v1715_v31 = vadd.f32 %v1714_v12, %v1696_v19  ;;  %v1733_v37 = vpop.f32.mrf.mxu2  ;;  %v1717_v46 = vpop.f32.mrf.mxu1 }
  0xf4   :  { %v3372_v5 = vld [vmem:[#allocation2 + $0x2f4] sm:$0xf0] }
  0xf5   :  { %2085 = vmatpush.bf16.msra.mxu1 %v2696_v42  ;;  %v3143_v8 = vld [vmem:[#allocation2 + $0x6d8] sm:$0xf]  ;;  %2105 = vmatpush.bf16.msra.mxu2 %v2920_v59  ;;  %v2632_v15 = vor.u32 %v3372_v5, %v2631_v4  ;;  %v1752_v38 = vpop.f32.mrf.mxu3  ;;  %v1734_v42 = vadd.f32 %v1733_v37, %v1715_v31  ;;  %v3464_v5 = vld [vmem:[#allocation2 + $0x5dc] sm:$0xf] }
  0xf6   :  { %v3500_v9 = vld [vmem:[#allocation2 + $0x6f4] sm:$0xf0]  ;;  %v3392_v31 = vld [vmem:[#allocation2 + $0x39c] sm:$0xf] }
  0xf7   :  { %2123 = vmatpush.bf16.msra.mxu3 %v3208_v43  ;;  %2067 = vmatpush.bf16.msra.mxu0 %v2408_v60  ;;  %v2855_v16 = vld [vmem:[#allocation2 + $0x498] sm:$0xf]  ;;  %v3144_v20 = vor.u32 %v3500_v9, %v3143_v8  ;;  %v1698_v43 = vpop.f32.mrf.mxu0  ;;  %v1753_v62 = vadd.f32 %v1752_v38, %v1734_v42  ;;  %v2505_v9 = vld [vmem:[#allocation2 + $0x1f8] sm:$0xf0] }
  0xf8   :  { %v3428_v17 = vld [vmem:[#allocation2 + $0x4b4] sm:$0xf0]  ;;  %v1699_v52 = vadd.f32 %v1698_v43, %v3715_v21  ;;  %v3448_v42 = vld [vmem:[#allocation2 + $0x55c] sm:$0xf] }
  0xf9   :  { %2086 = vmatpush.bf16.msra.mxu1 %v2664_v0  ;;  %v2343_v3 = vld [vmem:[#allocation2 + $0x98] sm:$0xf]  ;;  %2106 = vmatpush.bf16.msra.mxu2 %v2888_v13  ;;  %v2856_v27 = vor.u32 %v3428_v17, %v2855_v16  ;;  %2225 = vst [vmem:[%s3852_s3 + $0x48] sm:$0xff] %v1753_v62  ;;  %v2761_v13 = vld [vmem:[#allocation2 + $0x3f8] sm:$0xf0] }
  0xfa   :  { %v3300_v22 = vld [vmem:[#allocation2 + $0xb4] sm:$0xf0]  ;;  %v1718_v8 = vadd.f32 %v1717_v46, %v1699_v52  ;;  %v2953_v43 = vld [vmem:[#allocation2 + $0x578] sm:$0xf0] }
  0xfb   :  { %2124 = vmatpush.bf16.msra.mxu3 %v3176_v1  ;;  %v2599_v23 = vld [vmem:[#allocation2 + $0x298] sm:$0xf]  ;;  %2068 = vmatpush.bf16.msra.mxu0 %v2376_v14  ;;  %v2344_v28 = vor.u32 %v3300_v22, %v2343_v3  ;;  %v3528_v14 = vld [vmem:[#allocation2 + $0x7dc] sm:$0xf]  ;;  %v1736_v18 = vpop.f32.mrf.mxu2  ;;  %v2508_v3 = vor.u32 %v3336_v7, %v2505_v9 }
  0xfc   :  { %v3364_v24 = vld [vmem:[#allocation2 + $0x2b4] sm:$0xf0]  ;;  %2001 = vmatmul.bf16.gmra.mxu0 %v3649_v44  ;;  %2020 = vmatmul.bf16.gmra.mxu1 %v3651_v50  ;;  %v3456_v22 = vld [vmem:[#allocation2 + $0x59c] sm:$0xf] }
  0xfd   :  { %v3111_v25 = vld [vmem:[#allocation2 + $0x698] sm:$0xf]  ;;  %2087 = vmatpush.bf16.msra.mxu1 %v2632_v15  ;;  %v2600_v32 = vor.u32 %v3364_v24, %v2599_v23  ;;  %2107 = vmatpush.bf16.msra.mxu2 %v2856_v27  ;;  %v3273_v15 = vld [vmem:[#allocation2 + $0x7f8] sm:$0xf0]  ;;  %v1755_v19 = vpop.f32.mrf.mxu3  ;;  %v1737_v24 = vadd.f32 %v1736_v18, %v1718_v8  ;;  %v2764_v27 = vor.u32 %v3400_v10, %v2761_v13 }
  0xfe   :  { %v3492_v26 = vld [vmem:[#allocation2 + $0x6b4] sm:$0xf0]  ;;  %2039 = vmatmul.bf16.gmra.mxu2 %v3653_v51  ;;  %2058 = vmatmul.bf16.gmra.mxu3 %v3655_v56  ;;  %v2985_v23 = vld [vmem:[#allocation2 + $0x5b8] sm:$0xf0] }
  0xff   :  { %v2823_v29 = vld [vmem:[#allocation2 + $0x458] sm:$0xf]  ;;  %2125 = vmatpush.bf16.msra.mxu3 %v3144_v20  ;;  %v3112_v33 = vor.u32 %v3492_v26, %v3111_v25  ;;  %2069 = vmatpush.bf16.msra.mxu0 %v2344_v28  ;;  %v3020_v20 = vor.u32 %v3464_v5, %v3017_v6  ;;  %v1700_v25 = vpop.f32.mrf.mxu0  ;;  %v1719_v26 = vpop.f32.mrf.mxu1  ;;  %v3276_v28 = vor.u32 %v3528_v14, %v3273_v15  ;;  %v3320_v46 = vld [vmem:[#allocation2 + $0x15c] sm:$0xf] }
 0x100   :  { %v3420_v30 = vld [vmem:[#allocation2 + $0x474] sm:$0xf0]  ;;  %v2988_v37 = vor.u32 %v3456_v22, %v2985_v23  ;;  %v2921_v5 = vld [vmem:[#allocation2 + $0x538] sm:$0xf0] }
 0x101   :  { %v2311_v34 = vld [vmem:[#allocation2 + $0x58] sm:$0xf]  ;;  %v2824_v55 = vor.u32 %v3420_v30, %v2823_v29  ;;  %2088 = vmatpush.bf16.msra.mxu1 %v2600_v32  ;;  %v3328_v29 = vld [vmem:[#allocation2 + $0x19c] sm:$0xf] }
 0x102   :  { %v3292_v35 = vld [vmem:[#allocation2 + $0x74] sm:$0xf0]  ;;  %v2473_v30 = vld [vmem:[#allocation2 + $0x1b8] sm:$0xf0] }
 0x103   :  { %v2567_v36 = vld [vmem:[#allocation2 + $0x258] sm:$0xf]  ;;  %v2312_v58 = vor.u32 %v3292_v35, %v2311_v34  ;;  %2126 = vmatpush.bf16.msra.mxu3 %v3112_v33  ;;  %2108 = vmatpush.bf16.msra.mxu2 %v2824_v55  ;;  %v2729_v32 = vld [vmem:[#allocation2 + $0x3b8] sm:$0xf0]  ;;  %v1756_v35 = vadd.f32 %v1755_v19, %v1737_v24  ;;  %v2476_v38 = vor.u32 %v3328_v29, %v2473_v30  ;;  %v1738_v52 = vpop.f32.mrf.mxu2 }
 0x104   :  { %v3356_v39 = vld [vmem:[#allocation2 + $0x274] sm:$0xf0]  ;;  %v3520_v33 = vld [vmem:[#allocation2 + $0x79c] sm:$0xf] }
 0x105   :  { %v3079_v40 = vld [vmem:[#allocation2 + $0x658] sm:$0xf]  ;;  %v2568_v63 = vor.u32 %v3356_v39, %v2567_v36  ;;  %2070 = vmatpush.bf16.msra.mxu0 %v2312_v58  ;;  %v3241_v34 = vld [vmem:[#allocation2 + $0x7b8] sm:$0xf0]  ;;  %v1701_v36 = vadd.f32 %v1700_v25, %v3715_v21  ;;  %2233 = vst [vmem:[%s3852_s3 + $0x88] sm:$0xff] %v1756_v35  ;;  %v2732_v39 = vor.u32 %v3392_v31, %v2729_v32  ;;  %v1757_v55 = vpop.f32.mrf.mxu3 }
 0x106   :  { %v3484_v41 = vld [vmem:[#allocation2 + $0x674] sm:$0xf0]  ;;  %v2697_v58 = vld [vmem:[#allocation2 + $0x378] sm:$0xf0] }
 0x107   :  { %v2791_v47 = vld [vmem:[#allocation2 + $0x418] sm:$0xf]  ;;  %v3080_v0 = vor.u32 %v3484_v41, %v3079_v40  ;;  %2089 = vmatpush.bf16.msra.mxu1 %v2568_v63  ;;  %v3244_v40 = vor.u32 %v3520_v33, %v3241_v34  ;;  %v3742_v41 = vperm.slane %v3688_v45, 2  ;;  %v1720_v21 = vadd.f32 %v1719_v26, %v1701_v36  ;;  %v1769_v62 = vpop.f32.mrf.mxu0  ;;  %v1788_v63 = vpop.f32.mrf.mxu1  ;;  %v3312_v9 = vld [vmem:[#allocation2 + $0x11c] sm:$0xf] }
 0x108   :  { %v3412_v49 = vld [vmem:[#allocation2 + $0x434] sm:$0xf0]  ;;  %v2409_v10 = vld [vmem:[#allocation2 + $0x138] sm:$0xf0] }
 0x109   :  { %v2279_v59 = vld [vmem:[#allocation2 + $0x18] sm:$0xf]  ;;  %v2792_v11 = vor.u32 %v3412_v49, %v2791_v47  ;;  %2127 = vmatpush.bf16.msra.mxu3 %v3080_v0  ;;  %v2441_v47 = vld [vmem:[#allocation2 + $0x178] sm:$0xf0]  ;;  %v1770_v0 = vadd.f32 %v1769_v62, %v3742_v41 }
 0x10a   :  { %v3284_v60 = vld [vmem:[#allocation2 + $0x34] sm:$0xf0]  ;;  %v3384_v49 = vld [vmem:[#allocation2 + $0x35c] sm:$0xf] }
 0x10b   :  { %v2535_v61 = vld [vmem:[#allocation2 + $0x218] sm:$0xf]  ;;  %v2280_v12 = vor.u32 %v3284_v60, %v2279_v59  ;;  %2109 = vmatpush.bf16.msra.mxu2 %v2792_v11  ;;  %v3512_v59 = vld [vmem:[#allocation2 + $0x75c] sm:$0xf]  ;;  %v2700_v7 = vor.u32 %v3384_v49, %v2697_v58  ;;  %v1789_v15 = vadd.f32 %v1788_v63, %v1770_v0 }
 0x10c   :  { %v3348_v1 = vld [vmem:[#allocation2 + $0x234] sm:$0xf0]  ;;  %v3209_v60 = vld [vmem:[#allocation2 + $0x778] sm:$0xf0] }
 0x10d   :  { %v3047_v2 = vld [vmem:[#allocation2 + $0x618] sm:$0xf]  ;;  %v2536_v16 = vor.u32 %v3348_v1, %v2535_v61  ;;  %2071 = vmatpush.bf16.msra.mxu0 %v2280_v12  ;;  %v1739_v61 = vadd.f32 %v1738_v52, %v1720_v21  ;;  %v2956_v1 = vor.u32 %v3448_v42, %v2953_v43  ;;  %v3212_v8 = vor.u32 %v3512_v59, %v3209_v60  ;;  %v3376_v11 = vld [vmem:[#allocation2 + $0x31c] sm:$0xf]  ;;  %v1807_v26 = vpop.f32.mrf.mxu2 }
 0x10e   :  { %v3476_v4 = vld [vmem:[#allocation2 + $0x634] sm:$0xf0]  ;;  %v2665_v12 = vld [vmem:[#allocation2 + $0x338] sm:$0xf0]  ;;  %2110 = vmatmul.bf16.vlgmr.msra.gmra.mxu2 %v3617_v54  ;;  %v1808_v30 = vadd.f32 %v1807_v26, %v1789_v15 }
 0x10f   :  { %v3048_v17 = vor.u32 %v3476_v4, %v3047_v2  ;;  %2090 = vmatpush.bf16.msra.mxu1 %v2536_v16  ;;  %2178 = vmatpush.bf16.msrb.mxu2 %v3020_v20  ;;  %v2444_v2 = vor.u32 %v3320_v46, %v2441_v47  ;;  %v3440_v4 = vld [vmem:[#allocation2 + $0x51c] sm:$0xf]  ;;  %v1758_v6 = vadd.f32 %v1757_v55, %v1739_v61  ;;  %v1771_v31 = vpop.f32.mrf.mxu0  ;;  %v1790_v32 = vpop.f32.mrf.mxu1 }
 0x110   :  { %2072 = vmatmul.bf16.vlgmr.msra.gmra.mxu0 %v3613_v48  ;;  %v3504_v13 = vld [vmem:[#allocation2 + $0x71c] sm:$0xf]  ;;  %v2924_v16 = vor.u32 %v3440_v4, %v2921_v5 }
 0x111   :  { %2128 = vmatpush.bf16.msra.mxu3 %v3048_v17  ;;  %2140 = vmatpush.bf16.msrb.mxu0 %v2508_v3  ;;  %v3177_v14 = vld [vmem:[#allocation2 + $0x738] sm:$0xf0]  ;;  %2241 = vst [vmem:[%s3852_s3 + $0xc8] sm:$0xff] %v1758_v6  ;;  %v2412_v17 = vor.u32 %v3312_v9, %v2409_v10  ;;  %v2668_v3 = vor.u32 %v3376_v11, %v2665_v12 }
 0x112   :  { %2091 = vmatmul.bf16.vlgmr.msra.gmra.mxu1 %v3615_v53  ;;  %v3432_v18 = vld [vmem:[#allocation2 + $0x4dc] sm:$0xf]  ;;  %v3180_v22 = vor.u32 %v3504_v13, %v3177_v14 }
 0x113   :  { %2159 = vmatpush.bf16.msrb.mxu1 %v2764_v27  ;;  %2179 = vmatpush.bf16.msrb.mxu2 %v2988_v37  ;;  %v2889_v19 = vld [vmem:[#allocation2 + $0x4f8] sm:$0xf0]  ;;  %v1826_v27 = vpop.f32.mrf.mxu3 }
 0x114   :  { %2129 = vmatmul.bf16.vlgmr.msra.gmra.mxu3 %v3619_v57  ;;  %v3304_v20 = vld [vmem:[#allocation2 + $0xdc] sm:$0xf]  ;;  %v2892_v33 = vor.u32 %v3432_v18, %v2889_v19 }
 0x115   :  { %2197 = vmatpush.bf16.msrb.mxu3 %v3276_v28  ;;  %2141 = vmatpush.bf16.msrb.mxu0 %v2476_v38  ;;  %v2377_v23 = vld [vmem:[#allocation2 + $0xf8] sm:$0xf0]  ;;  %v1827_v38 = vadd.f32 %v1826_v27, %v1808_v30 }
 0x116   :  { %v3368_v24 = vld [vmem:[#allocation2 + $0x2dc] sm:$0xf]  ;;  %v2380_v34 = vor.u32 %v3304_v20, %v2377_v23 }
 0x117   :  { %2160 = vmatpush.bf16.msrb.mxu1 %v2732_v39  ;;  %2180 = vmatpush.bf16.msrb.mxu2 %v2956_v1  ;;  %v2633_v25 = vld [vmem:[#allocation2 + $0x2f8] sm:$0xf0]  ;;  %v1772_v39 = vadd.f32 %v1771_v31, %v3742_v41  ;;  %2218 = vst [vmem:[%s3852_s3 + $0x10] sm:$0xff] %v1827_v38  ;;  %v1774_v9 = vpop.f32.mrf.mxu0  ;;  %v1793_v10 = vpop.f32.mrf.mxu1 }
 0x118   :  { %v3496_v28 = vld [vmem:[#allocation2 + $0x6dc] sm:$0xf]  ;;  %v2636_v35 = vor.u32 %v3368_v24, %v2633_v25  ;;  %v1775_v11 = vadd.f32 %v1774_v9, %v3742_v41 }
 0x119   :  { %2198 = vmatpush.bf16.msrb.mxu3 %v3244_v40  ;;  %2142 = vmatpush.bf16.msrb.mxu0 %v2444_v2  ;;  %v3145_v29 = vld [vmem:[#allocation2 + $0x6f8] sm:$0xf0]  ;;  %v1791_v60 = vadd.f32 %v1790_v32, %v1772_v39  ;;  %v1809_v2 = vpop.f32.mrf.mxu2 }
 0x11a   :  { %v3424_v36 = vld [vmem:[#allocation2 + $0x49c] sm:$0xf]  ;;  %v3148_v40 = vor.u32 %v3496_v28, %v3145_v29  ;;  %v1794_v25 = vadd.f32 %v1793_v10, %v1775_v11 }
 0x11b   :  { %2161 = vmatpush.bf16.msrb.mxu1 %v2700_v7  ;;  %2181 = vmatpush.bf16.msrb.mxu2 %v2924_v16  ;;  %v2857_v37 = vld [vmem:[#allocation2 + $0x4b8] sm:$0xf0]  ;;  %v1828_v4 = vpop.f32.mrf.mxu3 }
 0x11c   :  { %v3296_v42 = vld [vmem:[#allocation2 + $0x9c] sm:$0xf]  ;;  %v2860_v52 = vor.u32 %v3424_v36, %v2857_v37  ;;  %v315_v37 = vperm.slane %v3688_v45, 3 }
 0x11d   :  { %2199 = vmatpush.bf16.msrb.mxu3 %v3212_v8  ;;  %2143 = vmatpush.bf16.msrb.mxu0 %v2412_v17  ;;  %v2345_v43 = vld [vmem:[#allocation2 + $0xb8] sm:$0xf0]  ;;  %v1810_v8 = vadd.f32 %v1809_v2, %v1791_v60 }
 0x11e   :  { %v3360_v21 = vld [vmem:[#allocation2 + $0x29c] sm:$0xf]  ;;  %v2348_v55 = vor.u32 %v3296_v42, %v2345_v43  ;;  %2115 = vmatmul.bf16.gmra.mxu2 %v3653_v51 }
 0x11f   :  { %2162 = vmatpush.bf16.msrb.mxu1 %v2668_v3  ;;  %v2601_v46 = vld [vmem:[#allocation2 + $0x2b8] sm:$0xf0]  ;;  %2182 = vmatpush.bf16.msrb.mxu2 %v2892_v33  ;;  %v1829_v16 = vadd.f32 %v1828_v4, %v1810_v8  ;;  %v1776_v33 = vpop.f32.mrf.mxu0 }
 0x120   :  { %v3488_v47 = vld [vmem:[#allocation2 + $0x69c] sm:$0xf]  ;;  %v2604_v61 = vor.u32 %v3360_v21, %v2601_v46  ;;  %2077 = vmatmul.bf16.gmra.mxu0 %v3649_v44  ;;  %v1777_v36 = vadd.f32 %v1776_v33, %v3742_v41 }
 0x121   :  { %2200 = vmatpush.bf16.msrb.mxu3 %v3180_v22  ;;  %v3113_v49 = vld [vmem:[#allocation2 + $0x6b8] sm:$0xf0]  ;;  %2144 = vmatpush.bf16.msrb.mxu0 %v2380_v34  ;;  %2226 = vst [vmem:[%s3852_s3 + $0x50] sm:$0xff] %v1829_v16  ;;  %v1812_v30 = vpop.f32.mrf.mxu2  ;;  %v1795_v34 = vpop.f32.mrf.mxu1 }
 0x122   :  { %v3416_v58 = vld [vmem:[#allocation2 + $0x45c] sm:$0xf]  ;;  %v3116_v62 = vor.u32 %v3488_v47, %v3113_v49  ;;  %2096 = vmatmul.bf16.gmra.mxu1 %v3651_v50  ;;  %v1813_v32 = vadd.f32 %v1812_v30, %v1794_v25  ;;  %v1796_v38 = vadd.f32 %v1795_v34, %v1777_v36 }
 0x123   :  { %v2825_v59 = vld [vmem:[#allocation2 + $0x478] sm:$0xf0]  ;;  %2163 = vmatpush.bf16.msrb.mxu1 %v2636_v35  ;;  %2183 = vmatpush.bf16.msrb.mxu2 %v2860_v52  ;;  %v1831_v31 = vpop.f32.mrf.mxu3 }
 0x124   :  { %v3288_v63 = vld [vmem:[#allocation2 + $0x5c] sm:$0xf]  ;;  %v2828_v12 = vor.u32 %v3416_v58, %v2825_v59  ;;  %2134 = vmatmul.bf16.gmra.mxu3 %v3655_v56  ;;  %v1832_v35 = vadd.f32 %v1831_v31, %v1813_v32 }
 0x125   :  { %2201 = vmatpush.bf16.msrb.mxu3 %v3148_v40  ;;  %v2313_v0 = vld [vmem:[#allocation2 + $0x78] sm:$0xf0]  ;;  %2145 = vmatpush.bf16.msrb.mxu0 %v2348_v55 }
 0x126   :  { %v3352_v1 = vld [vmem:[#allocation2 + $0x25c] sm:$0xf]  ;;  %v2316_v13 = vor.u32 %v3288_v63, %v2313_v0  ;;  %2234 = vst [vmem:[%s3852_s3 + $0x90] sm:$0xff] %v1832_v35 }
 0x127   :  { %v2569_v5 = vld [vmem:[#allocation2 + $0x278] sm:$0xf0]  ;;  %2164 = vmatpush.bf16.msrb.mxu1 %v2604_v61  ;;  %2184 = vmatpush.bf16.msrb.mxu2 %v2828_v12  ;;  %v1845_v43 = vpop.f32.mrf.mxu0 }
 0x128   :  { %v3480_v6 = vld [vmem:[#allocation2 + $0x65c] sm:$0xf]  ;;  %v2572_v17 = vor.u32 %v3352_v1, %v2569_v5  ;;  %v1846_v46 = vadd.f32 %v1845_v43, %v315_v37 }
 0x129   :  { %v3081_v7 = vld [vmem:[#allocation2 + $0x678] sm:$0xf0]  ;;  %2202 = vmatpush.bf16.msrb.mxu3 %v3116_v62  ;;  %2146 = vmatpush.bf16.msrb.mxu0 %v2316_v13  ;;  %v1814_v39 = vpop.f32.mrf.mxu2  ;;  %v1864_v21 = vpop.f32.mrf.mxu1 }
 0x12a   :  { %v3408_v14 = vld [vmem:[#allocation2 + $0x41c] sm:$0xf]  ;;  %v3084_v18 = vor.u32 %v3480_v6, %v3081_v7  ;;  %v1815_v42 = vadd.f32 %v1814_v39, %v1796_v38  ;;  %v1865_v41 = vadd.f32 %v1864_v21, %v1846_v46 }
 0x12b   :  { %v2793_v15 = vld [vmem:[#allocation2 + $0x438] sm:$0xf0]  ;;  %2165 = vmatpush.bf16.msrb.mxu1 %v2572_v17  ;;  %v1833_v40 = vpop.f32.mrf.mxu3 }
 0x12c   :  { %v3280_v19 = vld [vmem:[#allocation2 + $0x1c] sm:$0xf]  ;;  %v2796_v26 = vor.u32 %v3408_v14, %v2793_v15  ;;  %v1834_v47 = vadd.f32 %v1833_v40, %v1815_v42 }
 0x12d   :  { %v2281_v20 = vld [vmem:[#allocation2 + $0x38] sm:$0xf0]  ;;  %2203 = vmatpush.bf16.msrb.mxu3 %v3084_v18 }
 0x12e   :  { %v3344_v3 = vld [vmem:[#allocation2 + $0x21c] sm:$0xf]  ;;  %v2284_v27 = vor.u32 %v3280_v19, %v2281_v20  ;;  %2185 = vmatpush.bf16.msrb.mxu2 %v2796_v26  ;;  %2242 = vst [vmem:[%s3852_s3 + $0xd0] sm:$0xff] %v1834_v47 }
 0x12f   :  { %v2537_v22 = vld [vmem:[#allocation2 + $0x238] sm:$0xf0]  ;;  %v1847_v55 = vpop.f32.mrf.mxu0 }
 0x130   :  { %v3472_v23 = vld [vmem:[#allocation2 + $0x61c] sm:$0xf]  ;;  %v2540_v28 = vor.u32 %v3344_v3, %v2537_v22  ;;  %2147 = vmatpush.bf16.msrb.mxu0 %v2284_v27  ;;  %v1848_v60 = vadd.f32 %v1847_v55, %v315_v37 }
 0x131   :  { %v3049_v24 = vld [vmem:[#allocation2 + $0x638] sm:$0xf0]  ;;  %2186 = vmatmul.bf16.vlgmr.msrb.gmra.mxu2 %v3617_v54  ;;  %v1883_v45 = vpop.f32.mrf.mxu2  ;;  %v1866_v58 = vpop.f32.mrf.mxu1 }
 0x132   :  { %v3052_v29 = vor.u32 %v3472_v23, %v3049_v24  ;;  %2166 = vmatpush.bf16.msrb.mxu1 %v2540_v28  ;;  %v1884_v52 = vadd.f32 %v1883_v45, %v1865_v41 }
 0x133   :  { %2148 = vmatmul.bf16.vlgmr.msrb.gmra.mxu0 %v3613_v48  ;;  %v1902_v49 = vpop.f32.mrf.mxu3  ;;  %v1867_v48 = vadd.f32 %v1866_v58, %v1848_v60 }
 0x134   :  { %2204 = vmatpush.bf16.msrb.mxu3 %v3052_v29  ;;  %v1903_v59 = vadd.f32 %v1902_v49, %v1884_v52 }
 0x135   :  { %2167 = vmatmul.bf16.vlgmr.msrb.gmra.mxu1 %v3615_v53 }
 0x136   :  { %2219 = vst [vmem:[%s3852_s3 + $0x18] sm:$0xff] %v1903_v59 }
 0x137   :  { %2205 = vmatmul.bf16.vlgmr.msrb.gmra.mxu3 %v3619_v57  ;;  %v1850_v63 = vpop.f32.mrf.mxu0 }
 0x138   :  { %v1851_v54 = vadd.f32 %v1850_v63, %v315_v37 }
 0x139   :  { %v1885_v53 = vpop.f32.mrf.mxu2  ;;  %v1869_v0 = vpop.f32.mrf.mxu1 }
 0x13a   :  { %v1886_v62 = vadd.f32 %v1885_v53, %v1867_v48  ;;  %v1870_v57 = vadd.f32 %v1869_v0, %v1851_v54 }
 0x13b   :  { %v1904_v61 = vpop.f32.mrf.mxu3 }
 0x13c   :  { %v1905_v1 = vadd.f32 %v1904_v61, %v1886_v62 }
 0x13e   :  { %2227 = vst [vmem:[%s3852_s3 + $0x58] sm:$0xff] %v1905_v1 }
 0x13f   :  { %v1852_v6 = vpop.f32.mrf.mxu0 }
 0x140   :  { %v1853_v9 = vadd.f32 %v1852_v6, %v315_v37 }
 0x141   :  { %2191 = vmatmul.bf16.gmra.mxu2 %v3653_v51  ;;  %v1888_v2 = vpop.f32.mrf.mxu2  ;;  %v1871_v7 = vpop.f32.mrf.mxu1 }
 0x142   :  { %v1889_v5 = vadd.f32 %v1888_v2, %v1870_v57  ;;  %v1872_v51 = vadd.f32 %v1871_v7, %v1853_v9 }
 0x143   :  { %2153 = vmatmul.bf16.gmra.mxu0 %v3649_v44  ;;  %v1907_v4 = vpop.f32.mrf.mxu3  ;;  %v3792_v44 = vld [vmem:[%s3851_s2] sm:$0xff] }
 0x144   :  { %v1908_v8 = vadd.f32 %v1907_v4, %v1889_v5  ;;  %v317_v40 = vperm.slane %v3792_v44, 5 }
 0x145   :  { %2172 = vmatmul.bf16.gmra.mxu1 %v3651_v50  ;;  %v316_v50 = vperm.slane %v3792_v44, 4 }
 0x146   :  { %2235 = vst [vmem:[%s3852_s3 + $0x98] sm:$0xff] %v1908_v8 }
 0x147   :  { %2210 = vmatmul.bf16.gmra.mxu3 %v3655_v56 }
 0x148   :  { %v1921_v12 = vpop.f32.mrf.mxu0 }
 0x149   :  { %v1890_v56 = vpop.f32.mrf.mxu2  ;;  %v1940_v13 = vpop.f32.mrf.mxu1  ;;  %v1922_v14 = vadd.f32 %v1921_v12, %v316_v50 }
 0x14a   :  { %v1891_v11 = vadd.f32 %v1890_v56, %v1872_v51 }
 0x14b   :  { %v1909_v10 = vpop.f32.mrf.mxu3  ;;  %v1941_v16 = vadd.f32 %v1940_v13, %v1922_v14 }
 0x14c   :  { %v1910_v15 = vadd.f32 %v1909_v10, %v1891_v11  ;;  %v318_v10 = vperm.slane %v3792_v44, 6 }
 0x14e   :  { %2243 = vst [vmem:[%s3852_s3 + $0xd8] sm:$0xff] %v1910_v15 }
 0x150   :  { %v1923_v20 = vpop.f32.mrf.mxu0 }
 0x151   :  { %v1959_v17 = vpop.f32.mrf.mxu2  ;;  %v1942_v3 = vpop.f32.mrf.mxu1  ;;  %v1924_v23 = vadd.f32 %v1923_v20, %v316_v50 }
 0x152   :  { %v1960_v19 = vadd.f32 %v1959_v17, %v1941_v16 }
 0x153   :  { %v1978_v18 = vpop.f32.mrf.mxu3  ;;  %v1943_v24 = vadd.f32 %v1942_v3, %v1924_v23 }
 0x154   :  { %v1979_v22 = vadd.f32 %v1978_v18, %v1960_v19 }
 0x156   :  { %2220 = vst [vmem:[%s3852_s3 + $0x20] sm:$0xff] %v1979_v22 }
 0x158   :  { %v1926_v28 = vpop.f32.mrf.mxu0 }
 0x159   :  { %v1961_v25 = vpop.f32.mrf.mxu2  ;;  %v1945_v29 = vpop.f32.mrf.mxu1  ;;  %v1927_v30 = vadd.f32 %v1926_v28, %v316_v50 }
 0x15a   :  { %v1962_v27 = vadd.f32 %v1961_v25, %v1943_v24 }
 0x15b   :  { %v1980_v26 = vpop.f32.mrf.mxu3  ;;  %v1946_v32 = vadd.f32 %v1945_v29, %v1927_v30 }
 0x15c   :  { %v1981_v31 = vadd.f32 %v1980_v26, %v1962_v27 }
 0x15e   :  { %2228 = vst [vmem:[%s3852_s3 + $0x60] sm:$0xff] %v1981_v31 }
 0x160   :  { %v1928_v36 = vpop.f32.mrf.mxu0 }
 0x161   :  { %v1964_v33 = vpop.f32.mrf.mxu2  ;;  %v1947_v37 = vpop.f32.mrf.mxu1  ;;  %v1929_v39 = vadd.f32 %v1928_v36, %v316_v50 }
 0x162   :  { %v1965_v35 = vadd.f32 %v1964_v33, %v1946_v32 }
 0x163   :  { %v1983_v34 = vpop.f32.mrf.mxu3  ;;  %v1948_v42 = vadd.f32 %v1947_v37, %v1929_v39 }
 0x164   :  { %v1984_v38 = vadd.f32 %v1983_v34, %v1965_v35 }
 0x166   :  { %2236 = vst [vmem:[%s3852_s3 + $0xa0] sm:$0xff] %v1984_v38 }
 0x169   :  { %v1966_v43 = vpop.f32.mrf.mxu2  ;;  %v1997_v47 = vpop.f32.mrf.mxu0 }
 0x16a   :  { %v1967_v46 = vadd.f32 %v1966_v43, %v1948_v42  ;;  %v2016_v41 = vpop.f32.mrf.mxu1  ;;  %v1998_v45 = vadd.f32 %v1997_v47, %v317_v40 }
 0x16b   :  { %v1985_v21 = vpop.f32.mrf.mxu3 }
 0x16c   :  { %v1986_v49 = vadd.f32 %v1985_v21, %v1967_v46  ;;  %v2017_v52 = vadd.f32 %v2016_v41, %v1998_v45  ;;  %v319_v21 = vperm.slane %v3792_v44, 7 }
 0x16e   :  { %2244 = vst [vmem:[%s3852_s3 + $0xe0] sm:$0xff] %v1986_v49 }
 0x171   :  { %v2035_v55 = vpop.f32.mrf.mxu2  ;;  %v1999_v60 = vpop.f32.mrf.mxu0 }
 0x172   :  { %v2036_v59 = vadd.f32 %v2035_v55, %v2017_v52  ;;  %v2018_v48 = vpop.f32.mrf.mxu1  ;;  %v2000_v61 = vadd.f32 %v1999_v60, %v317_v40 }
 0x173   :  { %v2054_v58 = vpop.f32.mrf.mxu3 }
 0x174   :  { %v2055_v53 = vadd.f32 %v2054_v58, %v2036_v59  ;;  %v2019_v62 = vadd.f32 %v2018_v48, %v2000_v61 }
 0x176   :  { %2221 = vst [vmem:[%s3852_s3 + $0x28] sm:$0xff] %v2055_v53 }
 0x179   :  { %v2037_v63 = vpop.f32.mrf.mxu2  ;;  %v2002_v1 = vpop.f32.mrf.mxu0 }
 0x17a   :  { %v2038_v54 = vadd.f32 %v2037_v63, %v2019_v62  ;;  %v2021_v57 = vpop.f32.mrf.mxu1  ;;  %v2003_v2 = vadd.f32 %v2002_v1, %v317_v40 }
 0x17b   :  { %v2056_v0 = vpop.f32.mrf.mxu3 }
 0x17c   :  { %v2057_v4 = vadd.f32 %v2056_v0, %v2038_v54  ;;  %v2022_v5 = vadd.f32 %v2021_v57, %v2003_v2 }
 0x17e   :  { %2229 = vst [vmem:[%s3852_s3 + $0x68] sm:$0xff] %v2057_v4 }
 0x181   :  { %v2040_v6 = vpop.f32.mrf.mxu2  ;;  %v2004_v9 = vpop.f32.mrf.mxu0 }
 0x182   :  { %v2041_v8 = vadd.f32 %v2040_v6, %v2022_v5  ;;  %v2023_v50 = vpop.f32.mrf.mxu1  ;;  %v2005_v56 = vadd.f32 %v2004_v9, %v317_v40 }
 0x183   :  { %v2059_v7 = vpop.f32.mrf.mxu3 }
 0x184   :  { %v2060_v51 = vadd.f32 %v2059_v7, %v2041_v8  ;;  %v2024_v11 = vadd.f32 %v2023_v50, %v2005_v56 }
 0x186   :  { %2237 = vst [vmem:[%s3852_s3 + $0xa8] sm:$0xff] %v2060_v51 }
 0x189   :  { %v2042_v12 = vpop.f32.mrf.mxu2 }
 0x18a   :  { %v2043_v14 = vadd.f32 %v2042_v12, %v2024_v11 }
 0x18b   :  { %v2061_v13 = vpop.f32.mrf.mxu3 }
 0x18c   :  { %v2062_v18 = vadd.f32 %v2061_v13, %v2043_v14 }
 0x18d   :  { %v2073_v15 = vpop.f32.mrf.mxu0 }
 0x18e   :  { %v2074_v17 = vadd.f32 %v2073_v15, %v318_v10  ;;  %2245 = vst [vmem:[%s3852_s3 + $0xe8] sm:$0xff] %v2062_v18 }
 0x18f   :  { %v2092_v16 = vpop.f32.mrf.mxu1 }
 0x190   :  { %v2093_v19 = vadd.f32 %v2092_v16, %v2074_v17 }
 0x191   :  { %v2111_v20 = vpop.f32.mrf.mxu2 }
 0x192   :  { %v2112_v22 = vadd.f32 %v2111_v20, %v2093_v19 }
 0x195   :  { %v2075_v23 = vpop.f32.mrf.mxu0 }
 0x196   :  { %v2076_v26 = vadd.f32 %v2075_v23, %v318_v10 }
 0x197   :  { %v2130_v3 = vpop.f32.mrf.mxu3  ;;  %v2094_v24 = vpop.f32.mrf.mxu1 }
 0x198   :  { %v2131_v25 = vadd.f32 %v2130_v3, %v2112_v22  ;;  %v2095_v27 = vadd.f32 %v2094_v24, %v2076_v26 }
 0x199   :  { %v2113_v28 = vpop.f32.mrf.mxu2 }
 0x19a   :  { %2222 = vst [vmem:[%s3852_s3 + $0x30] sm:$0xff] %v2131_v25  ;;  %v2114_v30 = vadd.f32 %v2113_v28, %v2095_v27 }
 0x19d   :  { %v2078_v31 = vpop.f32.mrf.mxu0 }
 0x19e   :  { %v2079_v33 = vadd.f32 %v2078_v31, %v318_v10 }
 0x19f   :  { %v2132_v29 = vpop.f32.mrf.mxu3  ;;  %v2097_v32 = vpop.f32.mrf.mxu1 }
 0x1a0   :  { %v2133_v34 = vadd.f32 %v2132_v29, %v2114_v30  ;;  %v2098_v35 = vadd.f32 %v2097_v32, %v2079_v33 }
 0x1a1   :  { %v2116_v36 = vpop.f32.mrf.mxu2 }
 0x1a2   :  { %2230 = vst [vmem:[%s3852_s3 + $0x70] sm:$0xff] %v2133_v34  ;;  %v2117_v38 = vadd.f32 %v2116_v36, %v2098_v35 }
 0x1a5   :  { %v2080_v39 = vpop.f32.mrf.mxu0 }
 0x1a6   :  { %v2081_v43 = vadd.f32 %v2080_v39, %v318_v10 }
 0x1a7   :  { %v2135_v37 = vpop.f32.mrf.mxu3  ;;  %v2099_v40 = vpop.f32.mrf.mxu1 }
 0x1a8   :  { %v2136_v42 = vadd.f32 %v2135_v37, %v2117_v38  ;;  %v2100_v46 = vadd.f32 %v2099_v40, %v2081_v43 }
 0x1a9   :  { %v2118_v47 = vpop.f32.mrf.mxu2 }
 0x1aa   :  { %2238 = vst [vmem:[%s3852_s3 + $0xb0] sm:$0xff] %v2136_v42  ;;  %v2119_v45 = vadd.f32 %v2118_v47, %v2100_v46 }
 0x1af   :  { %v2137_v41 = vpop.f32.mrf.mxu3 }
 0x1b0   :  { %v2149_v49 = vpop.f32.mrf.mxu0  ;;  %v2138_v58 = vadd.f32 %v2137_v41, %v2119_v45 }
 0x1b1   :  { %v2150_v55 = vadd.f32 %v2149_v49, %v319_v21 }
 0x1b2   :  { %v2168_v52 = vpop.f32.mrf.mxu1  ;;  %2246 = vst [vmem:[%s3852_s3 + $0xf0] sm:$0xff] %v2138_v58 }
 0x1b3   :  { %v2169_v59 = vadd.f32 %v2168_v52, %v2150_v55 }
 0x1b4   :  { %v2187_v60 = vpop.f32.mrf.mxu2 }
 0x1b5   :  { %v2188_v53 = vadd.f32 %v2187_v60, %v2169_v59 }
 0x1b8   :  { %v2151_v61 = vpop.f32.mrf.mxu0 }
 0x1b9   :  { %v2152_v44 = vadd.f32 %v2151_v61, %v319_v21 }
 0x1ba   :  { %v2206_v48 = vpop.f32.mrf.mxu3  ;;  %v2170_v62 = vpop.f32.mrf.mxu1 }
 0x1bb   :  { %v2207_v63 = vadd.f32 %v2206_v48, %v2188_v53  ;;  %v2171_v0 = vadd.f32 %v2170_v62, %v2152_v44 }
 0x1bc   :  { %v2189_v54 = vpop.f32.mrf.mxu2 }
 0x1bd   :  { %2223 = vst [vmem:[%s3852_s3 + $0x38] sm:$0xff] %v2207_v63  ;;  %v2190_v57 = vadd.f32 %v2189_v54, %v2171_v0 }
 0x1c0   :  { %v2154_v2 = vpop.f32.mrf.mxu0 }
 0x1c1   :  { %v2155_v4 = vadd.f32 %v2154_v2, %v319_v21 }
 0x1c2   :  { %v2208_v1 = vpop.f32.mrf.mxu3  ;;  %v2173_v6 = vpop.f32.mrf.mxu1 }
 0x1c3   :  { %v2209_v5 = vadd.f32 %v2208_v1, %v2190_v57  ;;  %v2174_v7 = vadd.f32 %v2173_v6, %v2155_v4 }
 0x1c4   :  { %v2192_v8 = vpop.f32.mrf.mxu2 }
 0x1c5   :  { %2231 = vst [vmem:[%s3852_s3 + $0x78] sm:$0xff] %v2209_v5  ;;  %v2193_v50 = vadd.f32 %v2192_v8, %v2174_v7 }
 0x1c8   :  { %v2156_v51 = vpop.f32.mrf.mxu0 }
 0x1c9   :  { %v2157_v10 = vadd.f32 %v2156_v51, %v319_v21 }
 0x1ca   :  { %v2211_v9 = vpop.f32.mrf.mxu3  ;;  %v2175_v11 = vpop.f32.mrf.mxu1 }
 0x1cb   :  { %v2212_v56 = vadd.f32 %v2211_v9, %v2193_v50  ;;  %v2176_v12 = vadd.f32 %v2175_v11, %v2157_v10 }
 0x1cc   :  { %v2194_v13 = vpop.f32.mrf.mxu2 }
 0x1cd   :  { %2239 = vst [vmem:[%s3852_s3 + $0xb8] sm:$0xff] %v2212_v56  ;;  %v2195_v14 = vadd.f32 %v2194_v13, %v2176_v12 }
 0x1d2   :  { %v2213_v15 = vpop.f32.mrf.mxu3 }
 0x1d3   :  { %v2214_v16 = vadd.f32 %v2213_v15, %v2195_v14 }
 0x1d5   :  { %2247 = vst [vmem:[%s3852_s3 + $0xf8] sm:$0xff] %v2214_v16 }
 0x1d6   :  { %2252 = vsyncpa [#allocation3], 1 }

// kernel: mha_encoder_decoder_attention.5
= control target key start
LH: loop header
LB: loop body
LE: loop exit
PB: predicated region body
PF: predicated region fallthrough
CT: control target
= control target key end

     0   :  { %9 = vsyncpa [#allocation3], 0  ;;  %s5335_s0 = inlined_call_operand.vmem [shape: f32[2,8,512], index: 0, kind: input, shape index: {}]   ;;  %s5336_s1 = inlined_call_operand.vmem [shape: f32[2,16,1024], index: 1, kind: input, shape index: {}]   ;;  %s5337_s2 = inlined_call_operand.vmem [shape: bf16[512,512], index: 2, kind: input, shape index: {}]   ;;  %s5338_s3 = inlined_call_operand.vmem [shape: f32[1,512], index: 3, kind: input, shape index: {}]   ;;  %s5339_s4 = inlined_call_operand.hbm [shape: f32[2,8,512], index: 4, kind: output, shape index: {}]  }
   0x1   :  { %11 = vsyncpa [#allocation3 + $0x1], 0  ;;  %s3796_s15 = smov 0   ;;  %s3798_s16 = smov 0  }
   0x2   :  { %s3800_s17 = smov 0   ;;  %s3802_s18 = smov 0  }
   0x3 LB: > { %s3817_s19 = sadd.s32 4294967295, %s3766_s18   ;;  %s2937_s20 = sadd.s32 4294967294, %s3766_s18   ;;  %s3766_s18 = sphi %s3802_s18, %s5345_s18   ;;  %s3762_s17 = sphi %s3800_s17, %s5344_s17   ;;  %s3758_s16 = sphi %s3798_s16, %s5343_s16   ;;  %s3754_s15 = sphi %s3796_s15, %s5342_s15  }
   0x4   : > { %s3821_s21 = sadd.s32 1, %s3766_s18   ;;  %s118_s22 = sadd.s32 1, %s3762_s17 }
   0x5   : > { %s115_s23 = ssub.s32 %s3766_s18, %s3821_s21  ;;  %p128_p0 = scmp.ne.s32.totalorder %s3762_s17, %s3758_s16 }
   0x6   : > { %p116_p1 = scmp.eq.s32.totalorder %s115_s23, 0  ;;  %p129_p2 = scmp.eq.s32.totalorder %s3817_s19, 1 }
   0x7   : > { %p134_p3 = scmp.ne.s32.totalorder %s3758_s16, %s3754_s15  ;;  %p135_p4 = scmp.eq.s32.totalorder %s2937_s20, 1 }
   0x8   : > { %s3832_s24 = scalar_select %p116_p1, %s3762_s17, %s118_s22  }
   0x9   : > { %p3834_p5 = por %p129_p2, %p128_p0  ;;  %p3838_p6 = por %p135_p4, %p134_p3 }
   0xa   : > { %p2940_p7 = scmp.ge.s32.totalorder %s3766_s18, 1  ;;  %p175_p8 = scmp.lt.s32.totalorder %s3766_s18, 3 }
   0xc   : > { %p176_p9 = pnand %p2940_p7, %p175_p8 }
   0xd   : > { %p206_p10 = scmp.lt.s32.totalorder (!%p176_p9), %s3817_s19, 1  ;;  %s3769_s10 = smov (!%p176_p9), 64  }
   0xe   : > { %179 = sbr.rel (%p176_p9) target bundleno = 976 (0x3d0), region = 36  ;;  %s3724_s23 = scalar_lea.hbm (!%p176_p9), %s5339_s4, 64 }
  0x13   : > { %s207_s27 = scalar_select %p206_p10, %s3817_s19, 1  ;;  %v3768_v0 = vmov 1983009808   ;;  %vm264_vm0 = vcmask 1047556   ;;  %v3770_v52 = vmov 1934713408  }
  0x14   : > { %v267_v1 = vunpack.c.l.s4 %v3768_v0  ;;  %v281_v53 = vunpack.c.l.s4 %v3770_v52  ;;  %vm1171_vm1 = vcmask 523264   ;;  %vm1353_vm2 = vcmask 130048  }
  0x15   : > { %s3490_s28 = sshll.u32 %s207_s27, 7  ;;  %s3489_s29 = sshll.u32 %s207_s27, 5 }
  0x16   : > { %s3849_s6 = scalar_lea.vmem %s5336_s1, %s3490_s28  ;;  %s210_s9 = scalar_lea.vmem %s5335_s0, %s3489_s29  ;;  %v3860_v10 = vunpack.c.0.s8 %v267_v1  ;;  %v3888_v55 = vunpack.c.0.s8 %v281_v53 }
  0x17   : > { %v225_v2 = vld [vmem:[%s3849_s6 + $0x10] sm:$0xff]  ;;  %v226_v3 = vld [vmem:[%s3849_s6 + $0x18] sm:$0xff]  ;;  %v223_v4 = vld [vmem:[%s3849_s6] sm:$0xff]  ;;  %s203_s29 = sand.u32 1, %s3758_s16  }
  0x18   : > { %v232_v5 = vpack.c.bf16 %v226_v3, %v225_v2  ;;  %v224_v6 = vld [vmem:[%s3849_s6 + $0x8] sm:$0xff]  ;;  %v229_v7 = vld [vmem:[%s3849_s6 + $0x50] sm:$0xff]  ;;  %v230_v8 = vld [vmem:[%s3849_s6 + $0x58] sm:$0xff]  ;;  %s2941_s30 = sshll.u32 %s203_s29, 5  ;;  %s2850_s13 = scalar_lea.sflag [#allocation3], %s203_s29 }
  0x19   : > { %v231_v9 = vpack.c.bf16 %v224_v6, %v223_v4  ;;  %v234_v11 = vpack.c.bf16 %v230_v8, %v229_v7  ;;  %v227_v12 = vld [vmem:[%s3849_s6 + $0x40] sm:$0xff]  ;;  %v228_v13 = vld [vmem:[%s3849_s6 + $0x48] sm:$0xff]  ;;  %v219_v14 = vld [vmem:[%s210_s9 + $0x10] sm:$0xff]  ;;  %s5295_s5 = scalar_lea.vmem [#allocation2], %s2941_s30 }
  0x1a   : > { %452 = vrot.lane.b32.xlu0 %v232_v5, %s3769_s10  ;;  %v464_v15 = vrot.slane %v232_v5, 4  ;;  %v233_v16 = vpack.c.bf16 %v228_v13, %v227_v12  ;;  %v220_v17 = vld [vmem:[%s210_s9 + $0x18] sm:$0xff]  ;;  %v217_v18 = vld [vmem:[%s210_s9] sm:$0xff]  ;;  %v218_v19 = vld [vmem:[%s210_s9 + $0x8] sm:$0xff]  ;;  %s2863_s11 = sshll.u32 %s5295_s5, 4  ;;  %s2864_s11 = int_to_ptr.vmem [resolvable:$true] %s2863_s11 }
  0x1b   : > { %438 = vrot.lane.b32.xlu1 %v231_v9, %s3769_s10  ;;  %v434_v20 = vrot.slane %v231_v9, 4  ;;  %v520_v21 = vrot.slane %v234_v11, 4  ;;  %v222_v22 = vpack.c.bf16 %v220_v17, %v219_v14  ;;  %v221_v25 = vpack.c.bf16 %v218_v19, %v217_v18 }
  0x1c   : > { %v465_v23 = vsel %vm264_vm0, %v464_v15, %v231_v9  ;;  %v435_v24 = vrot.slane %v233_v16, 4 }
  0x1d   : > { %v469_v26 = vperm.slane %v465_v23, %v3860_v10  ;;  %v471_v27 = vsel %vm264_vm0, %v232_v5, %v434_v20  ;;  %v521_v28 = vsel %vm264_vm0, %v520_v21, %v233_v16  ;;  %257 = vrot.lane.b32.xlu2 %v222_v22, %s3769_s10  ;;  %v263_v29 = vrot.slane %v222_v22, 4 }
  0x1e   : > { %v475_v30 = vperm.slane %v471_v27, %v3860_v10  ;;  %v525_v31 = vperm.slane %v521_v28, %v3860_v10  ;;  %v527_v32 = vsel %vm264_vm0, %v234_v11, %v435_v24  ;;  %v248_v33 = vrot.slane %v221_v25, 4 }
  0x1f   : > { %v478_v34 = vrot.slane %v469_v26, 4  ;;  %v531_v35 = vperm.slane %v527_v32, %v3860_v10  ;;  %v265_v36 = vsel %vm264_vm0, %v263_v29, %v221_v25 }
  0x20   : > { %v476_v37 = vrot.slane %v475_v30, 4  ;;  %v534_v38 = vrot.slane %v525_v31, 4  ;;  %v269_v39 = vperm.slane %v265_v36, %v3860_v10  ;;  %v271_v40 = vsel %vm264_vm0, %v222_v22, %v248_v33 }
  0x21   : > { %v479_v41 = vsel %vm264_vm0, %v475_v30, %v478_v34  ;;  %v532_v42 = vrot.slane %v531_v35, 4  ;;  %v275_v43 = vperm.slane %v271_v40, %v3860_v10 }
  0x22   : > { %v477_v44 = vsel %vm264_vm0, %v476_v37, %v469_v26  ;;  %454 = vrot.lane.b32.xlu0 %v234_v11, %s3769_s10  ;;  %v535_v45 = vsel %vm264_vm0, %v531_v35, %v534_v38  ;;  %v278_v46 = vrot.slane %v269_v39, 4  ;;  %v3895_v60 = vperm.slane %v479_v41, %v3888_v55 }
  0x23   : > { %v533_v47 = vsel %vm264_vm0, %v532_v42, %v525_v31  ;;  %440 = vrot.lane.b32.xlu1 %v233_v16, %s3769_s10  ;;  %v276_v48 = vrot.slane %v275_v43, 4  ;;  %v3892_v59 = vperm.slane %v477_v44, %v3888_v55  ;;  %v3912_v11 = vperm.slane %v535_v45, %v3888_v55 }
  0x24   : > { %v279_v49 = vsel %vm264_vm0, %v275_v43, %v278_v46  ;;  %v490_v4 = vrot.slane %v3895_v60, 4  ;;  %v3908_v7 = vperm.slane %v533_v47, %v3888_v55  ;;  %v596_v21 = vshrl.u32 %v3895_v60, 16 }
  0x25   : > { %250 = vrot.lane.b32.xlu2 %v221_v25, %s3769_s10  ;;  %v277_v50 = vsel %vm264_vm0, %v276_v48, %v269_v39  ;;  %v287_v62 = vperm.slane %v279_v49, %v3888_v55  ;;  %v488_v3 = vrot.slane %v3892_v59, 4  ;;  %v580_v18 = vshrl.u32 %v3892_v59, 16 }
  0x26   : > { %v3902_v2 = vperm.slane %v277_v50, %v3888_v55  ;;  %v3922_v16 = vsel %vm264_vm0, 0, %v490_v4  ;;  %v544_v20 = vrot.slane %v3908_v7, 4  ;;  %v546_v24 = vrot.slane %v3912_v11, 4 }
  0x27   : > { %v290_v8 = vrot.slane %v287_v62, 4  ;;  %v3919_v15 = vsel %vm264_vm0, 0, %v488_v3  ;;  %v604_v27 = vshrl.u32 %v3922_v16, 16  ;;  %v340_v29 = vshrl.u32 %v287_v62, 16 }
  0x28   : > { %v288_v17 = vrot.slane %v3902_v2, 4  ;;  %v588_v26 = vshrl.u32 %v3919_v15, 16  ;;  %v324_v28 = vshrl.u32 %v3902_v2, 16  ;;  %v3939_v37 = vsel %vm264_vm0, 0, %v544_v20 }
  0x29   : > { %v291_v19 = vsel %vm264_vm0, 0, %v290_v8  ;;  %v612_v38 = vshrl.u32 %v3908_v7, 16  ;;  %v3947_v42 = vsel %vm264_vm0, 0, %v546_v24  ;;  %v628_v50 = vshrl.u32 %v3912_v11, 16 }
  0x2a   : > { %v3936_v32 = vsel %vm264_vm0, 0, %v288_v17  ;;  %v348_v34 = vshrl.u32 %v291_v19, 16 }
  0x2b   : > { %v332_v48 = vshrl.u32 %v3936_v32, 16 }
  0x77   : > { %v258_v51 = vpop.permute.xlu2 %257 }
  0x78   : > { %v292_v54 = vrot.slane %v258_v51, 4 }
  0x7f   : > { %v251_v56 = vpop.permute.xlu2 %250 }
  0x80   : > { %v252_v57 = vrot.slane %v251_v56, 4  ;;  %v293_v58 = vsel %vm264_vm0, %v292_v54, %v251_v56  ;;  %v620_v54 = vshrl.u32 %v3939_v37, 16 }
  0x81   : > { %v297_v61 = vperm.slane %v293_v58, %v3860_v10 }
  0x82   : > { %v299_v63 = vsel %vm264_vm0, %v258_v51, %v252_v57 }
  0x83   : > { %v303_v0 = vperm.slane %v299_v63, %v3860_v10  ;;  %v306_v1 = vrot.slane %v297_v61, 4 }
  0x85   : > { %v304_v5 = vrot.slane %v303_v0, 4  ;;  %v307_v6 = vsel %vm264_vm0, %v303_v0, %v306_v1 }
  0x86   : > { %v315_v9 = vperm.slane %v307_v6, %v3888_v55 }
  0x87   : > { %v305_v12 = vsel %vm264_vm0, %v304_v5, %v297_v61  ;;  %v636_v61 = vshrl.u32 %v3947_v42, 16 }
  0x88   : > { %v3916_v13 = vperm.slane %v305_v12, %v3888_v55  ;;  %v318_v14 = vrot.slane %v315_v9, 4  ;;  %v341_v33 = vshrl.u32 %v315_v9, 16  ;;  %v338_v41 = vpack.i.b16 %v315_v9, %v287_v62 }
  0x8a   : > { %v316_v22 = vrot.slane %v3916_v13, 4  ;;  %v319_v23 = vsel %vm264_vm0, 0, %v318_v14  ;;  %v325_v45 = vshrl.u32 %v3916_v13, 16  ;;  %v3954_v49 = vpack.i.b16 %v341_v33, %v340_v29 }
  0x8b   : > { %v349_v36 = vshrl.u32 %v319_v23, 16  ;;  %v346_v46 = vpack.i.b16 %v319_v23, %v291_v19  ;;  %v322_v57 = vpack.i.b16 %v3916_v13, %v3902_v2  ;;  %v352_v58 = vrot.slane %v338_v41, 4 }
  0x8c   : > { %v453_v25 = vpop.permute.xlu0 %452  ;;  %v3944_v40 = vsel %vm264_vm0, 0, %v316_v22  ;;  %v3965_v63 = vpack.i.b16 %v325_v45, %v324_v28  ;;  %v380_v6 = vrot.slane %v3954_v49, 4  ;;  %v238_v49 = vld [vmem:[%s3849_s6 + $0x38] sm:$0xff] }
  0x8d   : > { %v492_v30 = vrot.slane %v453_v25, 4  ;;  %v439_v31 = vpop.permute.xlu1 %438  ;;  %v333_v52 = vshrl.u32 %v3944_v40, 16  ;;  %v3958_v53 = vpack.i.b16 %v349_v36, %v348_v34  ;;  %v330_v0 = vpack.i.b16 %v3944_v40, %v3936_v32  ;;  %v237_v40 = vld [vmem:[%s3849_s6 + $0x30] sm:$0xff] }
  0x8e   : > { %v442_v35 = vrot.slane %v439_v31, 4  ;;  %v3969_v1 = vrot.slane %v346_v46, 4 }
  0x8f   : > { %v493_v39 = vsel %vm264_vm0, %v492_v30, %v439_v31  ;;  %v3975_v12 = vpack.i.b16 %v333_v52, %v332_v48  ;;  %v386_v13 = vrot.slane %v3958_v53, 4 }
  0x90   : > { %v497_v43 = vperm.slane %v493_v39, %v3860_v10  ;;  %v499_v44 = vsel %vm264_vm0, %v453_v25, %v442_v35 }
  0x91   : > { %v503_v47 = vperm.slane %v499_v44, %v3860_v10  ;;  %v387_v32 = vsel %vm264_vm0, %v386_v13, %v3975_v12 }
  0x92   : > { %v506_v51 = vrot.slane %v497_v43, 4 }
  0x93   : > { %v504_v56 = vrot.slane %v503_v47, 4 }
  0x94   : > { %v507_v62 = vsel %vm264_vm0, %v503_v47, %v506_v51  ;;  %v455_v3 = vpop.permute.xlu0 %454 }
  0x95   : > { %v505_v4 = vsel %vm264_vm0, %v504_v56, %v497_v43  ;;  %v515_v5 = vperm.slane %v507_v62, %v3888_v55  ;;  %v548_v2 = vrot.slane %v455_v3, 4  ;;  %v441_v8 = vpop.permute.xlu1 %440 }
  0x96   : > { %v511_v9 = vperm.slane %v505_v4, %v3888_v55  ;;  %v443_v14 = vrot.slane %v441_v8, 4 }
  0x97   : > { %v518_v17 = vrot.slane %v515_v5, 4  ;;  %v594_v19 = vpack.i.b16 %v515_v5, %v3895_v60  ;;  %v597_v20 = vshrl.u32 %v515_v5, 16  ;;  %v549_v22 = vsel %vm264_vm0, %v548_v2, %v441_v8 }
  0x98   : > { %v516_v23 = vrot.slane %v511_v9, 4  ;;  %v578_v24 = vpack.i.b16 %v511_v9, %v3892_v59  ;;  %v581_v25 = vshrl.u32 %v511_v9, 16  ;;  %v553_v28 = vperm.slane %v549_v22, %v3860_v10 }
  0x99   : > { %v519_v29 = vsel %vm264_vm0, 0, %v518_v17  ;;  %v598_v30 = vpack.i.b16 %v597_v20, %v596_v21  ;;  %v640_v31 = vrot.slane %v594_v19, 4  ;;  %v555_v33 = vsel %vm264_vm0, %v455_v3, %v443_v14 }
  0x9a   : > { %v517_v34 = vsel %vm264_vm0, 0, %v516_v23  ;;  %v582_v60 = vpack.i.b16 %v581_v25, %v580_v18  ;;  %v602_v35 = vpack.i.b16 %v519_v29, %v3922_v16  ;;  %v605_v36 = vshrl.u32 %v519_v29, 16 }
  0x9b   : > { %v586_v39 = vpack.i.b16 %v517_v34, %v3919_v15  ;;  %v589_v41 = vshrl.u32 %v517_v34, 16  ;;  %v668_v43 = vrot.slane %v598_v30, 4  ;;  %v559_v44 = vperm.slane %v555_v33, %v3860_v10 }
  0x9c   : > { %v606_v21 = vpack.i.b16 %v605_v36, %v604_v27  ;;  %v646_v45 = vrot.slane %v602_v35, 4  ;;  %v562_v46 = vrot.slane %v553_v28, 4  ;;  %v641_v47 = vsel %vm264_vm0, %v640_v31, %v578_v24 }
  0x9d   : > { %v590_v59 = vpack.i.b16 %v589_v41, %v588_v26  ;;  %v560_v18 = vrot.slane %v559_v44, 4  ;;  %v645_v48 = vperm.slane %v641_v47, %v3860_v10  ;;  %v669_v51 = vsel %vm264_vm0, %v668_v43, %v582_v60 }
  0x9e   : > { %v674_v52 = vrot.slane %v606_v21, 4  ;;  %v563_v56 = vsel %vm264_vm0, %v559_v44, %v562_v46  ;;  %v647_v62 = vsel %vm264_vm0, %v646_v45, %v586_v39  ;;  %v673_v16 = vperm.slane %v669_v51, %v3860_v10 }
  0x9f   : > { %v561_v27 = vsel %vm264_vm0, %v560_v18, %v553_v28  ;;  %v571_v3 = vperm.slane %v563_v56, %v3888_v55  ;;  %v651_v4 = vperm.slane %v647_v62, %v3860_v10  ;;  %v654_v15 = vrot.slane %v645_v48, 4 }
  0xa0   : > { %v567_v26 = vperm.slane %v561_v27, %v3888_v55  ;;  %v675_v5 = vsel %vm264_vm0, %v674_v52, %v590_v59  ;;  %v682_v2 = vrot.slane %v673_v16, 4  ;;  %v4006_v8 = vsel %vm264_vm0, %v352_v58, %v322_v57 }
  0xa1   : > { %v574_v9 = vrot.slane %v571_v3, 4  ;;  %v626_v14 = vpack.i.b16 %v571_v3, %v3912_v11  ;;  %v629_v17 = vshrl.u32 %v571_v3, 16  ;;  %v652_v19 = vrot.slane %v651_v4, 4 }
  0xa2   : > { %v572_v20 = vrot.slane %v567_v26, 4  ;;  %v610_v22 = vpack.i.b16 %v567_v26, %v3908_v7  ;;  %v613_v23 = vshrl.u32 %v567_v26, 16  ;;  %v679_v24 = vperm.slane %v675_v5, %v3860_v10 }
  0xa3   : > { %v575_v25 = vsel %vm264_vm0, 0, %v574_v9  ;;  %v630_v28 = vpack.i.b16 %v629_v17, %v628_v50  ;;  %v696_v29 = vrot.slane %v626_v14, 4  ;;  %v653_v57 = vsel %vm264_vm0, %v652_v19, %v645_v48 }
  0xa4   : > { %v573_v58 = vsel %vm264_vm0, 0, %v572_v20  ;;  %v614_v30 = vpack.i.b16 %v613_v23, %v612_v38  ;;  %v634_v31 = vpack.i.b16 %v575_v25, %v3947_v42  ;;  %v637_v33 = vshrl.u32 %v575_v25, 16 }
  0xa5   : > { %v618_v34 = vpack.i.b16 %v573_v58, %v3939_v37  ;;  %v621_v60 = vshrl.u32 %v573_v58, 16  ;;  %v724_v35 = vrot.slane %v630_v28, 4  ;;  %v659_v36 = vperm.slane %v653_v57, %v3888_v55 }
  0xa6   : > { %v638_v11 = vpack.i.b16 %v637_v33, %v636_v61  ;;  %v702_v50 = vrot.slane %v634_v31, 4  ;;  %v680_v39 = vrot.slane %v679_v24, 4  ;;  %v697_v41 = vsel %vm264_vm0, %v696_v29, %v610_v22 }
  0xa7   : > { %v622_v7 = vpack.i.b16 %v621_v60, %v620_v54  ;;  %v701_v38 = vperm.slane %v697_v41, %v3860_v10  ;;  %v725_v43 = vsel %vm264_vm0, %v724_v35, %v614_v30  ;;  %v655_v44 = vsel %vm264_vm0, %v651_v4, %v654_v15 }
  0xa8   : > { %v730_v21 = vrot.slane %v638_v11, 4  ;;  %v681_v45 = vsel %vm264_vm0, %v680_v39, %v673_v16  ;;  %v703_v46 = vsel %vm264_vm0, %v702_v50, %v618_v34  ;;  %v729_v42 = vperm.slane %v725_v43, %v3860_v10 }
  0xa9   : > { %v687_v61 = vperm.slane %v681_v45, %v3888_v55  ;;  %v707_v47 = vperm.slane %v703_v46, %v3860_v10  ;;  %v4035_v37 = vperm.slane %v655_v44, %v3888_v55  ;;  %v683_v54 = vsel %vm264_vm0, %v679_v24, %v682_v2 }
  0xaa   : > { %v731_v59 = vsel %vm264_vm0, %v730_v21, %v622_v7  ;;  %v4040_v18 = vperm.slane %v683_v54, %v3888_v55  ;;  %v710_v48 = vrot.slane %v701_v38, 4  ;;  %v738_v51 = vrot.slane %v729_v42, 4 }
  0xab   : > { %v708_v52 = vrot.slane %v707_v47, 4  ;;  %v735_v56 = vperm.slane %v731_v59, %v3860_v10  ;;  %v754_v62 = vpack.i.b16 %v687_v61, %v659_v36  ;;  %v755_v16 = vshrl.u32 %v659_v36, 16 }
  0xac   : > { %v711_v27 = vsel %vm264_vm0, %v707_v47, %v710_v48  ;;  %v766_v3 = vpack.i.b16 %v4040_v18, %v4035_v37  ;;  %v756_v4 = vshrl.u32 %v687_v61, 16  ;;  %v664_v15 = vrot.slane %v659_v36, 4 }
  0xad   : > { %v709_v26 = vsel %vm264_vm0, %v708_v52, %v701_v38  ;;  %v736_v5 = vrot.slane %v735_v56, 4  ;;  %v1168_v2 = vunpack.c.l.b16 %v754_v62  ;;  %v719_v9 = vperm.slane %v711_v27, %v3888_v55 }
  0xae   : > { %v715_v14 = vperm.slane %v709_v26, %v3888_v55  ;;  %v739_v17 = vsel %vm264_vm0, %v735_v56, %v738_v51  ;;  %v1257_v19 = vunpack.c.l.b16 %v766_v3  ;;  %v757_v20 = vpack.i.b16 %v756_v4, %v755_v16 }
  0xaf   : > { %v737_v22 = vsel %vm264_vm0, %v736_v5, %v729_v42  ;;  %v747_v23 = vperm.slane %v739_v17, %v3888_v55  ;;  %v665_v24 = vsel %vm264_vm0, 0, %v664_v15  ;;  %v692_v25 = vrot.slane %v687_v61, 4 }
  0xb0   : > { %v743_v28 = vperm.slane %v737_v22, %v3888_v55  ;;  %v779_v29 = vshrl.u32 %v715_v14, 16  ;;  %v1191_v57 = vunpack.c.l.b16 %v757_v20  ;;  %v720_v58 = vrot.slane %v715_v14, 4 }
  0xb1   : > { %v790_v30 = vpack.i.b16 %v747_v23, %v719_v9  ;;  %v693_v31 = vsel %vm264_vm0, 0, %v692_v25  ;;  %v767_v33 = vshrl.u32 %v4035_v37, 16  ;;  %v768_v34 = vshrl.u32 %v4040_v18, 16 }
  0xb2   : > { %v778_v60 = vpack.i.b16 %v743_v28, %v715_v14  ;;  %v780_v35 = vshrl.u32 %v743_v28, 16  ;;  %v721_v36 = vsel %vm264_vm0, 0, %v720_v58  ;;  %v748_v11 = vrot.slane %v743_v28, 4 }
  0xb3   : > { %v1258_v50 = vunpack.c.l.b16 %v790_v30  ;;  %v760_v39 = vpack.i.b16 %v693_v31, %v665_v24  ;;  %v769_v41 = vpack.i.b16 %v768_v34, %v767_v33  ;;  %v791_v7 = vshrl.u32 %v719_v9, 16 }
  0xb4   : > { %v1169_v38 = vunpack.c.l.b16 %v778_v60  ;;  %v781_v43 = vpack.i.b16 %v780_v35, %v779_v29  ;;  %v749_v44 = vsel %vm264_vm0, 0, %v748_v11  ;;  %v792_v21 = vshrl.u32 %v747_v23, 16 }
  0xb5   : > { %v1259_v45 = vpack.c.b16 %v1258_v50, %v1257_v19  ;;  %v784_v46 = vpack.i.b16 %v749_v44, %v721_v36  ;;  %v1213_v42 = vunpack.c.l.b16 %v760_v39  ;;  %v1279_v61 = vunpack.c.l.b16 %v769_v41 }
  0xb6   : > { %v1170_v47 = vpack.c.b16 %v1169_v38, %v1168_v2  ;;  %v1192_v54 = vunpack.c.l.b16 %v781_v43  ;;  %v793_v59 = vpack.i.b16 %v792_v21, %v791_v7  ;;  %v666_v48 = vrot.slane %v4035_v37, 4 }
  0xb7   : > { %v1264_v51 = vsel %vm1171_vm1, %v1259_v45, 0  ;;  %v1214_v52 = vunpack.c.l.b16 %v784_v46  ;;  %v694_v56 = vrot.slane %v4040_v18, 4  ;;  %v722_v62 = vrot.slane %v719_v9, 4 }
  0xb8   : > { %v1176_v16 = vsel %vm1171_vm1, %v1170_v47, 0  ;;  %v1193_v27 = vpack.c.b16 %v1192_v54, %v1191_v57  ;;  %v1280_v3 = vunpack.c.l.b16 %v793_v59  ;;  %v667_v4 = vsel %vm264_vm0, 0, %v666_v48  ;;  %v241_v47 = vld [vmem:[%s3849_s6 + $0x70] sm:$0xff]  ;;  %v242_v54 = vld [vmem:[%s3849_s6 + $0x78] sm:$0xff] }
  0xb9   : > { %1185 = vmatpush.bf16.xpose.msra.mxu0 %v1176_v16  ;;  %v1215_v15 = vpack.c.b16 %v1214_v52, %v1213_v42  ;;  %v695_v26 = vsel %vm264_vm0, 0, %v694_v56  ;;  %v723_v5 = vsel %vm264_vm0, 0, %v722_v62  ;;  %v750_v2 = vrot.slane %v747_v23, 4 }
  0xba   : > { %v1198_v37 = vsel %vm1171_vm1, %v1193_v27, 0  ;;  %v1281_v14 = vpack.c.b16 %v1280_v3, %v1279_v61  ;;  %v772_v17 = vpack.i.b16 %v695_v26, %v667_v4  ;;  %v761_v18 = vshrl.u32 %v665_v24, 16 }
  0xbb   : > { %1207 = vmatpush.bf16.xpose.msra.mxu1 %v1198_v37  ;;  %v1220_v9 = vsel %vm1171_vm1, %v1215_v15, 0  ;;  %v751_v19 = vsel %vm264_vm0, 0, %v750_v2  ;;  %v762_v20 = vshrl.u32 %v693_v31, 16  ;;  %v785_v22 = vshrl.u32 %v721_v36, 16 }
  0xbc   : > { %1229 = vmatpush.bf16.xpose.msra.mxu2 %v1220_v9  ;;  %v1286_v25 = vsel %vm1171_vm1, %v1281_v14, 0  ;;  %v796_v28 = vpack.i.b16 %v751_v19, %v723_v5  ;;  %v1301_v29 = vunpack.c.l.b16 %v772_v17  ;;  %v786_v57 = vshrl.u32 %v749_v44, 16  ;;  %v235_v9 = vld [vmem:[%s3849_s6 + $0x20] sm:$0xff] }
  0xbd   : > { %v763_v23 = vpack.i.b16 %v762_v20, %v761_v18  ;;  %v773_v58 = vshrl.u32 %v667_v4, 16  ;;  %v774_v30 = vshrl.u32 %v695_v26, 16  ;;  %v797_v33 = vshrl.u32 %v723_v5, 16  ;;  %v239_v5 = vld [vmem:[%s3849_s6 + $0x60] sm:$0xff]  ;;  %v240_v18 = vld [vmem:[%s3849_s6 + $0x68] sm:$0xff] }
  0xbe   : > { %v1302_v34 = vunpack.c.l.b16 %v796_v28  ;;  %v787_v24 = vpack.i.b16 %v786_v57, %v785_v22  ;;  %v798_v60 = vshrl.u32 %v751_v19, 16  ;;  %v357_v31 = vperm.slane %v4006_v8, %v3860_v10  ;;  %v236_v19 = vld [vmem:[%s3849_s6 + $0x28] sm:$0xff]  ;;  %s3619_s6 = sshll.u32 %s3817_s19, 5 }
  0xbf   : > { %v1235_v35 = vunpack.c.l.b16 %v763_v23  ;;  %v775_v36 = vpack.i.b16 %v774_v30, %v773_v58  ;;  %v359_v11 = vsel %vm264_vm0, %v3969_v1, %v330_v0  ;;  %v381_v50 = vsel %vm264_vm0, %v380_v6, %v3965_v63  ;;  %s2861_s9 = scalar_lea.hbm %s5339_s4, %s3619_s6 }
  0xc0   : > { %v1303_v39 = vpack.c.b16 %v1302_v34, %v1301_v29  ;;  %v1236_v41 = vunpack.c.l.b16 %v787_v24  ;;  %v799_v7 = vpack.i.b16 %v798_v60, %v797_v33  ;;  %v363_v38 = vperm.slane %v359_v11, %v3860_v10  ;;  %s2865_s12 = sshll.u32 %s2861_s9, 4  ;;  %s2866_s12 = int_to_ptr.hbm [resolvable:$true] %s2865_s12 }
  0xc1   : > { %1273 = vmatpush.bf16.xpose.msrb.mxu0 %v1264_v51  ;;  %v1323_v43 = vunpack.c.l.b16 %v775_v36  ;;  %v366_v8 = vrot.slane %v357_v31, 4  ;;  %v385_v44 = vperm.slane %v381_v50, %v3860_v10  ;;  %v391_v21 = vperm.slane %v387_v32, %v3860_v10  ;;  %s3718_s14 = sshra.s32 %s2866_s12, 4  ;;  %s3719_s14 = int_to_ptr.hbm [resolvable:$true] %s3718_s14 }
  0xc2   : > { %v1308_v63 = vsel %vm1171_vm1, %v1303_v39, 0  ;;  %v1237_v0 = vpack.c.b16 %v1236_v41, %v1235_v35  ;;  %v1324_v1 = vunpack.c.l.b16 %v799_v7  ;;  %v364_v6 = vrot.slane %v363_v38, 4  ;;  %s3720_s19 = scalar_lea.hbm %s3719_s14, 32  ;;  %p3725_p0 = scmp.lt.s32.totalorder %s3719_s14, %s5339_s4 }
  0xc3   : > { %1295 = vmatpush.bf16.xpose.msrb.mxu1 %v1286_v25  ;;  %v394_v45 = vrot.slane %v385_v44, 4  ;;  %v367_v46 = vsel %vm264_vm0, %v363_v38, %v366_v8  ;;  %v4092_v42 = vpack.c.bf16 %v238_v49, %v237_v40  ;;  %v392_v48 = vrot.slane %v391_v21, 4  ;;  %p3721_p11 = scmp.ne.s32.totalorder %s3719_s14, %s3720_s19  ;;  %p3726_p1 = scmp.lt.s32.totalorder %s3724_s23, %s3720_s19 }
  0xc4   : > { %1317 = vmatpush.bf16.xpose.msrb.mxu2 %v1308_v63  ;;  %v1242_v53 = vsel %vm1171_vm1, %v1237_v0, 0  ;;  %v1325_v12 = vpack.c.b16 %v1324_v1, %v1323_v43  ;;  %v365_v13 = vsel %vm264_vm0, %v364_v6, %v357_v31  ;;  %v4097_v61 = vperm.slane %v367_v46, %v3888_v55 }
  0xc5   : > { %1251 = vmatpush.bf16.xpose.msra.mxu3 %v1242_v53  ;;  %v371_v59 = vperm.slane %v365_v13, %v3888_v55  ;;  %v395_v51 = vsel %vm264_vm0, %v391_v21, %v394_v45  ;;  %v832_v52 = vrot.slane %v4092_v42, 4  ;;  %820 = vrot.lane.b32.xlu0 %v4092_v42, %s3769_s10  ;;  %v393_v3 = vsel %vm264_vm0, %v392_v48, %v385_v44  ;;  %p3722_p12 = pnand %p3721_p11, %p3834_p5  ;;  %p3727_p2 = por %p3726_p1, %p3725_p0 }
  0xc6   : > { %v1330_v56 = vsel %vm1171_vm1, %v1325_v12, 0  ;;  %v403_v62 = vperm.slane %v395_v51, %v3888_v55  ;;  %v423_v16 = vshrl.u32 %v4097_v61, 16  ;;  %v378_v27 = vrot.slane %v4097_v61, 4 }
  0xc7   : > { %v411_v4 = vshrl.u32 %v371_v59, 16  ;;  %v376_v15 = vrot.slane %v371_v59, 4  ;;  %v246_v26 = vpack.c.bf16 %v242_v54, %v241_v47  ;;  %v399_v2 = vperm.slane %v393_v3, %v3888_v55  ;;  %p3723_p13 = pneg %p3722_p12 }
  0xc8   : > { %v422_v37 = vpack.i.b16 %v403_v62, %v4097_v61  ;;  %v424_v14 = vshrl.u32 %v403_v62, 16  ;;  %v379_v17 = vsel %vm264_vm0, 0, %v378_v27  ;;  %v406_v22 = vrot.slane %v403_v62, 4 }
  0xc9   : > { %v377_v20 = vsel %vm264_vm0, 0, %v376_v15  ;;  %v429_v25 = vshrl.u32 %v379_v17, 16  ;;  %v888_v28 = vrot.slane %v246_v26, 4  ;;  %822 = vrot.lane.b32.xlu1 %v246_v26, %s3769_s10  ;;  %v410_v29 = vpack.i.b16 %v399_v2, %v371_v59  ;;  %p3728_p3 = pnand %p3727_p2, %p3723_p13 }
  0xca   : > { %v412_v57 = vshrl.u32 %v399_v2, 16  ;;  %v404_v23 = vrot.slane %v399_v2, 4  ;;  %v417_v58 = vshrl.u32 %v377_v20, 16  ;;  %v425_v30 = vpack.i.b16 %v424_v14, %v423_v16 }
  0xcb   : > { %v407_v33 = vsel %vm264_vm0, 0, %v406_v22  ;;  %v245_v34 = vpack.c.bf16 %v240_v18, %v239_v5  ;;  %v243_v24 = vpack.c.bf16 %v236_v19, %v235_v9  ;;  %2956 = vmatmul.msk.bf16.vlgmr.msra.gmra.mxu0 %vm1171_vm1, %v410_v29 }
  0xcc   : > { %v413_v60 = vpack.i.b16 %v412_v57, %v411_v4  ;;  %v405_v31 = vsel %vm264_vm0, 0, %v404_v23  ;;  %v428_v35 = vpack.i.b16 %v407_v33, %v379_v17  ;;  %v430_v36 = vshrl.u32 %v407_v33, 16 }
  0xcd   : > { %1339 = vmatpush.bf16.xpose.msrb.mxu3 %v1330_v56  ;;  %v416_v11 = vpack.i.b16 %v405_v31, %v377_v20  ;;  %v418_v50 = vshrl.u32 %v405_v31, 16  ;;  %v803_v39 = vrot.slane %v245_v34, 4  ;;  %v889_v41 = vsel %vm264_vm0, %v888_v28, %v245_v34  ;;  %808 = vrot.lane.b32.xlu0 %v245_v34, %s3769_s10 }
  0xce   : > { %806 = vrot.lane.b32.xlu2 %v243_v24, %s3769_s10  ;;  %2957 = vmatmul.msk.bf16.vlgmr.msra.gmra.mxu1 %vm1171_vm1, %v413_v60  ;;  %v431_v7 = vpack.i.b16 %v430_v36, %v429_v25  ;;  %v893_v38 = vperm.slane %v889_v41, %v3860_v10  ;;  %v802_v43 = vrot.slane %v243_v24, 4  ;;  %v833_v8 = vsel %vm264_vm0, %v832_v52, %v243_v24 }
  0xcf   : > { %2958 = vmatmul.msk.bf16.vlgmr.msra.gmra.mxu2 %vm1171_vm1, %v416_v11  ;;  %v419_v44 = vpack.i.b16 %v418_v50, %v417_v58  ;;  %v895_v32 = vsel %vm264_vm0, %v246_v26, %v803_v39  ;;  %v837_v40 = vperm.slane %v833_v8, %v3860_v10 }
  0xd0   : > { %v899_v49 = vperm.slane %v895_v32, %v3860_v10  ;;  %v902_v63 = vrot.slane %v893_v38, 4  ;;  %v839_v0 = vsel %vm264_vm0, %v4092_v42, %v802_v43 }
  0xd1   : > { %2959 = vmatmul.msk.bf16.vlgmr.msra.gmra.mxu3 %vm1171_vm1, %v419_v44  ;;  %v843_v1 = vperm.slane %v839_v0, %v3860_v10  ;;  %v846_v6 = vrot.slane %v837_v40, 4 }
  0xd2   : > { %v900_v21 = vrot.slane %v899_v49, 4  ;;  %v903_v45 = vsel %vm264_vm0, %v899_v49, %v902_v63 }
  0xd3   : > { %v844_v46 = vrot.slane %v843_v1, 4  ;;  %v847_v53 = vsel %vm264_vm0, %v843_v1, %v846_v6  ;;  %v4153_v48 = vperm.slane %v903_v45, %v3888_v55 }
  0xd4   : > { %v901_v12 = vsel %vm264_vm0, %v900_v21, %v893_v38  ;;  %v4161_v56 = vperm.slane %v847_v53, %v3888_v55 }
  0xd5   : > { %v845_v13 = vsel %vm264_vm0, %v844_v46, %v837_v40  ;;  %v4148_v54 = vperm.slane %v901_v12, %v3888_v55  ;;  %v914_v14 = vrot.slane %v4153_v48, 4  ;;  %v996_v58 = vshrl.u32 %v4153_v48, 16 }
  0xd6   : > { %v4158_v52 = vperm.slane %v845_v13, %v3888_v55  ;;  %v858_v9 = vrot.slane %v4161_v56, 4  ;;  %v964_v50 = vshrl.u32 %v4161_v56, 16 }
  0xd7   : > { %v912_v26 = vrot.slane %v4148_v54, 4  ;;  %v980_v23 = vshrl.u32 %v4148_v54, 16  ;;  %v4186_v34 = vsel %vm264_vm0, 0, %v914_v14 }
  0xd8   : > { %v856_v18 = vrot.slane %v4158_v52, 4  ;;  %v4193_v36 = vsel %vm264_vm0, 0, %v858_v9  ;;  %v948_v11 = vshrl.u32 %v4158_v52, 16  ;;  %v1004_v0 = vshrl.u32 %v4186_v34, 16 }
  0xd9   : > { %v4178_v57 = vsel %vm264_vm0, 0, %v912_v26  ;;  %v972_v13 = vshrl.u32 %v4193_v36, 16 }
  0xda   : > { %v988_v32 = vshrl.u32 %v4178_v57, 16 }
  0xdb   : > { %2960 = vmatmul.msk.bf16.vlgmr.msrb.gmra.mxu0 %vm1171_vm1, %v422_v37 }
  0xde   : > { %2961 = vmatmul.msk.bf16.vlgmr.msrb.gmra.mxu1 %vm1171_vm1, %v425_v30 }
  0xdf   : > { %2962 = vmatmul.msk.bf16.vlgmr.msrb.gmra.mxu2 %vm1171_vm1, %v428_v35  ;;  %v4190_v35 = vsel %vm264_vm0, 0, %v856_v18 }
  0xe0   : > { %v956_v6 = vshrl.u32 %v4190_v35, 16 }
  0xe1   : > { %2963 = vmatmul.msk.bf16.vlgmr.msrb.gmra.mxu3 %vm1171_vm1, %v431_v7 }
 0x128   : > { %v807_v3 = vpop.permute.xlu2 %806 }
 0x129   : > { %v810_v19 = vrot.slane %v807_v3, 4 }
 0x137   : > { %v821_v62 = vpop.permute.xlu0 %820 }
 0x138   : > { %v860_v27 = vrot.slane %v821_v62, 4  ;;  %v867_v30 = vsel %vm264_vm0, %v821_v62, %v810_v19 }
 0x139   : > { %v871_v24 = vperm.slane %v867_v30, %v3860_v10 }
 0x13a   : > { %v861_v20 = vsel %vm264_vm0, %v860_v27, %v807_v3 }
 0x13b   : > { %v823_v15 = vpop.permute.xlu1 %822  ;;  %v865_v29 = vperm.slane %v861_v20, %v3860_v10  ;;  %v872_v38 = vrot.slane %v871_v24, 4 }
 0x13c   : > { %v916_v28 = vrot.slane %v823_v15, 4 }
 0x13d   : > { %v874_v60 = vrot.slane %v865_v29, 4  ;;  %v873_v21 = vsel %vm264_vm0, %v872_v38, %v865_v29 }
 0x13f   : > { %v809_v31 = vpop.permute.xlu0 %808  ;;  %v875_v43 = vsel %vm264_vm0, %v871_v24, %v874_v60 }
 0x140   : > { %v811_v41 = vrot.slane %v809_v31, 4  ;;  %v917_v7 = vsel %vm264_vm0, %v916_v28, %v809_v31  ;;  %v883_v49 = vperm.slane %v875_v43, %v3888_v55 }
 0x141   : > { %v921_v40 = vperm.slane %v917_v7, %v3860_v10 }
 0x142   : > { %v923_v1 = vsel %vm264_vm0, %v823_v15, %v811_v41  ;;  %v965_v62 = vshrl.u32 %v883_v49, 16 }
 0x143   : > { %v927_v53 = vperm.slane %v923_v1, %v3860_v10  ;;  %v930_v12 = vrot.slane %v921_v40, 4 }
 0x144   : > { %v966_v18 = vpack.i.b16 %v965_v62, %v964_v50 }
 0x145   : > { %v928_v27 = vrot.slane %v927_v53, 4  ;;  %v931_v3 = vsel %vm264_vm0, %v927_v53, %v930_v12 }
 0x146   : > { %v939_v15 = vperm.slane %v931_v3, %v3888_v55 }
 0x148   : > { %v1187_v42 = vpop.f32.mrf.mxu0  ;;  %v942_v20 = vrot.slane %v939_v15, 4  ;;  %v997_v28 = vshrl.u32 %v939_v15, 16 }
 0x149   : > { %v4155_v51 = vmul.f32 0.125, %v1187_v42 }
 0x14a   : > { %v943_v50 = vsel %vm264_vm0, 0, %v942_v20  ;;  %v998_v38 = vpack.i.b16 %v997_v28, %v996_v58 }
 0x14b   : > { %v1209_v61 = vpop.f32.mrf.mxu1  ;;  %v1354_v37 = vsel %vm1353_vm2, %v4155_v51, -inf  ;;  %v1002_v43 = vpack.i.b16 %v943_v50, %v4186_v34 }
 0x14c   : > { %v4145_v47 = vmul.f32 0.125, %v1209_v61  ;;  %v4217_v61 = vperm.slane %v873_v21, %v3888_v55  ;;  %v1092_v12 = vrot.slane %v998_v38, 4 }
 0x14d   : > { %v1070_v53 = vrot.slane %v1002_v43, 4 }
 0x14e   : > { %v1357_v59 = vsel %vm1353_vm2, %v4145_v47, -inf  ;;  %v884_v26 = vrot.slane %v4217_v61, 4  ;;  %v946_v14 = vpack.i.b16 %v4217_v61, %v4158_v52 }
 0x14f   : > { %1358 = vmax.xlane.f32.xlu0 %v1357_v59  ;;  %v886_v59 = vrot.slane %v883_v49, 4 }
 0x150   : > { %v1189_v16 = vpop.f32.mrf.mxu0  ;;  %v885_v30 = vsel %vm264_vm0, 0, %v884_v26 }
 0x152   : > { %v1231_v4 = vpop.f32.mrf.mxu2 }
 0x153   : > { %v4164_v5 = vmul.f32 0.125, %v1231_v4  ;;  %v1211_v2 = vpop.f32.mrf.mxu1  ;;  %v962_v4 = vpack.i.b16 %v883_v49, %v4161_v56 }
 0x154   : > { %v1253_v17 = vpop.f32.mrf.mxu3  ;;  %v887_v2 = vsel %vm264_vm0, 0, %v886_v59 }
 0x155   : > { %v4172_v22 = vmul.f32 0.125, %v1253_v17  ;;  %v1360_v25 = vsel %vm1353_vm2, %v4164_v5, -inf  ;;  %v949_v17 = vshrl.u32 %v4217_v61, 16  ;;  %v970_v9 = vpack.i.b16 %v887_v2, %v4193_v36 }
 0x156   : > { %1361 = vmax.xlane.f32.xlu2 %v1360_v25  ;;  %v994_v25 = vpack.i.b16 %v939_v15, %v4153_v48  ;;  %v973_v24 = vshrl.u32 %v887_v2, 16  ;;  %v1008_v52 = vrot.slane %v962_v4, 4 }
 0x157   : > { %v1363_v33 = vsel %vm1353_vm2, %v4172_v22, -inf }
 0x158   : > { %1364 = vmax.xlane.f32.xlu1 %v1363_v33  ;;  %v1275_v39 = vpop.f32.mrf.mxu0  ;;  %v950_v33 = vpack.i.b16 %v949_v17, %v948_v11  ;;  %v1009_v26 = vsel %vm264_vm0, %v1008_v52, %v946_v14 }
 0x159   : > { %v4199_v8 = vmul.f32 0.125, %v1275_v39  ;;  %v1013_v2 = vperm.slane %v1009_v26, %v3860_v10 }
 0x15a   : > { %v1233_v44 = vpop.f32.mrf.mxu2 }
 0x15b   : > { %v1297_v63 = vpop.f32.mrf.mxu1  ;;  %v4214_v42 = vsel %vm1353_vm2, %v4199_v8, -inf  ;;  %v1005_v44 = vshrl.u32 %v943_v50, 16 }
 0x15c   : > { %v4208_v45 = vmul.f32 0.125, %v1297_v63  ;;  %v1255_v46 = vpop.f32.mrf.mxu3  ;;  %v1064_v63 = vrot.slane %v994_v25, 4 }
 0x15d   : > { %v1006_v48 = vpack.i.b16 %v1005_v44, %v1004_v0 }
 0x15e   : > { %1355 = vmax.xlane.f32.xlu2 %v1354_v37  ;;  %v1369_v16 = vsel %vm1353_vm2, %v4208_v45, -inf  ;;  %v929_v37 = vsel %vm264_vm0, %v928_v27, %v921_v40  ;;  %v974_v27 = vpack.i.b16 %v973_v24, %v972_v13 }
 0x15f   : > { %1370 = vmax.xlane.f32.xlu0 %v1369_v16  ;;  %v935_v56 = vperm.slane %v929_v37, %v3888_v55  ;;  %v1098_v62 = vrot.slane %v1006_v48, 4  ;;  %v957_v16 = vshrl.u32 %v885_v30, 16  ;;  %v1036_v37 = vrot.slane %v966_v18, 4 }
 0x160   : > { %v1277_v19 = vpop.f32.mrf.mxu0  ;;  %v1042_v17 = vrot.slane %v974_v27, 4 }
 0x161   : > { %v940_v39 = vrot.slane %v935_v56, 4  ;;  %v978_v36 = vpack.i.b16 %v935_v56, %v4148_v54  ;;  %v981_v7 = vshrl.u32 %v935_v56, 16  ;;  %v954_v54 = vpack.i.b16 %v885_v30, %v4190_v35 }
 0x162   : > { %v1319_v29 = vpop.f32.mrf.mxu2  ;;  %v1037_v14 = vsel %vm264_vm0, %v1036_v37, %v950_v33  ;;  %v1022_v35 = vrot.slane %v1013_v2, 4 }
 0x163   : > { %v4234_v60 = vmul.f32 0.125, %v1319_v29  ;;  %v1299_v31 = vpop.f32.mrf.mxu1  ;;  %v941_v49 = vsel %vm264_vm0, 0, %v940_v39  ;;  %v982_v1 = vpack.i.b16 %v981_v7, %v980_v23  ;;  %v1065_v34 = vsel %vm264_vm0, %v1064_v63, %v978_v36 }
 0x164   : > { %v1341_v41 = vpop.f32.mrf.mxu3  ;;  %v986_v21 = vpack.i.b16 %v941_v49, %v4178_v57  ;;  %v989_v46 = vshrl.u32 %v941_v49, 16  ;;  %v1069_v59 = vperm.slane %v1065_v34, %v3860_v10  ;;  %v1014_v57 = vrot.slane %v970_v9, 4 }
 0x165   : > { %v4241_v40 = vmul.f32 0.125, %v1341_v41  ;;  %v1372_v11 = vsel %vm1353_vm2, %v4234_v60, -inf  ;;  %v1093_v0 = vsel %vm264_vm0, %v1092_v12, %v982_v1 }
 0x166   : > { %1373 = vmax.xlane.f32.xlu2 %v1372_v11  ;;  %v990_v61 = vpack.i.b16 %v989_v46, %v988_v32  ;;  %v1071_v23 = vsel %vm264_vm0, %v1070_v53, %v986_v21  ;;  %v958_v32 = vpack.i.b16 %v957_v16, %v956_v6  ;;  %v1015_v56 = vsel %vm264_vm0, %v1014_v57, %v954_v54 }
 0x167   : > { %v1375_v58 = vsel %vm1353_vm2, %v4241_v40, -inf  ;;  %v1075_v4 = vperm.slane %v1071_v23, %v3860_v10  ;;  %v1097_v13 = vperm.slane %v1093_v0, %v3860_v10  ;;  %v1019_v28 = vperm.slane %v1015_v56, %v3860_v10 }
 0x168   : > { %1376 = vmax.xlane.f32.xlu1 %v1375_v58  ;;  %v1099_v15 = vsel %vm264_vm0, %v1098_v62, %v990_v61  ;;  %v1043_v9 = vsel %vm264_vm0, %v1042_v17, %v958_v32  ;;  %v1041_v6 = vperm.slane %v1037_v14, %v3860_v10  ;;  %v1078_v39 = vrot.slane %v1069_v59, 4 }
 0x169   : > { %v1076_v20 = vrot.slane %v1075_v4, 4  ;;  %v1103_v25 = vperm.slane %v1099_v15, %v3860_v10  ;;  %v1047_v18 = vperm.slane %v1043_v9, %v3860_v10  ;;  %v1020_v24 = vrot.slane %v1019_v28, 4 }
 0x16a   : > { %v1321_v3 = vpop.f32.mrf.mxu2  ;;  %v1023_v31 = vsel %vm264_vm0, %v1019_v28, %v1022_v35  ;;  %v1050_v41 = vrot.slane %v1041_v6, 4  ;;  %v1079_v44 = vsel %vm264_vm0, %v1075_v4, %v1078_v39  ;;  %v1106_v34 = vrot.slane %v1097_v13, 4 }
 0x16b   : > { %v1077_v29 = vsel %vm264_vm0, %v1076_v20, %v1069_v59  ;;  %v1104_v30 = vrot.slane %v1103_v25, 4  ;;  %v1048_v50 = vrot.slane %v1047_v18, 4  ;;  %v4278_v36 = vperm.slane %v1023_v31, %v3888_v55 }
 0x16c   : > { %v1343_v19 = vpop.f32.mrf.mxu3  ;;  %v1083_v52 = vperm.slane %v1077_v29, %v3888_v55  ;;  %v1021_v7 = vsel %vm264_vm0, %v1020_v24, %v1013_v2  ;;  %v4287_v63 = vperm.slane %v1079_v44, %v3888_v55  ;;  %v1107_v23 = vsel %vm264_vm0, %v1103_v25, %v1106_v34 }
 0x16d   : > { %v1105_v33 = vsel %vm264_vm0, %v1104_v30, %v1097_v13  ;;  %v1027_v11 = vperm.slane %v1021_v7, %v3888_v55  ;;  %v1049_v49 = vsel %vm264_vm0, %v1048_v50, %v1041_v6  ;;  %v1115_v26 = vperm.slane %v1107_v23, %v3888_v55 }
 0x16e   : > { %v1111_v38 = vperm.slane %v1105_v33, %v3888_v55  ;;  %v1147_v43 = vshrl.u32 %v1083_v52, 16  ;;  %v1055_v1 = vperm.slane %v1049_v49, %v3888_v55  ;;  %v1088_v12 = vrot.slane %v1083_v52, 4 }
 0x16f   : > { %v1123_v58 = vshrl.u32 %v1027_v11, 16  ;;  %v1032_v53 = vrot.slane %v1027_v11, 4  ;;  %v1158_v56 = vpack.i.b16 %v1115_v26, %v4287_v63  ;;  %v1135_v25 = vshrl.u32 %v4278_v36, 16 }
 0x170   : > { %1367 = vmax.xlane.f32.xlu1 %v4214_v42  ;;  %v1051_v42 = vsel %vm264_vm0, %v1047_v18, %v1050_v41  ;;  %v1146_v21 = vpack.i.b16 %v1111_v38, %v1083_v52  ;;  %v1148_v46 = vshrl.u32 %v1111_v38, 16  ;;  %v1122_v61 = vpack.i.b16 %v1055_v1, %v1027_v11 }
 0x171   : > { %v1059_v48 = vperm.slane %v1051_v42, %v3888_v55  ;;  %v1124_v62 = vshrl.u32 %v1055_v1, 16  ;;  %v1033_v16 = vsel %vm264_vm0, 0, %v1032_v53  ;;  %v1060_v27 = vrot.slane %v1055_v1, 4 }
 0x172   : > { %v1443_v59 = vunpack.c.l.b16 %v1146_v21  ;;  %v1149_v54 = vpack.i.b16 %v1148_v46, %v1147_v43  ;;  %v1442_v3 = vunpack.c.l.b16 %v1122_v61  ;;  %v1089_v2 = vsel %vm264_vm0, 0, %v1088_v12 }
 0x173   : > { %v1134_v0 = vpack.i.b16 %v1059_v48, %v4278_v36  ;;  %v1125_v4 = vpack.i.b16 %v1124_v62, %v1123_v58  ;;  %v1061_v32 = vsel %vm264_vm0, 0, %v1060_v27  ;;  %v1116_v37 = vrot.slane %v1111_v38, 4 }
 0x174   : > { %v1463_v15 = vunpack.c.l.b16 %v1149_v54  ;;  %v1444_v17 = vpack.c.b16 %v1443_v59, %v1442_v3  ;;  %v1128_v20 = vpack.i.b16 %v1061_v32, %v1033_v16  ;;  %v1136_v28 = vshrl.u32 %v1059_v48, 16 }
 0x175   : > { %v1522_v57 = vunpack.c.l.b16 %v1134_v0  ;;  %v1462_v19 = vunpack.c.l.b16 %v1125_v4  ;;  %v1117_v13 = vsel %vm264_vm0, 0, %v1116_v37  ;;  %v1159_v14 = vshrl.u32 %v4287_v63, 16 }
 0x176   : > { %1456 = vmatpush.bf16.msra.mxu0 %v1444_v17  ;;  %v1523_v35 = vunpack.c.l.b16 %v1158_v56  ;;  %v1152_v6 = vpack.i.b16 %v1117_v13, %v1089_v2  ;;  %v1482_v18 = vunpack.c.l.b16 %v1128_v20  ;;  %v1137_v29 = vpack.i.b16 %v1136_v28, %v1135_v25 }
 0x177   : > { %v1464_v9 = vpack.c.b16 %v1463_v15, %v1462_v19  ;;  %v1160_v30 = vshrl.u32 %v1115_v26, 16  ;;  %v1129_v24 = vshrl.u32 %v1033_v16, 16  ;;  %v1130_v52 = vshrl.u32 %v1061_v32, 16 }
 0x178   : > { %v1524_v31 = vpack.c.b16 %v1523_v35, %v1522_v57  ;;  %v1483_v39 = vunpack.c.l.b16 %v1152_v6  ;;  %v1153_v50 = vshrl.u32 %v1089_v2, 16  ;;  %v1154_v33 = vshrl.u32 %v1117_v13, 16 }
 0x179   : > { %1476 = vmatpush.bf16.msra.mxu1 %v1464_v9  ;;  %v1161_v41 = vpack.i.b16 %v1160_v30, %v1159_v14  ;;  %v1542_v7 = vunpack.c.l.b16 %v1137_v29  ;;  %v1131_v38 = vpack.i.b16 %v1130_v52, %v1129_v24  ;;  %v1034_v43 = vrot.slane %v4278_v36, 4 }
 0x17a   : > { %1536 = vmatpush.bf16.msrb.mxu0 %v1524_v31  ;;  %v1484_v44 = vpack.c.b16 %v1483_v39, %v1482_v18  ;;  %v1155_v11 = vpack.i.b16 %v1154_v33, %v1153_v50  ;;  %v1062_v49 = vrot.slane %v1059_v48, 4  ;;  %v1090_v42 = vrot.slane %v4287_v63, 4 }
 0x17b   : > { %v1543_v1 = vunpack.c.l.b16 %v1161_v41  ;;  %v1502_v21 = vunpack.c.l.b16 %v1131_v38  ;;  %v1035_v46 = vsel %vm264_vm0, 0, %v1034_v43  ;;  %v1118_v58 = vrot.slane %v1115_v26, 4 }
 0x17c   : > { %1496 = vmatpush.bf16.msra.mxu2 %v1484_v44  ;;  %v1503_v34 = vunpack.c.l.b16 %v1155_v11  ;;  %v1063_v53 = vsel %vm264_vm0, 0, %v1062_v49  ;;  %v1091_v12 = vsel %vm264_vm0, 0, %v1090_v42  ;;  %v1141_v61 = vshrl.u32 %v1035_v46, 16 }
 0x17d   : > { %v1544_v59 = vpack.c.b16 %v1543_v1, %v1542_v7  ;;  %v1119_v36 = vsel %vm264_vm0, 0, %v1118_v58  ;;  %v1140_v62 = vpack.i.b16 %v1063_v53, %v1035_v46  ;;  %v1142_v54 = vshrl.u32 %v1063_v53, 16 }
 0x17e   : > { %v1504_v48 = vpack.c.b16 %v1503_v34, %v1502_v21  ;;  %v1164_v23 = vpack.i.b16 %v1119_v36, %v1091_v12  ;;  %v1165_v63 = vshrl.u32 %v1091_v12, 16  ;;  %v1166_v0 = vshrl.u32 %v1119_v36, 16 }
 0x17f   : > { %1556 = vmatpush.bf16.msrb.mxu1 %v1544_v59  ;;  %v1562_v16 = vunpack.c.l.b16 %v1140_v62  ;;  %v1143_v27 = vpack.i.b16 %v1142_v54, %v1141_v61 }
 0x180   : > { %1516 = vmatpush.bf16.msra.mxu3 %v1504_v48  ;;  %v1563_v3 = vunpack.c.l.b16 %v1164_v23  ;;  %v1167_v4 = vpack.i.b16 %v1166_v0, %v1165_v63 }
 0x181   : > { %v1582_v15 = vunpack.c.l.b16 %v1143_v27 }
 0x182   : > { %v1564_v26 = vpack.c.b16 %v1563_v3, %v1562_v16  ;;  %v1583_v57 = vunpack.c.l.b16 %v1167_v4 }
 0x184   : > { %1576 = vmatpush.bf16.msrb.mxu2 %v1564_v26  ;;  %v1584_v32 = vpack.c.b16 %v1583_v57, %v1582_v15 }
 0x186   : > { %1596 = vmatpush.bf16.msrb.mxu3 %v1584_v32 }
 0x1c2   : > { %v1359_v2 = vpop.xlane.xlu0 %1358 }
 0x1c3   : > { %v1379_v37 = vsub.f32 %v4145_v47, %v1359_v2 }
 0x1c5   : > { %v1388_v17 = vmul.f32 1.442695, %v1379_v37 }
 0x1c7   : > { %3672 = vpow2.f32 %v1388_v17 }
 0x1c9   : > { %v1362_v19 = vpop.xlane.xlu2 %1361 }
 0x1ca   : > { %v1380_v56 = vsub.f32 %v4164_v5, %v1362_v19 }
 0x1cb   : > { %v1365_v20 = vpop.xlane.xlu1 %1364 }
 0x1cc   : > { %v1390_v13 = vmul.f32 1.442695, %v1380_v56  ;;  %v1381_v25 = vsub.f32 %v4172_v22, %v1365_v20 }
 0x1cd   : > { %v3673_v28 = vpop.eup %3672 }
 0x1ce   : > { %v1435_v14 = vpack.c.bf16 %v3673_v28, %v3673_v28  ;;  %3674 = vpow2.f32 %v1390_v13  ;;  %v1392_v9 = vmul.f32 1.442695, %v1381_v25  ;;  %v1405_v35 = vsel %vm1353_vm2, %v3673_v28, 0.0 }
 0x1cf   : > { %1406 = vadd.xlane.f32.xlu1 %v1405_v35 }
 0x1d0   : > { %3676 = vpow2.f32 %v1392_v9  ;;  %2965 = vmatmul.msk.bf16.vlgmr.msra.gmra.mxu1 %vm1353_vm2, %v1435_v14 }
 0x1d1   : > { %v1356_v47 = vpop.xlane.xlu2 %1355 }
 0x1d2   : > { %v1378_v6 = vsub.f32 %v4155_v51, %v1356_v47  ;;  %v1371_v18 = vpop.xlane.xlu0 %1370 }
 0x1d3   : > { %v1383_v5 = vsub.f32 %v4208_v45, %v1371_v18 }
 0x1d4   : > { %v3675_v29 = vpop.eup %3674  ;;  %v1386_v30 = vmul.f32 1.442695, %v1378_v6 }
 0x1d5   : > { %v1436_v24 = vpack.c.bf16 %v3675_v29, %v3675_v29  ;;  %v1396_v22 = vmul.f32 1.442695, %v1383_v5  ;;  %v1408_v52 = vsel %vm1353_vm2, %v3675_v29, 0.0 }
 0x1d6   : > { %v3677_v31 = vpop.eup %3676  ;;  %3678 = vpow2.f32 %v1386_v30  ;;  %1409 = vadd.xlane.f32.xlu2 %v1408_v52 }
 0x1d7   : > { %v1437_v39 = vpack.c.bf16 %v3677_v31, %v3677_v31  ;;  %3680 = vpow2.f32 %v1396_v22  ;;  %2966 = vmatmul.msk.bf16.vlgmr.msra.gmra.mxu2 %vm1353_vm2, %v1436_v24  ;;  %v1411_v44 = vsel %vm1353_vm2, %v3677_v31, 0.0 }
 0x1d9   : > { %2967 = vmatmul.msk.bf16.vlgmr.msra.gmra.mxu3 %vm1353_vm2, %v1437_v39  ;;  %v1374_v50 = vpop.xlane.xlu2 %1373 }
 0x1da   : > { %v1384_v51 = vsub.f32 %v4234_v60, %v1374_v50 }
 0x1db   : > { %v1377_v33 = vpop.xlane.xlu1 %1376 }
 0x1dc   : > { %v3679_v45 = vpop.eup %3678  ;;  %v1398_v41 = vmul.f32 1.442695, %v1384_v51  ;;  %v1385_v7 = vsub.f32 %v4241_v40, %v1377_v33 }
 0x1dd   : > { %v3681_v38 = vpop.eup %3680  ;;  %v1434_v43 = vpack.c.bf16 %v3679_v45, %v3679_v45  ;;  %v1402_v46 = vsel %vm1353_vm2, %v3679_v45, 0.0 }
 0x1de   : > { %v1439_v11 = vpack.c.bf16 %v3681_v38, %v3681_v38  ;;  %3682 = vpow2.f32 %v1398_v41  ;;  %v1400_v49 = vmul.f32 1.442695, %v1385_v7  ;;  %1412 = vadd.xlane.f32.xlu2 %v1411_v44  ;;  %v1417_v42 = vsel %vm1353_vm2, %v3681_v38, 0.0 }
 0x1df   : > { %1418 = vadd.xlane.f32.xlu0 %v1417_v42  ;;  %2964 = vmatmul.msk.bf16.vlgmr.msra.gmra.mxu0 %vm1353_vm2, %v1434_v43 }
 0x1e0   : > { %3684 = vpow2.f32 %v1400_v49  ;;  %2969 = vmatmul.msk.bf16.vlgmr.msrb.gmra.mxu1 %vm1353_vm2, %v1439_v11 }
 0x1e3   : > { %v1368_v60 = vpop.xlane.xlu1 %1367 }
 0x1e4   : > { %v3683_v1 = vpop.eup %3682  ;;  %v1382_v40 = vsub.f32 %v4199_v8, %v1368_v60 }
 0x1e5   : > { %v1440_v21 = vpack.c.bf16 %v3683_v1, %v3683_v1  ;;  %v1420_v58 = vsel %vm1353_vm2, %v3683_v1, 0.0 }
 0x1e6   : > { %v3685_v34 = vpop.eup %3684  ;;  %v1394_v53 = vmul.f32 1.442695, %v1382_v40  ;;  %1403 = vadd.xlane.f32.xlu2 %v1402_v46  ;;  %1421 = vadd.xlane.f32.xlu1 %v1420_v58 }
 0x1e7   : > { %v1441_v12 = vpack.c.bf16 %v3685_v34, %v3685_v34  ;;  %2970 = vmatmul.msk.bf16.vlgmr.msrb.gmra.mxu2 %vm1353_vm2, %v1440_v21  ;;  %v1423_v61 = vsel %vm1353_vm2, %v3685_v34, 0.0 }
 0x1e8   : > { %3686 = vpow2.f32 %v1394_v53  ;;  %1424 = vadd.xlane.f32.xlu0 %v1423_v61 }
 0x1e9   : > { %2971 = vmatmul.msk.bf16.vlgmr.msrb.gmra.mxu3 %vm1353_vm2, %v1441_v12 }
 0x1ee   : > { %v3687_v59 = vpop.eup %3686 }
 0x1ef   : > { %v1438_v8 = vpack.c.bf16 %v3687_v59, %v3687_v59  ;;  %v1414_v36 = vsel %vm1353_vm2, %v3687_v59, 0.0 }
 0x1f0   : > { %1415 = vadd.xlane.f32.xlu0 %v1414_v36 }
 0x1f1   : > { %2968 = vmatmul.msk.bf16.vlgmr.msrb.gmra.mxu0 %vm1353_vm2, %v1438_v8 }
 0x242   : > { %v1407_v48 = vpop.xlane.xlu1 %1406 }
 0x243   : > { %3688 = vrcp.f32 %v1407_v48 }
 0x249   : > { %v1410_v62 = vpop.xlane.xlu2 %1409  ;;  %v3689_v16 = vpop.eup %3688 }
 0x24d   : > { %v1478_v54 = vpop.f32.mrf.mxu1 }
 0x24e   : > { %v1603_v3 = vmul.f32 %v3689_v16, %v1478_v54 }
 0x250   : > { %v1625_v19 = vrot.slane %v1603_v3, 4 }
 0x251   : > { %v1413_v23 = vpop.xlane.xlu2 %1412 }
 0x252   : > { %v1419_v63 = vpop.xlane.xlu0 %1418  ;;  %3690 = vrcp.f32 %v1413_v23 }
 0x253   : > { %3692 = vrcp.f32 %v1410_v62 }
 0x255   : > { %v1480_v0 = vpop.f32.mrf.mxu1 }
 0x258   : > { %v3691_v26 = vpop.eup %3690 }
 0x259   : > { %v1404_v27 = vpop.xlane.xlu2 %1403  ;;  %v3693_v2 = vpop.eup %3692 }
 0x25a   : > { %v1498_v4 = vpop.f32.mrf.mxu2  ;;  %3694 = vrcp.f32 %v1404_v27  ;;  %v1422_v28 = vpop.xlane.xlu1 %1421  ;;  %v3086_v27 = vld [vmem:[%s5337_s2 + $0xe0] sm:$0xf] }
 0x25b   : > { %v1425_v15 = vpop.xlane.xlu0 %1424  ;;  %v1604_v56 = vmul.f32 %v3693_v2, %v1498_v4  ;;  %3696 = vrcp.f32 %v1419_v63 }
 0x25c   : > { %v1458_v57 = vpop.f32.mrf.mxu0  ;;  %v1518_v32 = vpop.f32.mrf.mxu3  ;;  %3698 = vrcp.f32 %v1422_v28 }
 0x25d   : > { %v1605_v37 = vmul.f32 %v3691_v26, %v1518_v32  ;;  %v1558_v17 = vpop.f32.mrf.mxu1  ;;  %v1610_v9 = vrot.slane %v1604_v56, 4  ;;  %3700 = vrcp.f32 %v1425_v15  ;;  %v3214_v26 = vld [vmem:[%s5337_s2 + $0x1e0] sm:$0xf] }
 0x25e   : > { %v3070_v32 = vld [vmem:[%s5337_s2 + $0xc0] sm:$0xf] }
 0x25f   : > { %v1623_v20 = vrot.slane %v1605_v37, 4  ;;  %v1626_v13 = vsel %vm264_vm0, %v1605_v37, %v1625_v19 }
 0x260   : > { %v3695_v25 = vpop.eup %3694  ;;  %v1634_v18 = vperm.slane %v1626_v13, %v3860_v10 }
 0x261   : > { %v1624_v14 = vsel %vm264_vm0, %v1623_v20, %v1603_v3  ;;  %v1602_v35 = vmul.f32 %v3695_v25, %v1458_v57  ;;  %v3697_v7 = vpop.eup %3696  ;;  %v3521_v3 = vld [vmem:[%s5337_s2 + $0xec] sm:$0xf0]  ;;  %v3198_v20 = vld [vmem:[%s5337_s2 + $0x1c0] sm:$0xf] }
 0x262   : > { %v1630_v47 = vperm.slane %v1624_v14, %v3860_v10  ;;  %v1500_v6 = vpop.f32.mrf.mxu2  ;;  %v1671_v41 = vrot.slane %v1634_v18, 4  ;;  %v1607_v11 = vmul.f32 %v3697_v7, %v1558_v17  ;;  %v3699_v49 = vpop.eup %3698  ;;  %v3087_v15 = vor.u32 %v3521_v3, %v3086_v27  ;;  %v3553_v57 = vld [vmem:[%s5337_s2 + $0x1ec] sm:$0xf0] }
 0x263   : > { %v1612_v5 = vsel %vm264_vm0, %v1610_v9, %v1602_v35  ;;  %v1613_v29 = vrot.slane %v1602_v35, 4  ;;  %v1416_v31 = vpop.xlane.xlu0 %1415  ;;  %v3701_v58 = vpop.eup %3700  ;;  %v3215_v19 = vor.u32 %v3553_v57, %v3214_v26  ;;  %v3549_v35 = vld [vmem:[%s5337_s2 + $0x1cc] sm:$0xf0] }
 0x264   : > { %v1659_v30 = vrot.slane %v1630_v47, 4  ;;  %v1460_v24 = vpop.f32.mrf.mxu0  ;;  %v1520_v22 = vpop.f32.mrf.mxu3  ;;  %v1618_v52 = vperm.slane %v1612_v5, %v3860_v10  ;;  %3702 = vrcp.f32 %v1416_v31  ;;  %v1649_v12 = vrot.slane %v1607_v11, 4  ;;  %2637 = vmatpush.bf16.msra.mxu0 %v3087_v15  ;;  %v3513_v5 = vld [vmem:[%s5337_s2 + $0xac] sm:$0xf0] }
 0x265   : > { %v1560_v39 = vpop.f32.mrf.mxu1  ;;  %v1614_v50 = vsel %vm264_vm0, %v1604_v56, %v1613_v29  ;;  %v3517_v56 = vld [vmem:[%s5337_s2 + $0xcc] sm:$0xf0]  ;;  %2650 = vmatpush.bf16.msra.mxu1 %v3215_v19  ;;  %v3182_v29 = vld [vmem:[%s5337_s2 + $0x1a0] sm:$0xf] }
 0x266   : > { %v1622_v51 = vperm.slane %v1614_v50, %v3860_v10  ;;  %v1661_v33 = vrot.slane %v1618_v52, 4  ;;  %v1660_v45 = vsel %vm264_vm0, %v1659_v30, %v1618_v52  ;;  %v3071_v9 = vor.u32 %v3517_v56, %v3070_v32  ;;  %v3545_v30 = vld [vmem:[%s5337_s2 + $0x1ac] sm:$0xf0]  ;;  %v3038_v39 = vld [vmem:[%s5337_s2 + $0x80] sm:$0xf] }
 0x267   : > { %v4343_v42 = vperm.slane %v1660_v45, %v3888_v55  ;;  %v3509_v50 = vld [vmem:[%s5337_s2 + $0x8c] sm:$0xf0] }
 0x268   : > { %v1673_v38 = vrot.slane %v1622_v51, 4  ;;  %v1662_v43 = vsel %vm264_vm0, %v1630_v47, %v1661_v33  ;;  %v1672_v44 = vsel %vm264_vm0, %v1671_v41, %v1622_v51  ;;  %v3054_v47 = vld [vmem:[%s5337_s2 + $0xa0] sm:$0xf]  ;;  %v3183_v33 = vor.u32 %v3545_v30, %v3182_v29  ;;  %v3541_v7 = vld [vmem:[%s5337_s2 + $0x18c] sm:$0xf0]  ;;  %2638 = vmatpush.bf16.msra.mxu0 %v3071_v9 }
 0x269   : > { %v4346_v60 = vperm.slane %v1662_v43, %v3888_v55  ;;  %v4349_v1 = vperm.slane %v1672_v44, %v3888_v55  ;;  %v1709_v8 = vrot.slane %v4343_v42, 4  ;;  %v3055_v51 = vor.u32 %v3513_v5, %v3054_v47  ;;  %v3166_v41 = vld [vmem:[%s5337_s2 + $0x180] sm:$0xf] }
 0x26a   : > { %v1578_v40 = vpop.f32.mrf.mxu2  ;;  %v1674_v21 = vsel %vm264_vm0, %v1634_v18, %v1673_v38  ;;  %v3703_v59 = vpop.eup %3702  ;;  %v3199_v18 = vor.u32 %v3549_v35, %v3198_v20  ;;  %v3039_v45 = vor.u32 %v3509_v50, %v3038_v39  ;;  %v4418_v38 = vld [vmem:[%s5337_s2 + $0x60] sm:$0xf] }
 0x26b   : > { %v1608_v46 = vmul.f32 %v3699_v49, %v1578_v40  ;;  %v4353_v34 = vperm.slane %v1674_v21, %v3888_v55  ;;  %v1713_v36 = vrot.slane %v4346_v60, 4  ;;  %v1717_v62 = vrot.slane %v4349_v1, 4  ;;  %v3505_v21 = vld [vmem:[%s5337_s2 + $0x6c] sm:$0xf0] }
 0x26c   : > { %v1598_v53 = vpop.f32.mrf.mxu3  ;;  %2651 = vmatpush.bf16.msra.mxu1 %v3199_v18  ;;  %2639 = vmatpush.bf16.msra.mxu0 %v3055_v51 }
 0x26d   : > { %v1609_v61 = vmul.f32 %v3701_v58, %v1598_v53  ;;  %v1635_v54 = vrot.slane %v1608_v46, 4  ;;  %v1721_v23 = vrot.slane %v4353_v34, 4 }
 0x26e   : > { %v1538_v48 = vpop.f32.mrf.mxu0 }
 0x26f   : > { %v1647_v63 = vrot.slane %v1609_v61, 4  ;;  %v1650_v0 = vsel %vm264_vm0, %v1609_v61, %v1649_v12  ;;  %v1606_v16 = vmul.f32 %v3703_v59, %v1538_v48  ;;  %v3167_v61 = vor.u32 %v3541_v7, %v3166_v41  ;;  %v3537_v59 = vld [vmem:[%s5337_s2 + $0x16c] sm:$0xf0] }
 0x270   : > { %v1658_v4 = vperm.slane %v1650_v0, %v3860_v10  ;;  %v4443_v48 = vld [vmem:[%s5337_s2 + $0x4c] sm:$0xf0]  ;;  %v3023_v0 = vor.u32 %v3505_v21, %v4418_v38  ;;  %2652 = vmatpush.bf16.msra.mxu1 %v3183_v33  ;;  %2640 = vmatpush.bf16.msra.mxu0 %v3039_v45 }
 0x271   : > { %v1648_v2 = vsel %vm264_vm0, %v1647_v63, %v1607_v11  ;;  %v1636_v37 = vsel %vm264_vm0, %v1635_v54, %v1606_v16  ;;  %v1637_v17 = vrot.slane %v1606_v16, 4  ;;  %v4438_v54 = vld [vmem:[%s5337_s2 + $0x40] sm:$0xf] }
 0x272   : > { %v1654_v13 = vperm.slane %v1648_v2, %v3860_v10  ;;  %v1695_v25 = vrot.slane %v1658_v4, 4  ;;  %v1642_v28 = vperm.slane %v1636_v37, %v3860_v10  ;;  %v1580_v14 = vpop.f32.mrf.mxu2  ;;  %v3007_v27 = vor.u32 %v4443_v48, %v4438_v54  ;;  %v3342_v54 = vld [vmem:[%s5337_s2 + $0x2e0] sm:$0xf] }
 0x273   : > { %v1638_v6 = vsel %vm264_vm0, %v1608_v46, %v1637_v17  ;;  %v3150_v46 = vld [vmem:[%s5337_s2 + $0x160] sm:$0xf] }
 0x274   : > { %v1683_v24 = vrot.slane %v1654_v13, 4  ;;  %v1646_v22 = vperm.slane %v1638_v6, %v3860_v10  ;;  %v1685_v52 = vrot.slane %v1642_v28, 4  ;;  %v1600_v31 = vpop.f32.mrf.mxu3  ;;  %v3151_v16 = vor.u32 %v3537_v59, %v3150_v46  ;;  %2653 = vmatpush.bf16.msra.mxu1 %v3167_v61  ;;  %2641 = vmatpush.bf16.msra.mxu0 %v3023_v0 }
 0x276   : > { %v1684_v43 = vsel %vm264_vm0, %v1683_v24, %v1642_v28  ;;  %v1686_v44 = vsel %vm264_vm0, %v1654_v13, %v1685_v52  ;;  %v1696_v11 = vsel %vm264_vm0, %v1695_v25, %v1646_v22  ;;  %v1697_v49 = vrot.slane %v1646_v22, 4  ;;  %v1540_v40 = vpop.f32.mrf.mxu0 }
 0x277   : > { %v1690_v58 = vperm.slane %v1684_v43, %v3888_v55  ;;  %v1694_v53 = vperm.slane %v1686_v44, %v3888_v55  ;;  %v1702_v12 = vperm.slane %v1696_v11, %v3888_v55  ;;  %v3134_v40 = vld [vmem:[%s5337_s2 + $0x140] sm:$0xf] }
 0x278   : > { %v1698_v63 = vsel %vm264_vm0, %v1658_v4, %v1697_v49  ;;  %2654 = vmatpush.bf16.msra.mxu1 %v3151_v16  ;;  %2642 = vmatpush.bf16.msra.mxu0 %v3007_v27  ;;  %v3497_v16 = vld [vmem:[%s5337_s2 + $0x2c] sm:$0xf0] }
 0x279   : > { %v1706_v3 = vperm.slane %v1698_v63, %v3888_v55  ;;  %v1707_v15 = vrot.slane %v1690_v58, 4  ;;  %v1710_v26 = vsel %vm264_vm0, %v1690_v58, %v1709_v8  ;;  %v1711_v57 = vrot.slane %v1694_v53, 4 }
 0x27a   : > { %v1714_v32 = vsel %vm264_vm0, %v1694_v53, %v1713_v36  ;;  %v1715_v2 = vrot.slane %v1702_v12, 4  ;;  %v1718_v4 = vsel %vm264_vm0, %v1702_v12, %v1717_v62  ;;  %v1737_v37 = vrot.slane %v1710_v26, 4  ;;  %v3533_v53 = vld [vmem:[%s5337_s2 + $0x14c] sm:$0xf0]  ;;  %v2990_v12 = vld [vmem:[%s5337_s2 + $0x20] sm:$0xf] }
 0x27b   : > { %v1708_v17 = vsel %vm264_vm0, %v1707_v15, %v4343_v42  ;;  %v1712_v19 = vsel %vm264_vm0, %v1711_v57, %v4346_v60  ;;  %v1719_v56 = vrot.slane %v1706_v3, 4  ;;  %v1735_v8 = vrot.slane %v1714_v32, 4  ;;  %v3529_v57 = vld [vmem:[%s5337_s2 + $0x12c] sm:$0xf0] }
 0x27c   : > { %v1716_v20 = vsel %vm264_vm0, %v1715_v2, %v4349_v1  ;;  %v1723_v36 = vrot.slane %v1712_v19, 4  ;;  %v1725_v13 = vrot.slane %v1708_v17, 4  ;;  %v1761_v25 = vrot.slane %v1718_v4, 4 }
 0x27d   : > { %v1720_v62 = vsel %vm264_vm0, %v1719_v56, %v4353_v34  ;;  %v1722_v28 = vsel %vm264_vm0, %v1706_v3, %v1721_v23  ;;  %v1738_v42 = vsel %vm264_vm0, %v1714_v32, %v1737_v37  ;;  %v1749_v14 = vrot.slane %v1716_v20, 4  ;;  %v3470_v37 = vld [vmem:[%s5337_s2 + $0x3e0] sm:$0xf] }
 0x27e   : > { %v1726_v60 = vsel %vm264_vm0, %v1712_v19, %v1725_v13  ;;  %v1746_v9 = vperm.slane %v1738_v42, %v3860_v10  ;;  %v1747_v35 = vrot.slane %v1720_v62, 4  ;;  %v1759_v47 = vrot.slane %v1722_v28, 4  ;;  %v3493_v13 = vld [vmem:[%s5337_s2 + $0xc] sm:$0xf0] }
 0x27f   : > { %v1734_v1 = vperm.slane %v1726_v60, %v3860_v10  ;;  %v1750_v6 = vsel %vm264_vm0, %v1720_v62, %v1749_v14  ;;  %v1762_v18 = vsel %vm264_vm0, %v1722_v28, %v1761_v25  ;;  %v1724_v34 = vsel %vm264_vm0, %v1723_v36, %v1708_v17  ;;  %v3617_v17 = vld [vmem:[%s5337_s2 + $0x3ec] sm:$0xf0]  ;;  %v2974_v36 = vld [vmem:[%s5337_s2] sm:$0xf] }
 0x280   : > { %v1758_v23 = vperm.slane %v1750_v6, %v3860_v10  ;;  %v1770_v5 = vperm.slane %v1762_v18, %v3860_v10  ;;  %v1783_v29 = vrot.slane %v1746_v9, 4  ;;  %v1730_v30 = vperm.slane %v1724_v34, %v3860_v10  ;;  %v3326_v25 = vld [vmem:[%s5337_s2 + $0x2c0] sm:$0xf]  ;;  %v3581_v60 = vld [vmem:[%s5337_s2 + $0x2cc] sm:$0xf0] }
 0x281   : > { %v1785_v24 = vrot.slane %v1734_v1, 4  ;;  %v1736_v22 = vsel %vm264_vm0, %v1735_v8, %v1710_v26  ;;  %v1748_v52 = vsel %vm264_vm0, %v1747_v35, %v1716_v20  ;;  %v1760_v31 = vsel %vm264_vm0, %v1759_v47, %v1718_v4  ;;  %v3118_v26 = vld [vmem:[%s5337_s2 + $0x120] sm:$0xf]  ;;  %v3585_v4 = vld [vmem:[%s5337_s2 + $0x2ec] sm:$0xf0] }
 0x282   : > { %v1784_v39 = vsel %vm264_vm0, %v1783_v29, %v1734_v1  ;;  %v1807_v50 = vrot.slane %v1770_v5, 4  ;;  %v1809_v51 = vrot.slane %v1758_v23, 4  ;;  %v1742_v33 = vperm.slane %v1736_v22, %v3860_v10  ;;  %v3613_v1 = vld [vmem:[%s5337_s2 + $0x3cc] sm:$0xf0]  ;;  %v3519_v6 = vld [vmem:[%s5337_s2 + $0xe4] sm:$0xf] }
 0x283   : > { %v1786_v45 = vsel %vm264_vm0, %v1746_v9, %v1785_v24  ;;  %v4487_v41 = vperm.slane %v1784_v39, %v3888_v55  ;;  %v1754_v7 = vperm.slane %v1748_v52, %v3860_v10  ;;  %v1766_v38 = vperm.slane %v1760_v31, %v3860_v10  ;;  %v3454_v9 = vld [vmem:[%s5337_s2 + $0x3c0] sm:$0xf]  ;;  %v3088_v18 = vld [vmem:[%s5337_s2 + $0xf0] sm:$0xf0]  ;;  %v3551_v24 = vld [vmem:[%s5337_s2 + $0x1e4] sm:$0xf] }
 0x284   : > { %v4492_v43 = vperm.slane %v1786_v45, %v3888_v55  ;;  %v1808_v44 = vsel %vm264_vm0, %v1807_v50, %v1758_v23  ;;  %v1810_v11 = vsel %vm264_vm0, %v1770_v5, %v1809_v51  ;;  %v1771_v49 = vrot.slane %v1742_v33, 4  ;;  %v3102_v29 = vld [vmem:[%s5337_s2 + $0x100] sm:$0xf]  ;;  %v3216_v31 = vld [vmem:[%s5337_s2 + $0x1f0] sm:$0xf0] }
 0x285   : > { %v4500_v21 = vperm.slane %v1808_v44, %v3888_v55  ;;  %v4503_v46 = vperm.slane %v1810_v11, %v3888_v55  ;;  %v1829_v10 = vrot.slane %v4487_v41, 4  ;;  %v1773_v58 = vrot.slane %v1730_v30, 4  ;;  %v3310_v39 = vld [vmem:[%s5337_s2 + $0x2a0] sm:$0xf]  ;;  %v3577_v50 = vld [vmem:[%s5337_s2 + $0x2ac] sm:$0xf0] }
 0x286   : > { %v1833_v61 = vrot.slane %v4492_v43, 4  ;;  %v1772_v59 = vsel %vm264_vm0, %v1771_v49, %v1730_v30  ;;  %v1795_v63 = vrot.slane %v1766_v38, 4  ;;  %v1797_v0 = vrot.slane %v1754_v7, 4  ;;  %v3525_v30 = vld [vmem:[%s5337_s2 + $0x10c] sm:$0xf0] }
 0x287   : > { %v1830_v3 = vsel %vm264_vm0, %v4500_v21, %v1829_v10  ;;  %v1774_v15 = vsel %vm264_vm0, %v1742_v33, %v1773_v58  ;;  %v4535_v27 = vperm.slane %v1772_v59, %v3888_v55  ;;  %v3135_v20 = vor.u32 %v3533_v53, %v3134_v40  ;;  %v3438_v45 = vld [vmem:[%s5337_s2 + $0x3a0] sm:$0xf]  ;;  %v3072_v11 = vld [vmem:[%s5337_s2 + $0xd0] sm:$0xf0]  ;;  %v3547_v49 = vld [vmem:[%s5337_s2 + $0x1c4] sm:$0xf] }
 0x288   : > { %v1834_v48 = vsel %vm264_vm0, %v4503_v46, %v1833_v61  ;;  %v4538_v32 = vperm.slane %v1774_v15, %v3888_v55  ;;  %v1796_v2 = vsel %vm264_vm0, %v1795_v63, %v1754_v7  ;;  %v1798_v56 = vsel %vm264_vm0, %v1766_v38, %v1797_v0  ;;  %v3609_v7 = vld [vmem:[%s5337_s2 + $0x3ac] sm:$0xf0]  ;;  %v3515_v38 = vld [vmem:[%s5337_s2 + $0xc4] sm:$0xf]  ;;  %v3200_v40 = vld [vmem:[%s5337_s2 + $0x1d0] sm:$0xf0] }
 0x289   : > { %v3662_v19 = vpack.i.bf16 %v1834_v48, %v1830_v3  ;;  %v4552_v8 = vperm.slane %v1796_v2, %v3888_v55  ;;  %v4564_v62 = vperm.slane %v1798_v56, %v3888_v55  ;;  %v1821_v28 = vrot.slane %v4535_v27, 4  ;;  %2655 = vmatpush.bf16.msra.mxu1 %v3135_v20  ;;  %v3573_v61 = vld [vmem:[%s5337_s2 + $0x28c] sm:$0xf0] }
 0x28a   : > { %v1825_v42 = vrot.slane %v4538_v32, 4  ;;  %v2991_v14 = vor.u32 %v3497_v16, %v2990_v12  ;;  %v3119_v35 = vor.u32 %v3529_v57, %v3118_v26  ;;  %v3343_v47 = vor.u32 %v3585_v4, %v3342_v54  ;;  %v3294_v12 = vld [vmem:[%s5337_s2 + $0x280] sm:$0xf]  ;;  %v3605_v3 = vld [vmem:[%s5337_s2 + $0x38c] sm:$0xf0] }
 0x28b   : > { %3663 = vrot.lane.b32.xlu1 %v3662_v19, %s3769_s10  ;;  %v3471_v55 = vor.u32 %v3617_v17, %v3470_v37  ;;  %v1822_v34 = vsel %vm264_vm0, %v4552_v8, %v1821_v28  ;;  %v2975_v5 = vor.u32 %v3493_v13, %v2974_v36  ;;  %v3327_v52 = vor.u32 %v3581_v60, %v3326_v25  ;;  %v3422_v16 = vld [vmem:[%s5337_s2 + $0x380] sm:$0xf]  ;;  %v3056_v26 = vld [vmem:[%s5337_s2 + $0xb0] sm:$0xf0]  ;;  %v3543_v4 = vld [vmem:[%s5337_s2 + $0x1a4] sm:$0xf] }
 0x28c   : > { %v1826_v23 = vsel %vm264_vm0, %v4564_v62, %v1825_v42  ;;  %2643 = vmatpush.bf16.msra.mxu0 %v2991_v14  ;;  %2663 = vmatpush.bf16.msra.mxu2 %v3343_v47  ;;  %v3455_v51 = vor.u32 %v3613_v1, %v3454_v9  ;;  %v3091_v33 = vor.u32 %v3519_v6, %v3088_v18  ;;  %v1827_v10 = vrot.slane %v4500_v21, 4  ;;  %v3184_v37 = vld [vmem:[%s5337_s2 + $0x1b0] sm:$0xf0]  ;;  %v3278_v17 = vld [vmem:[%s5337_s2 + $0x260] sm:$0xf] }
 0x28d   : > { %v3667_v22 = vpack.i.bf16 %v1826_v23, %v1822_v34  ;;  %2676 = vmatpush.bf16.msra.mxu3 %v3471_v55  ;;  %2656 = vmatpush.bf16.msra.mxu1 %v3119_v35  ;;  %v3103_v44 = vor.u32 %v3525_v30, %v3102_v29  ;;  %v1823_v58 = vrot.slane %v4564_v62, 4  ;;  %v3219_v53 = vor.u32 %v3551_v24, %v3216_v31  ;;  %v3569_v20 = vld [vmem:[%s5337_s2 + $0x26c] sm:$0xf0]  ;;  %v3406_v36 = vld [vmem:[%s5337_s2 + $0x360] sm:$0xf] }
 0x28e   : > { %v1831_v59 = vrot.slane %v4503_v46, 4  ;;  %v1819_v63 = vrot.slane %v4552_v8, 4  ;;  %v3311_v0 = vor.u32 %v3577_v50, %v3310_v39  ;;  %v3439_v21 = vor.u32 %v3609_v7, %v3438_v45  ;;  %v3511_v46 = vld [vmem:[%s5337_s2 + $0xa4] sm:$0xf]  ;;  %v3168_v42 = vld [vmem:[%s5337_s2 + $0x190] sm:$0xf0] }
 0x28f   : > { %3668 = vrot.lane.b32.xlu2 %v3667_v22, %s3769_s10  ;;  %v3075_v15 = vor.u32 %v3515_v38, %v3072_v11  ;;  %v3203_v57 = vor.u32 %v3547_v49, %v3200_v40  ;;  %v3295_v54 = vor.u32 %v3573_v61, %v3294_v12  ;;  %v3423_v48 = vor.u32 %v3605_v3, %v3422_v16  ;;  %v3539_v28 = vld [vmem:[%s5337_s2 + $0x184] sm:$0xf]  ;;  %v3262_v14 = vld [vmem:[%s5337_s2 + $0x240] sm:$0xf]  ;;  %v3565_v9 = vld [vmem:[%s5337_s2 + $0x24c] sm:$0xf0] }
 0x290   : > { %2644 = vmatpush.bf16.msra.mxu0 %v2975_v5  ;;  %2664 = vmatpush.bf16.msra.mxu2 %v3327_v52  ;;  %v4649_v2 = vsel %vm264_vm0, %v1823_v58, %v4538_v32  ;;  %v4662_v19 = vsel %vm264_vm0, %v1819_v63, %v4535_v27  ;;  %v4666_v32 = vsel %vm264_vm0, %v1831_v59, %v4492_v43  ;;  %v3601_v27 = vld [vmem:[%s5337_s2 + $0x36c] sm:$0xf0]  ;;  %v3507_v43 = vld [vmem:[%s5337_s2 + $0x84] sm:$0xf]  ;;  %v3390_v35 = vld [vmem:[%s5337_s2 + $0x340] sm:$0xf] }
 0x291   : > { %2677 = vmatpush.bf16.msra.mxu3 %v3455_v51  ;;  %2657 = vmatpush.bf16.msra.mxu1 %v3103_v44  ;;  %v4670_v56 = vsel %vm264_vm0, %v1827_v10, %v4487_v41  ;;  %v3059_v8 = vor.u32 %v3511_v46, %v3056_v26  ;;  %v3040_v41 = vld [vmem:[%s5337_s2 + $0x90] sm:$0xf0]  ;;  %v3187_v13 = vor.u32 %v3543_v4, %v3184_v37  ;;  %v3597_v47 = vld [vmem:[%s5337_s2 + $0x34c] sm:$0xf0]  ;;  %v3503_v55 = vld [vmem:[%s5337_s2 + $0x64] sm:$0xf] }
 0x292   : > { %v3279_v25 = vor.u32 %v3569_v20, %v3278_v17  ;;  %v3407_v62 = vor.u32 %v3601_v27, %v3406_v36  ;;  %v3043_v60 = vor.u32 %v3507_v43, %v3040_v41  ;;  %v3024_v1 = vld [vmem:[%s5337_s2 + $0x70] sm:$0xf0]  ;;  %v3171_v6 = vor.u32 %v3539_v28, %v3168_v42  ;;  %v3535_v23 = vld [vmem:[%s5337_s2 + $0x164] sm:$0xf]  ;;  %v3246_v29 = vld [vmem:[%s5337_s2 + $0x220] sm:$0xf] }
 0x293   : > { %v3263_v18 = vor.u32 %v3565_v9, %v3262_v14  ;;  %v3391_v34 = vor.u32 %v3597_v47, %v3390_v35  ;;  %v3152_v5 = vld [vmem:[%s5337_s2 + $0x170] sm:$0xf0]  ;;  %v3027_v30 = vor.u32 %v3503_v55, %v3024_v1  ;;  %v3561_v24 = vld [vmem:[%s5337_s2 + $0x22c] sm:$0xf0]  ;;  %v3374_v22 = vld [vmem:[%s5337_s2 + $0x320] sm:$0xf] }
 0x294   : > { %2689 = vmatpush.bf16.msrb.mxu0 %v3091_v33  ;;  %2665 = vmatpush.bf16.msra.mxu2 %v3311_v0  ;;  %v3593_v52 = vld [vmem:[%s5337_s2 + $0x32c] sm:$0xf0]  ;;  %v3499_v31 = vld [vmem:[%s5337_s2 + $0x44] sm:$0xf]  ;;  %v3008_v39 = vld [vmem:[%s5337_s2 + $0x50] sm:$0xf0]  ;;  %v3155_v50 = vor.u32 %v3535_v23, %v3152_v5  ;;  %v3247_v51 = vor.u32 %v3561_v24, %v3246_v29 }
 0x295   : > { %2702 = vmatpush.bf16.msrb.mxu1 %v3219_v53  ;;  %2678 = vmatpush.bf16.msra.mxu3 %v3439_v21  ;;  %v3375_v33 = vor.u32 %v3593_v52, %v3374_v22  ;;  %v3531_v45 = vld [vmem:[%s5337_s2 + $0x144] sm:$0xf]  ;;  %v3136_v7 = vld [vmem:[%s5337_s2 + $0x150] sm:$0xf0]  ;;  %v3230_v38 = vld [vmem:[%s5337_s2 + $0x200] sm:$0xf]  ;;  %v3011_v44 = vor.u32 %v3499_v31, %v3008_v39 }
 0x296   : > { %v3557_v11 = vld [vmem:[%s5337_s2 + $0x20c] sm:$0xf0]  ;;  %v3358_v49 = vld [vmem:[%s5337_s2 + $0x300] sm:$0xf]  ;;  %v3139_v10 = vor.u32 %v3531_v45, %v3136_v7  ;;  %v3495_v12 = vld [vmem:[%s5337_s2 + $0x24] sm:$0xf] }
 0x297   : > { %v3589_v40 = vld [vmem:[%s5337_s2 + $0x30c] sm:$0xf0]  ;;  %v3231_v58 = vor.u32 %v3557_v11, %v3230_v38  ;;  %v2992_v61 = vld [vmem:[%s5337_s2 + $0x30] sm:$0xf0]  ;;  %v3527_v59 = vld [vmem:[%s5337_s2 + $0x124] sm:$0xf] }
 0x298   : > { %2690 = vmatpush.bf16.msrb.mxu0 %v3075_v15  ;;  %2666 = vmatpush.bf16.msra.mxu2 %v3295_v54  ;;  %v3359_v53 = vor.u32 %v3589_v40, %v3358_v49  ;;  %v2995_v63 = vor.u32 %v3495_v12, %v2992_v61  ;;  %v3120_v0 = vld [vmem:[%s5337_s2 + $0x130] sm:$0xf0]  ;;  %v3583_v21 = vld [vmem:[%s5337_s2 + $0x2e4] sm:$0xf]  ;;  %v3522_v12 = vld [vmem:[%s5337_s2 + $0xf4] sm:$0xf0] }
 0x299   : > { %2703 = vmatpush.bf16.msrb.mxu1 %v3203_v57  ;;  %2679 = vmatpush.bf16.msra.mxu3 %v3423_v48  ;;  %v3344_v16 = vld [vmem:[%s5337_s2 + $0x2f0] sm:$0xf0]  ;;  %v3123_v3 = vor.u32 %v3527_v59, %v3120_v0  ;;  %v3615_v46 = vld [vmem:[%s5337_s2 + $0x3e4] sm:$0xf]  ;;  %v3222_v61 = vld [vmem:[%s5337_s2 + $0x1e8] sm:$0xf] }
 0x29a   : > { %v3347_v15 = vor.u32 %v3583_v21, %v3344_v16  ;;  %v3472_v26 = vld [vmem:[%s5337_s2 + $0x3f0] sm:$0xf0]  ;;  %v3491_v57 = vld [vmem:[%s5337_s2 + $0x4] sm:$0xf]  ;;  %v3554_v59 = vld [vmem:[%s5337_s2 + $0x1f4] sm:$0xf0] }
 0x29b   : > { %v3475_v54 = vor.u32 %v3615_v46, %v3472_v26  ;;  %v2976_v48 = vld [vmem:[%s5337_s2 + $0x10] sm:$0xf0]  ;;  %v3523_v4 = vld [vmem:[%s5337_s2 + $0x104] sm:$0xf]  ;;  %v3223_v26 = vor.u32 %v3554_v59, %v3222_v61  ;;  %v2982_v59 = vld [vmem:[%s5337_s2 + $0x8] sm:$0xf] }
 0x29c   : > { %2691 = vmatpush.bf16.msrb.mxu0 %v3059_v8  ;;  %2667 = vmatpush.bf16.msra.mxu2 %v3279_v25  ;;  %v3104_v37 = vld [vmem:[%s5337_s2 + $0x110] sm:$0xf0]  ;;  %v2979_v17 = vor.u32 %v3491_v57, %v2976_v48  ;;  %v3579_v20 = vld [vmem:[%s5337_s2 + $0x2c4] sm:$0xf]  ;;  %v3078_v57 = vld [vmem:[%s5337_s2 + $0xc8] sm:$0xf] }
 0x29d   : > { %2704 = vmatpush.bf16.msrb.mxu1 %v3187_v13  ;;  %2680 = vmatpush.bf16.msra.mxu3 %v3407_v62  ;;  %v3107_v8 = vor.u32 %v3523_v4, %v3104_v37  ;;  %v3328_v36 = vld [vmem:[%s5337_s2 + $0x2d0] sm:$0xf0]  ;;  %v3611_v27 = vld [vmem:[%s5337_s2 + $0x3c4] sm:$0xf]  ;;  %v3518_v4 = vld [vmem:[%s5337_s2 + $0xd4] sm:$0xf0] }
 0x29e   : > { %v3331_v43 = vor.u32 %v3579_v20, %v3328_v36  ;;  %v3456_v41 = vld [vmem:[%s5337_s2 + $0x3d0] sm:$0xf0]  ;;  %v3575_v25 = vld [vmem:[%s5337_s2 + $0x2a4] sm:$0xf]  ;;  %v3079_v37 = vor.u32 %v3518_v4, %v3078_v57  ;;  %v3514_v20 = vld [vmem:[%s5337_s2 + $0xb4] sm:$0xf0] }
 0x29f   : > { %v3459_v13 = vor.u32 %v3611_v27, %v3456_v41  ;;  %v3312_v62 = vld [vmem:[%s5337_s2 + $0x2b0] sm:$0xf0]  ;;  %v3607_v28 = vld [vmem:[%s5337_s2 + $0x3a4] sm:$0xf]  ;;  %v3190_v36 = vld [vmem:[%s5337_s2 + $0x1a8] sm:$0xf] }
 0x2a0   : > { %2692 = vmatpush.bf16.msrb.mxu0 %v3043_v60  ;;  %2668 = vmatpush.bf16.msra.mxu2 %v3263_v18  ;;  %v3440_v42 = vld [vmem:[%s5337_s2 + $0x3b0] sm:$0xf0]  ;;  %v3315_v14 = vor.u32 %v3575_v25, %v3312_v62  ;;  %v3571_v9 = vld [vmem:[%s5337_s2 + $0x284] sm:$0xf]  ;;  %v3546_v27 = vld [vmem:[%s5337_s2 + $0x1b4] sm:$0xf0] }
 0x2a1   : > { %2705 = vmatpush.bf16.msrb.mxu1 %v3171_v6  ;;  %2681 = vmatpush.bf16.msra.mxu3 %v3391_v34  ;;  %v3443_v60 = vor.u32 %v3607_v28, %v3440_v42  ;;  %v3296_v35 = vld [vmem:[%s5337_s2 + $0x290] sm:$0xf0]  ;;  %v3603_v47 = vld [vmem:[%s5337_s2 + $0x384] sm:$0xf]  ;;  %v3191_v41 = vor.u32 %v3546_v27, %v3190_v36  ;;  %v3510_v25 = vld [vmem:[%s5337_s2 + $0x94] sm:$0xf0] }
 0x2a2   : > { %v3424_v55 = vld [vmem:[%s5337_s2 + $0x390] sm:$0xf0]  ;;  %v3299_v1 = vor.u32 %v3571_v9, %v3296_v35  ;;  %v3567_v18 = vld [vmem:[%s5337_s2 + $0x264] sm:$0xf]  ;;  %v3174_v62 = vld [vmem:[%s5337_s2 + $0x188] sm:$0xf] }
 0x2a3   : > { %v3427_v6 = vor.u32 %v3603_v47, %v3424_v55  ;;  %v3280_v34 = vld [vmem:[%s5337_s2 + $0x270] sm:$0xf0]  ;;  %v3599_v23 = vld [vmem:[%s5337_s2 + $0x364] sm:$0xf]  ;;  %v3542_v28 = vld [vmem:[%s5337_s2 + $0x194] sm:$0xf0] }
 0x2a4   : > { %2693 = vmatpush.bf16.msrb.mxu0 %v3027_v30  ;;  %2669 = vmatpush.bf16.msra.mxu2 %v3247_v51  ;;  %v3408_v5 = vld [vmem:[%s5337_s2 + $0x370] sm:$0xf0]  ;;  %v3283_v29 = vor.u32 %v3567_v18, %v3280_v34  ;;  %v3563_v24 = vld [vmem:[%s5337_s2 + $0x244] sm:$0xf]  ;;  %v3506_v9 = vld [vmem:[%s5337_s2 + $0x74] sm:$0xf0] }
 0x2a5   : > { %2706 = vmatpush.bf16.msrb.mxu1 %v3155_v50  ;;  %2682 = vmatpush.bf16.msra.mxu3 %v3375_v33  ;;  %v3411_v30 = vor.u32 %v3599_v23, %v3408_v5  ;;  %v3264_v22 = vld [vmem:[%s5337_s2 + $0x250] sm:$0xf0]  ;;  %v3595_v52 = vld [vmem:[%s5337_s2 + $0x344] sm:$0xf]  ;;  %v3158_v35 = vld [vmem:[%s5337_s2 + $0x168] sm:$0xf] }
 0x2a6   : > { %v3392_v31 = vld [vmem:[%s5337_s2 + $0x350] sm:$0xf0]  ;;  %v3267_v39 = vor.u32 %v3563_v24, %v3264_v22  ;;  %v3559_v51 = vld [vmem:[%s5337_s2 + $0x224] sm:$0xf]  ;;  %v3538_v47 = vld [vmem:[%s5337_s2 + $0x174] sm:$0xf0] }
 0x2a7   : > { %v3395_v50 = vor.u32 %v3595_v52, %v3392_v31  ;;  %v3248_v33 = vld [vmem:[%s5337_s2 + $0x230] sm:$0xf0]  ;;  %v3591_v45 = vld [vmem:[%s5337_s2 + $0x324] sm:$0xf]  ;;  %v3502_v18 = vld [vmem:[%s5337_s2 + $0x54] sm:$0xf0] }
 0x2a8   : > { %2694 = vmatpush.bf16.msrb.mxu0 %v3011_v44  ;;  %2670 = vmatpush.bf16.msra.mxu2 %v3231_v58  ;;  %v3376_v7 = vld [vmem:[%s5337_s2 + $0x330] sm:$0xf0]  ;;  %v3251_v38 = vor.u32 %v3559_v51, %v3248_v33  ;;  %v3555_v11 = vld [vmem:[%s5337_s2 + $0x204] sm:$0xf]  ;;  %v3094_v58 = vld [vmem:[%s5337_s2 + $0xe8] sm:$0xf] }
 0x2a9   : > { %2707 = vmatpush.bf16.msrb.mxu1 %v3139_v10  ;;  %2683 = vmatpush.bf16.msra.mxu3 %v3359_v53  ;;  %v3379_v44 = vor.u32 %v3591_v45, %v3376_v7  ;;  %v3232_v49 = vld [vmem:[%s5337_s2 + $0x210] sm:$0xf0]  ;;  %v3587_v40 = vld [vmem:[%s5337_s2 + $0x304] sm:$0xf]  ;;  %v3095_v46 = vor.u32 %v3522_v12, %v3094_v58  ;;  %v3142_v23 = vld [vmem:[%s5337_s2 + $0x148] sm:$0xf] }
 0x2aa   : > { %v3360_v10 = vld [vmem:[%s5337_s2 + $0x310] sm:$0xf0]  ;;  %v3534_v5 = vld [vmem:[%s5337_s2 + $0x154] sm:$0xf0]  ;;  %v3478_v52 = vld [vmem:[%s5337_s2 + $0x3e8] sm:$0xf] }
 0x2ab   : > { %v3363_v16 = vor.u32 %v3587_v40, %v3360_v10  ;;  %v3586_v22 = vld [vmem:[%s5337_s2 + $0x2f4] sm:$0xf0]  ;;  %v3143_v33 = vor.u32 %v3534_v5, %v3142_v23  ;;  %v2998_v45 = vld [vmem:[%s5337_s2 + $0x28] sm:$0xf]  ;;  %v3224_v57 = vld [vmem:[%s5337_s2 + $0x1f8] sm:$0xf0] }
 0x2ac   : > { %2695 = vmatpush.bf16.msrb.mxu0 %v2995_v63  ;;  %2715 = vmatpush.bf16.msrb.mxu2 %v3347_v15  ;;  %v3235_v63 = vor.u32 %v3555_v11, %v3232_v49  ;;  %v3618_v31 = vld [vmem:[%s5337_s2 + $0x3f4] sm:$0xf0]  ;;  %v3334_v40 = vld [vmem:[%s5337_s2 + $0x2c8] sm:$0xf]  ;;  %v3516_v27 = vld [vmem:[%s5337_s2 + $0xcc] sm:$0xf] }
 0x2ad   : > { %2708 = vmatpush.bf16.msrb.mxu1 %v3123_v3  ;;  %2728 = vmatpush.bf16.msrb.mxu3 %v3475_v54  ;;  %v3498_v7 = vld [vmem:[%s5337_s2 + $0x34] sm:$0xf0]  ;;  %v3479_v49 = vor.u32 %v3618_v31, %v3478_v52  ;;  %v3462_v58 = vld [vmem:[%s5337_s2 + $0x3c8] sm:$0xf]  ;;  %v3508_v52 = vld [vmem:[%s5337_s2 + $0x8c] sm:$0xf] }
 0x2ae   : > { %v3582_v10 = vld [vmem:[%s5337_s2 + $0x2d4] sm:$0xf0]  ;;  %v2999_v12 = vor.u32 %v3498_v7, %v2998_v45  ;;  %v3318_v4 = vld [vmem:[%s5337_s2 + $0x2a8] sm:$0xf]  ;;  %v3048_v31 = vld [vmem:[%s5337_s2 + $0x98] sm:$0xf0] }
 0x2af   : > { %v3286_v23 = vld [vmem:[%s5337_s2 + $0x268] sm:$0xf]  ;;  %v3570_v5 = vld [vmem:[%s5337_s2 + $0x274] sm:$0xf0] }
 0x2b0   : > { %2696 = vmatpush.bf16.msrb.mxu0 %v2979_v17  ;;  %2716 = vmatpush.bf16.msrb.mxu2 %v3331_v43  ;;  %v3270_v45 = vld [vmem:[%s5337_s2 + $0x248] sm:$0xf]  ;;  %v3566_v7 = vld [vmem:[%s5337_s2 + $0x254] sm:$0xf0] }
 0x2b1   : > { %2709 = vmatpush.bf16.msrb.mxu1 %v3107_v8  ;;  %2729 = vmatpush.bf16.msrb.mxu3 %v3459_v13  ;;  %v3062_v8 = vld [vmem:[%s5337_s2 + $0xa8] sm:$0xf] }
 0x2b2   : > { %v3063_v43 = vor.u32 %v3514_v20, %v3062_v8  ;;  %v3046_v13 = vld [vmem:[%s5337_s2 + $0x88] sm:$0xf] }
 0x2b3   : > { %v3047_v42 = vor.u32 %v3510_v25, %v3046_v13  ;;  %v3548_v25 = vld [vmem:[%s5337_s2 + $0x1cc] sm:$0xf] }
 0x2b4   : > { %2717 = vmatpush.bf16.msrb.mxu2 %v3315_v14  ;;  %v3175_v14 = vor.u32 %v3542_v28, %v3174_v62  ;;  %v3208_v62 = vld [vmem:[%s5337_s2 + $0x1d8] sm:$0xf0]  ;;  %v3302_v28 = vld [vmem:[%s5337_s2 + $0x288] sm:$0xf] }
 0x2b5   : > { %2730 = vmatpush.bf16.msrb.mxu3 %v3443_v60  ;;  %v3030_v60 = vld [vmem:[%s5337_s2 + $0x68] sm:$0xf] }
 0x2b6   : > { %v3031_v55 = vor.u32 %v3506_v9, %v3030_v60  ;;  %v3606_v60 = vld [vmem:[%s5337_s2 + $0x394] sm:$0xf0] }
 0x2b8   : > { %2718 = vmatpush.bf16.msrb.mxu2 %v3299_v1  ;;  %v3159_v1 = vor.u32 %v3538_v47, %v3158_v35  ;;  %v3211_v35 = vor.u32 %v3548_v25, %v3208_v62  ;;  %v3512_v47 = vld [vmem:[%s5337_s2 + $0xac] sm:$0xf] }
 0x2b9   : > { %2731 = vmatpush.bf16.msrb.mxu3 %v3427_v6  ;;  %v3014_v6 = vld [vmem:[%s5337_s2 + $0x48] sm:$0xf]  ;;  %v3496_v25 = vld [vmem:[%s5337_s2 + $0x2c] sm:$0xf] }
 0x2bc   : > { %2719 = vmatpush.bf16.msrb.mxu2 %v3283_v29  ;;  %v3350_v29 = vld [vmem:[%s5337_s2 + $0x2e8] sm:$0xf] }
 0x2bd   : > { %2732 = vmatpush.bf16.msrb.mxu3 %v3411_v30  ;;  %v3351_v11 = vor.u32 %v3586_v22, %v3350_v29  ;;  %v3414_v29 = vld [vmem:[%s5337_s2 + $0x368] sm:$0xf] }
 0x2c0   : > { %2720 = vmatpush.bf16.msrb.mxu2 %v3267_v39  ;;  %v3015_v39 = vor.u32 %v3502_v18, %v3014_v6  ;;  %v3544_v18 = vld [vmem:[%s5337_s2 + $0x1ac] sm:$0xf] }
 0x2c1   : > { %2733 = vmatpush.bf16.msrb.mxu3 %v3395_v50 }
 0x2c4   : > { %2721 = vmatpush.bf16.msrb.mxu2 %v3251_v38 }
 0x2c5   : > { %2734 = vmatpush.bf16.msrb.mxu3 %v3379_v44 }
 0x2c8   : > { %2722 = vmatpush.bf16.msrb.mxu2 %v3235_v63  ;;  %v3494_v63 = vld [vmem:[%s5337_s2 + $0x14] sm:$0xf0] }
 0x2c9   : > { %2735 = vmatpush.bf16.msrb.mxu3 %v3363_v16  ;;  %v3335_v16 = vor.u32 %v3582_v10, %v3334_v40  ;;  %v3504_v40 = vld [vmem:[%s5337_s2 + $0x6c] sm:$0xf]  ;;  %v3032_v10 = vld [vmem:[%s5337_s2 + $0x78] sm:$0xf0] }
 0x2e9   : > { %v3669_v53 = vpop.permute.xlu2 %3668 }
 0x2ea   : > { %v3671_v0 = vunpack.i.h.bf16 %v3669_v53  ;;  %v3670_v21 = vunpack.i.l.bf16 %v3669_v53  ;;  %v3614_v53 = vld [vmem:[%s5337_s2 + $0x3d4] sm:$0xf0] }
 0x2ec   : > { %v1852_v3 = vsel %vm1171_vm1, %v4649_v2, %v3671_v0  ;;  %v1851_v15 = vsel %vm1171_vm1, %v4662_v19, %v3670_v21  ;;  %v3206_v2 = vld [vmem:[%s5337_s2 + $0x1c8] sm:$0xf]  ;;  %v3550_v19 = vld [vmem:[%s5337_s2 + $0x1d4] sm:$0xf0] }
 0x2ed   : > { %v4892_v54 = vpack.c.bf16 %v1852_v3, %v1852_v3  ;;  %v4894_v48 = vpack.c.bf16 %v1851_v15, %v1851_v15  ;;  %v3207_v17 = vor.u32 %v3550_v19, %v3206_v2  ;;  %v3110_v0 = vld [vmem:[%s5337_s2 + $0x108] sm:$0xf]  ;;  %v3526_v21 = vld [vmem:[%s5337_s2 + $0x114] sm:$0xf0]  ;;  %v3463_v3 = vor.u32 %v3614_v53, %v3462_v58  ;;  %v3520_v15 = vld [vmem:[%s5337_s2 + $0xec] sm:$0xf] }
 0x2ee   : > { %v3578_v2 = vld [vmem:[%s5337_s2 + $0x2b4] sm:$0xf0]  ;;  %v3446_v19 = vld [vmem:[%s5337_s2 + $0x3a8] sm:$0xf]  ;;  %v3111_v8 = vor.u32 %v3526_v21, %v3110_v0  ;;  %v3271_v58 = vor.u32 %v3566_v7, %v3270_v45 }
 0x2ef   : > { %2645 = vmatmul.bf16.vlgmr.msra.gmra.mxu0 %v4894_v48  ;;  %2658 = vmatmul.bf16.vlgmr.msra.gmra.mxu1 %v4892_v54  ;;  %v3382_v0 = vld [vmem:[%s5337_s2 + $0x328] sm:$0xf]  ;;  %v3594_v21 = vld [vmem:[%s5337_s2 + $0x334] sm:$0xf0] }
 0x2f0   : > { %2741 = vmatpush.bf16.msra.mxu0 %v3095_v46  ;;  %2754 = vmatpush.bf16.msra.mxu1 %v3223_v26  ;;  %v3096_v46 = vld [vmem:[%s5337_s2 + $0xf8] sm:$0xf0]  ;;  %v3552_v26 = vld [vmem:[%s5337_s2 + $0x1ec] sm:$0xf] }
 0x2f1   : > { %v3099_v20 = vor.u32 %v3520_v15, %v3096_v46  ;;  %v3227_v36 = vor.u32 %v3552_v26, %v3224_v57  ;;  %v3500_v15 = vld [vmem:[%s5337_s2 + $0x4c] sm:$0xf]  ;;  %v3016_v46 = vld [vmem:[%s5337_s2 + $0x58] sm:$0xf0] }
 0x2f2   : > { %v3532_v26 = vld [vmem:[%s5337_s2 + $0x14c] sm:$0xf] }
 0x2f4   : > { %2742 = vmatpush.bf16.msra.mxu0 %v3079_v37  ;;  %2755 = vmatpush.bf16.msra.mxu1 %v3207_v17  ;;  %v3610_v37 = vld [vmem:[%s5337_s2 + $0x3b4] sm:$0xf0]  ;;  %v2983_v17 = vor.u32 %v3494_v63, %v2982_v59  ;;  %v3254_v59 = vld [vmem:[%s5337_s2 + $0x228] sm:$0xf] }
 0x2f5   : > { %v3447_v13 = vor.u32 %v3610_v37, %v3446_v19  ;;  %v3562_v63 = vld [vmem:[%s5337_s2 + $0x234] sm:$0xf0]  ;;  %v3238_v19 = vld [vmem:[%s5337_s2 + $0x208] sm:$0xf] }
 0x2f6   : > { %v3255_v57 = vor.u32 %v3562_v63, %v3254_v59  ;;  %v3558_v37 = vld [vmem:[%s5337_s2 + $0x214] sm:$0xf0] }
 0x2f7   : > { %v3239_v62 = vor.u32 %v3558_v37, %v3238_v19  ;;  %v3556_v19 = vld [vmem:[%s5337_s2 + $0x20c] sm:$0xf]  ;;  %v3240_v37 = vld [vmem:[%s5337_s2 + $0x218] sm:$0xf0] }
 0x2f8   : > { %2743 = vmatpush.bf16.msra.mxu0 %v3063_v43  ;;  %2756 = vmatpush.bf16.msra.mxu1 %v3191_v41  ;;  %v3080_v43 = vld [vmem:[%s5337_s2 + $0xd8] sm:$0xf0]  ;;  %v3319_v41 = vor.u32 %v3578_v2, %v3318_v4  ;;  %v3383_v4 = vor.u32 %v3594_v21, %v3382_v0  ;;  %v3596_v0 = vld [vmem:[%s5337_s2 + $0x34c] sm:$0xf] }
 0x2f9   : > { %v3083_v9 = vor.u32 %v3516_v27, %v3080_v43  ;;  %v3144_v2 = vld [vmem:[%s5337_s2 + $0x158] sm:$0xf0]  ;;  %v3616_v27 = vld [vmem:[%s5337_s2 + $0x3ec] sm:$0xf] }
 0x2fa   : > { %v3480_v43 = vld [vmem:[%s5337_s2 + $0x3f8] sm:$0xf0] }
 0x2fb   : > { %v3400_v21 = vld [vmem:[%s5337_s2 + $0x358] sm:$0xf0] }
 0x2fc   : > { %2744 = vmatpush.bf16.msra.mxu0 %v3047_v42  ;;  %2757 = vmatpush.bf16.msra.mxu1 %v3175_v14  ;;  %v3574_v42 = vld [vmem:[%s5337_s2 + $0x294] sm:$0xf0]  ;;  %v3430_v14 = vld [vmem:[%s5337_s2 + $0x388] sm:$0xf] }
 0x2fd   : > { %v3664_v34 = vpop.permute.xlu1 %3663  ;;  %v3431_v6 = vor.u32 %v3606_v60, %v3430_v14  ;;  %v3528_v14 = vld [vmem:[%s5337_s2 + $0x12c] sm:$0xf]  ;;  %v3128_v60 = vld [vmem:[%s5337_s2 + $0x138] sm:$0xf0] }
 0x2fe   : > { %v3666_v30 = vunpack.i.h.bf16 %v3664_v34  ;;  %v3665_v24 = vunpack.i.l.bf16 %v3664_v34  ;;  %v3192_v34 = vld [vmem:[%s5337_s2 + $0x1b8] sm:$0xf0] }
 0x2ff   : > { %2697 = vmatmul.bf16.vlgmr.msrb.gmra.mxu0 %v4894_v48  ;;  %2710 = vmatmul.bf16.vlgmr.msrb.gmra.mxu1 %v4892_v54  ;;  %v3195_v22 = vor.u32 %v3544_v18, %v3192_v34  ;;  %v3131_v34 = vor.u32 %v3528_v14, %v3128_v60 }
 0x300   : > { %2745 = vmatpush.bf16.msra.mxu0 %v3031_v55  ;;  %2758 = vmatpush.bf16.msra.mxu1 %v3159_v1  ;;  %v1854_v50 = vsel %vm1171_vm1, %v4666_v32, %v3666_v30  ;;  %v1853_v51 = vsel %vm1171_vm1, %v4670_v56, %v3665_v24  ;;  %v3126_v32 = vld [vmem:[%s5337_s2 + $0x128] sm:$0xf]  ;;  %v3530_v56 = vld [vmem:[%s5337_s2 + $0x134] sm:$0xf0]  ;;  %v3064_v55 = vld [vmem:[%s5337_s2 + $0xb8] sm:$0xf0]  ;;  %v3303_v1 = vor.u32 %v3574_v42, %v3302_v28 }
 0x301   : > { %v4979_v38 = vpack.c.bf16 %v1854_v50, %v1854_v50  ;;  %v4981_v44 = vpack.c.bf16 %v1853_v51, %v1853_v51  ;;  %v3127_v61 = vor.u32 %v3530_v56, %v3126_v32  ;;  %v3602_v30 = vld [vmem:[%s5337_s2 + $0x374] sm:$0xf0]  ;;  %v3067_v24 = vor.u32 %v3512_v47, %v3064_v55  ;;  %v3540_v51 = vld [vmem:[%s5337_s2 + $0x18c] sm:$0xf]  ;;  %v3398_v32 = vld [vmem:[%s5337_s2 + $0x348] sm:$0xf] }
 0x302   : > { %v3415_v50 = vor.u32 %v3602_v30, %v3414_v29  ;;  %v3598_v56 = vld [vmem:[%s5337_s2 + $0x354] sm:$0xf0]  ;;  %v3000_v42 = vld [vmem:[%s5337_s2 + $0x38] sm:$0xf0]  ;;  %v3580_v47 = vld [vmem:[%s5337_s2 + $0x2cc] sm:$0xf] }
 0x303   : > { %2671 = vmatmul.bf16.vlgmr.msra.gmra.mxu2 %v4981_v44  ;;  %2684 = vmatmul.bf16.vlgmr.msra.gmra.mxu3 %v4979_v38  ;;  %v3399_v53 = vor.u32 %v3598_v56, %v3398_v32  ;;  %v3336_v55 = vld [vmem:[%s5337_s2 + $0x2d8] sm:$0xf0]  ;;  %v3003_v18 = vor.u32 %v3496_v25, %v3000_v42  ;;  %v3524_v29 = vld [vmem:[%s5337_s2 + $0x10c] sm:$0xf]  ;;  %v1987_v25 = vld [vmem:[%s5338_s3] sm:$0xf] }
 0x304   : > { %2746 = vmatpush.bf16.msra.mxu0 %v3015_v39  ;;  %2759 = vmatpush.bf16.msra.mxu1 %v3143_v33  ;;  %v3287_v39 = vor.u32 %v3570_v5, %v3286_v23  ;;  %v3176_v33 = vld [vmem:[%s5337_s2 + $0x198] sm:$0xf0]  ;;  %v3492_v23 = vld [vmem:[%s5337_s2 + $0xc] sm:$0xf]  ;;  %v1989_v42 = vperm.slane %v1987_v25, 0 }
 0x305   : > { %2767 = vmatpush.bf16.msra.mxu2 %v3351_v11  ;;  %2780 = vmatpush.bf16.msra.mxu3 %v3479_v49  ;;  %v3051_v11 = vor.u32 %v3508_v52, %v3048_v31  ;;  %v3179_v49 = vor.u32 %v3540_v51, %v3176_v33  ;;  %v2984_v5 = vld [vmem:[%s5337_s2 + $0x18] sm:$0xf0]  ;;  %v3576_v52 = vld [vmem:[%s5337_s2 + $0x2ac] sm:$0xf] }
 0x306   : > { %v3112_v30 = vld [vmem:[%s5337_s2 + $0x118] sm:$0xf0]  ;;  %v2987_v51 = vor.u32 %v3492_v23, %v2984_v5  ;;  %v3572_v32 = vld [vmem:[%s5337_s2 + $0x28c] sm:$0xf] }
 0x307   : > { %v3320_v31 = vld [vmem:[%s5337_s2 + $0x2b8] sm:$0xf0]  ;;  %v3115_v33 = vor.u32 %v3524_v29, %v3112_v30 }
 0x308   : > { %2747 = vmatpush.bf16.msra.mxu0 %v2999_v12  ;;  %2760 = vmatpush.bf16.msra.mxu1 %v3127_v61  ;;  %v3536_v12 = vld [vmem:[%s5337_s2 + $0x16c] sm:$0xf]  ;;  %v3160_v61 = vld [vmem:[%s5337_s2 + $0x178] sm:$0xf0]  ;;  %v3323_v45 = vor.u32 %v3576_v52, %v3320_v31 }
 0x309   : > { %2768 = vmatpush.bf16.msra.mxu2 %v3335_v16  ;;  %2781 = vmatpush.bf16.msra.mxu3 %v3463_v3  ;;  %v3035_v16 = vor.u32 %v3504_v40, %v3032_v10  ;;  %v3163_v3 = vor.u32 %v3536_v12, %v3160_v61  ;;  %v3304_v56 = vld [vmem:[%s5337_s2 + $0x298] sm:$0xf0]  ;;  %v3600_v12 = vld [vmem:[%s5337_s2 + $0x36c] sm:$0xf] }
 0x30a   : > { %v3307_v40 = vor.u32 %v3572_v32, %v3304_v56  ;;  %v3416_v61 = vld [vmem:[%s5337_s2 + $0x378] sm:$0xf0] }
 0x30b   : > { %v3419_v63 = vor.u32 %v3600_v12, %v3416_v61 }
 0x30c   : > { %2748 = vmatpush.bf16.msra.mxu0 %v2983_v17  ;;  %2761 = vmatpush.bf16.msra.mxu1 %v3111_v8  ;;  %v3366_v17 = vld [vmem:[%s5337_s2 + $0x308] sm:$0xf]  ;;  %v3590_v8 = vld [vmem:[%s5337_s2 + $0x314] sm:$0xf0] }
 0x30d   : > { %2769 = vmatpush.bf16.msra.mxu2 %v3319_v41  ;;  %2782 = vmatpush.bf16.msra.mxu3 %v3447_v13  ;;  %v3019_v41 = vor.u32 %v3500_v15, %v3016_v46  ;;  %v3147_v13 = vor.u32 %v3532_v26, %v3144_v2  ;;  %v3367_v28 = vor.u32 %v3590_v8, %v3366_v17  ;;  %v3560_v15 = vld [vmem:[%s5337_s2 + $0x22c] sm:$0xf]  ;;  %v3256_v46 = vld [vmem:[%s5337_s2 + $0x238] sm:$0xf0] }
 0x30e   : > { %v3592_v26 = vld [vmem:[%s5337_s2 + $0x32c] sm:$0xf]  ;;  %v3368_v8 = vld [vmem:[%s5337_s2 + $0x318] sm:$0xf0] }
 0x30f   : > { %2749 = vmatmul.bf16.vlgmr.msra.gmra.mxu0 %v4894_v48  ;;  %2762 = vmatmul.bf16.vlgmr.msra.gmra.mxu1 %v4892_v54  ;;  %v3588_v17 = vld [vmem:[%s5337_s2 + $0x30c] sm:$0xf] }
 0x310   : > { %2793 = vmatpush.bf16.msrb.mxu0 %v3099_v20  ;;  %2806 = vmatpush.bf16.msrb.mxu1 %v3227_v36  ;;  %v3584_v20 = vld [vmem:[%s5337_s2 + $0x2ec] sm:$0xf]  ;;  %v3352_v36 = vld [vmem:[%s5337_s2 + $0x2f8] sm:$0xf0] }
 0x311   : > { %2770 = vmatpush.bf16.msra.mxu2 %v3303_v1  ;;  %2783 = vmatpush.bf16.msra.mxu3 %v3431_v6  ;;  %v3612_v1 = vld [vmem:[%s5337_s2 + $0x3cc] sm:$0xf]  ;;  %v3464_v6 = vld [vmem:[%s5337_s2 + $0x3d8] sm:$0xf0] }
 0x313   : > { %2723 = vmatmul.bf16.vlgmr.msrb.gmra.mxu2 %v4981_v44  ;;  %2736 = vmatmul.bf16.vlgmr.msrb.gmra.mxu3 %v4979_v38 }
 0x314   : > { %2794 = vmatpush.bf16.msrb.mxu0 %v3083_v9  ;;  %2807 = vmatpush.bf16.msrb.mxu1 %v3211_v35  ;;  %v3355_v9 = vor.u32 %v3584_v20, %v3352_v36  ;;  %v3483_v35 = vor.u32 %v3616_v27, %v3480_v43  ;;  %v3243_v20 = vor.u32 %v3556_v19, %v3240_v37 }
 0x315   : > { %2771 = vmatpush.bf16.msra.mxu2 %v3287_v39  ;;  %2784 = vmatpush.bf16.msra.mxu3 %v3415_v50  ;;  %v3608_v39 = vld [vmem:[%s5337_s2 + $0x3ac] sm:$0xf]  ;;  %v3448_v50 = vld [vmem:[%s5337_s2 + $0x3b8] sm:$0xf0]  ;;  %v3371_v36 = vor.u32 %v3588_v17, %v3368_v8 }
 0x316   : > { %v3451_v7 = vor.u32 %v3608_v39, %v3448_v50 }
 0x318   : > { %2795 = vmatpush.bf16.msrb.mxu0 %v3067_v24  ;;  %2808 = vmatpush.bf16.msrb.mxu1 %v3195_v22  ;;  %v3339_v24 = vor.u32 %v3580_v47, %v3336_v55  ;;  %v3467_v22 = vor.u32 %v3612_v1, %v3464_v6 }
 0x319   : > { %2772 = vmatpush.bf16.msra.mxu2 %v3271_v58  ;;  %2785 = vmatpush.bf16.msra.mxu3 %v3399_v53  ;;  %v3568_v58 = vld [vmem:[%s5337_s2 + $0x26c] sm:$0xf]  ;;  %v3288_v53 = vld [vmem:[%s5337_s2 + $0x278] sm:$0xf0] }
 0x31a   : > { %v3291_v59 = vor.u32 %v3568_v58, %v3288_v53 }
 0x31c   : > { %2796 = vmatpush.bf16.msrb.mxu0 %v3051_v11  ;;  %2809 = vmatpush.bf16.msrb.mxu1 %v3179_v49  ;;  %v3604_v11 = vld [vmem:[%s5337_s2 + $0x38c] sm:$0xf]  ;;  %v3432_v49 = vld [vmem:[%s5337_s2 + $0x398] sm:$0xf0] }
 0x31d   : > { %2773 = vmatpush.bf16.msra.mxu2 %v3255_v57  ;;  %2786 = vmatpush.bf16.msra.mxu3 %v3383_v4  ;;  %v3435_v10 = vor.u32 %v3604_v11, %v3432_v49  ;;  %v3384_v57 = vld [vmem:[%s5337_s2 + $0x338] sm:$0xf0]  ;;  %v3259_v4 = vor.u32 %v3560_v15, %v3256_v46 }
 0x31e   : > { %v3387_v2 = vor.u32 %v3592_v26, %v3384_v57 }
 0x320   : > { %2797 = vmatpush.bf16.msrb.mxu0 %v3035_v16  ;;  %2810 = vmatpush.bf16.msrb.mxu1 %v3163_v3  ;;  %v3403_v3 = vor.u32 %v3596_v0, %v3400_v21 }
 0x321   : > { %2774 = vmatpush.bf16.msra.mxu2 %v3239_v62  ;;  %2787 = vmatpush.bf16.msra.mxu3 %v3367_v28 }
 0x324   : > { %2798 = vmatpush.bf16.msrb.mxu0 %v3019_v41  ;;  %2811 = vmatpush.bf16.msrb.mxu1 %v3147_v13 }
 0x325   : > { %2819 = vmatpush.bf16.msrb.mxu2 %v3355_v9  ;;  %2832 = vmatpush.bf16.msrb.mxu3 %v3483_v35 }
 0x326   : > { %2775 = vmatmul.bf16.vlgmr.msra.gmra.mxu2 %v4981_v44  ;;  %2788 = vmatmul.bf16.vlgmr.msra.gmra.mxu3 %v4979_v38 }
 0x328   : > { %2799 = vmatpush.bf16.msrb.mxu0 %v3003_v18  ;;  %2812 = vmatpush.bf16.msrb.mxu1 %v3131_v34  ;;  %v1990_v18 = vperm.slane %v1987_v25, 1 }
 0x329   : > { %2820 = vmatpush.bf16.msrb.mxu2 %v3339_v24  ;;  %2833 = vmatpush.bf16.msrb.mxu3 %v3467_v22 }
 0x32c   : > { %2800 = vmatpush.bf16.msrb.mxu0 %v2987_v51  ;;  %2813 = vmatpush.bf16.msrb.mxu1 %v3115_v33  ;;  %v1991_v33 = vperm.slane %v1987_v25, 2 }
 0x32d   : > { %2821 = vmatpush.bf16.msrb.mxu2 %v3323_v45  ;;  %2834 = vmatpush.bf16.msrb.mxu3 %v3451_v7 }
 0x32f   : > { %2801 = vmatmul.bf16.vlgmr.msrb.gmra.mxu0 %v4894_v48  ;;  %2814 = vmatmul.bf16.vlgmr.msrb.gmra.mxu1 %v4892_v54  ;;  %v3564_v54 = vld [vmem:[%s5337_s2 + $0x24c] sm:$0xf]  ;;  %v3272_v48 = vld [vmem:[%s5337_s2 + $0x258] sm:$0xf0] }
 0x330   : > { %v3275_v16 = vor.u32 %v3564_v54, %v3272_v48 }
 0x331   : > { %2822 = vmatpush.bf16.msrb.mxu2 %v3307_v40  ;;  %2835 = vmatpush.bf16.msrb.mxu3 %v3435_v10 }
 0x335   : > { %2823 = vmatpush.bf16.msrb.mxu2 %v3291_v59  ;;  %2836 = vmatpush.bf16.msrb.mxu3 %v3419_v63  ;;  %v1992_v59 = vperm.slane %v1987_v25, 3 }
 0x339   : > { %2824 = vmatpush.bf16.msrb.mxu2 %v3275_v16  ;;  %2837 = vmatpush.bf16.msrb.mxu3 %v3403_v3 }
 0x33d   : > { %2825 = vmatpush.bf16.msrb.mxu2 %v3259_v4  ;;  %2838 = vmatpush.bf16.msrb.mxu3 %v3387_v2 }
 0x341   : > { %2826 = vmatpush.bf16.msrb.mxu2 %v3243_v20  ;;  %2839 = vmatpush.bf16.msrb.mxu3 %v3371_v36 }
 0x344   : > { %2827 = vmatmul.bf16.vlgmr.msrb.gmra.mxu2 %v4981_v44  ;;  %2840 = vmatmul.bf16.vlgmr.msrb.gmra.mxu3 %v4979_v38 }
 0x36c   : > { %v2646_v27 = vpop.f32.mrf.mxu0  ;;  %v2659_v43 = vpop.f32.mrf.mxu1 }
 0x36d   : > { %v2647_v14 = vadd.f32 %v2646_v27, %v1989_v42 }
 0x36f   : > { %v2660_v35 = vadd.f32 %v2659_v43, %v2647_v14 }
 0x374   : > { %v2648_v41 = vpop.f32.mrf.mxu0  ;;  %v2661_v13 = vpop.f32.mrf.mxu1 }
 0x37c   : > { %v2698_v62 = vpop.f32.mrf.mxu0  ;;  %v2711_v28 = vpop.f32.mrf.mxu1 }
 0x37d   : > { %v2699_v5 = vadd.f32 %v2698_v62, %v1990_v18 }
 0x37f   : > { %v2712_v24 = vadd.f32 %v2711_v28, %v2699_v5 }
 0x384   : > { %v2700_v60 = vpop.f32.mrf.mxu0  ;;  %v2713_v9 = vpop.f32.mrf.mxu1 }
 0x386   : > { %v2672_v44 = vpop.f32.mrf.mxu2  ;;  %v2685_v38 = vpop.f32.mrf.mxu3 }
 0x387   : > { %v2673_v47 = vadd.f32 %v2672_v44, %v2660_v35 }
 0x389   : > { %v2686_v55 = vadd.f32 %v2685_v38, %v2673_v47 }
 0x38b   : > { %2845 = vst [vmem:[%s5295_s5] sm:$0xff] %v2686_v55 }
 0x38c   : > { %v2750_v1 = vpop.f32.mrf.mxu0  ;;  %v2763_v6 = vpop.f32.mrf.mxu1 }
 0x38d   : > { %v2751_v45 = vadd.f32 %v2750_v1, %v1991_v33 }
 0x38e   : > { %v2674_v34 = vpop.f32.mrf.mxu2  ;;  %v2687_v23 = vpop.f32.mrf.mxu3 }
 0x38f   : > { %v2764_v7 = vadd.f32 %v2763_v6, %v2751_v45 }
 0x394   : > { %v2752_v29 = vpop.f32.mrf.mxu0  ;;  %v2765_v30 = vpop.f32.mrf.mxu1 }
 0x396   : > { %v2724_v22 = vpop.f32.mrf.mxu2  ;;  %v2737_v52 = vpop.f32.mrf.mxu3 }
 0x397   : > { %v2725_v31 = vadd.f32 %v2724_v22, %v2712_v24 }
 0x399   : > { %v2738_v39 = vadd.f32 %v2737_v52, %v2725_v31 }
 0x39b   : > { %2846 = vst [vmem:[%s5295_s5 + $0x8] sm:$0xff] %v2738_v39 }
 0x39e   : > { %v2726_v50 = vpop.f32.mrf.mxu2  ;;  %v2739_v51 = vpop.f32.mrf.mxu3 }
 0x3a9   : > { %v2776_v11 = vpop.f32.mrf.mxu2  ;;  %v2789_v49 = vpop.f32.mrf.mxu3 }
 0x3aa   : > { %v2777_v40 = vadd.f32 %v2776_v11, %v2764_v7 }
 0x3ac   : > { %v2802_v32 = vpop.f32.mrf.mxu0  ;;  %v2815_v56 = vpop.f32.mrf.mxu1  ;;  %v2790_v10 = vadd.f32 %v2789_v49, %v2777_v40 }
 0x3ad   : > { %v2803_v63 = vadd.f32 %v2802_v32, %v1992_v59 }
 0x3ae   : > { %2847 = vst [vmem:[%s5295_s5 + $0x10] sm:$0xff] %v2790_v10 }
 0x3af   : > { %v2816_v54 = vadd.f32 %v2815_v56, %v2803_v63 }
 0x3b1   : > { %v2778_v12 = vpop.f32.mrf.mxu2  ;;  %v2791_v61 = vpop.f32.mrf.mxu3 }
 0x3b4   : > { %v2804_v58 = vpop.f32.mrf.mxu0  ;;  %v2817_v53 = vpop.f32.mrf.mxu1 }
 0x3c7   : > { %v2828_v48 = vpop.f32.mrf.mxu2  ;;  %v2841_v0 = vpop.f32.mrf.mxu3 }
 0x3c8   : > { %v2829_v21 = vadd.f32 %v2828_v48, %v2816_v54 }
 0x3ca   : > { %v2842_v16 = vadd.f32 %v2841_v0, %v2829_v21 }
 0x3cc   : > { %2848 = vst [vmem:[%s5295_s5 + $0x18] sm:$0xff] %v2842_v16 }
 0x3cd   : > { %3731 = shalt.err (!%p3728_p3)
}
 0x3ce   : > { %3620 = dma.vmem_to_hbm [thread:$0]  (%p3834_p5), %s2864_s11, 512, %s2866_s12, %s2850_s13  }
 0x3cf   : > { %v2830_v3 = vpop.f32.mrf.mxu2  ;;  %v2843_v15 = vpop.f32.mrf.mxu3 }
 0x3d0 PF: > { %p3626_p4 = scmp.ge.s32.totalorder %s3766_s18, 2  ;;  %s2877_s28 = sand.u32 1, %s3754_s15  }
 0x3d1   : > { %s2878_s29 = scalar_lea.sflag [#allocation3], %s2877_s28 }
 0x3d2   : > { %p3623_p7 = pnand %p3626_p4, %p3838_p6 }
 0x3d4   : > { %p3624_p8 = pneg %p3623_p7 }
 0x3d6   : > { %3749 = dma.done.wait (%p3624_p8), %s2878_s29, 512  }
 0x3d7   : > { %3751 = vsyncadd (%p3624_p8), %s2878_s29, 4294966784  ;;  %p14_p5 = scmp.ge.s32.totalorder %s3821_s21, 4   ;;  %s5342_s15 = smov %s3758_s16 }
 0x3d8   : > { %s5343_s16 = smov %s3762_s17  ;;  %s5344_s17 = smov %s3832_s24 }
 0x3d9   : > { %s5345_s18 = smov %s3821_s21  ;;  %16 = sbr.rel (!%p14_p5) target bundleno = 3 (0x3), region = 74 }
 0x3de   :  { %2884 = vsyncpa [#allocation3], 1 }
 0x3df   :  { %2886 = vsyncpa [#allocation3 + $0x1], 1 }

</bundles_post_ra>
